<compile_context>
chip_gen: v6e
topology: v6e:2x2x1
jax: 0.10.0
libtpu: 0.0.40
codegen_flags: <defaults>
</compile_context>

<pallas_src>
import functools

import jax
import jax.numpy as jnp
import numpy as np
from jax.experimental import pallas as pl
from jax.experimental.pallas import tpu as pltpu

NEG_SLOPE = 0.01   # PyTorch nn.LeakyReLU default negative_slope
OUT_PAD = 128      # lane-dense padded width for the 1-wide output head


def _leaky_relu(h):
    return jnp.where(h > 0, h, NEG_SLOPE * h)


def _sigmoid(z):
    return 1.0 / (1.0 + jnp.exp(-z))


def discriminator_kernel(
    xin_ref,                 # (TB, 9)     f32  -- cat([x, label], 1)
    w1_ref, b1_ref,          # (9, 1024)   bf16, (1, 1024) f32
    w2_ref, b2_ref,          # (1024, 512) bf16, (1, 512)  f32
    w3_ref, b3_ref,          # (512, 256)  bf16, (1, 256)  f32
    w4_ref, b4_ref,          # (256, 128)  bf16 (zero-padded from width 1), (1, 128) f32
    out_ref,                 # (TB, 128)   f32  -- real output in lane 0
):
    xin = xin_ref[...]

    # layer1 + LeakyReLU: bf16 operands on the MXU, f32 accumulation; bias add
    # and activation stay in f32 on the VPU (v5e has no bf16 VALU).
    h = jnp.dot(xin.astype(jnp.bfloat16), w1_ref[...],
                preferred_element_type=jnp.float32) + b1_ref[...]
    h = _leaky_relu(h)

    # layer2 + LeakyReLU
    h = jnp.dot(h.astype(jnp.bfloat16), w2_ref[...],
                preferred_element_type=jnp.float32) + b2_ref[...]
    h = _leaky_relu(h)

    # layer3 + LeakyReLU
    h = jnp.dot(h.astype(jnp.bfloat16), w3_ref[...],
                preferred_element_type=jnp.float32) + b3_ref[...]
    h = _leaky_relu(h)

    # layer4 + sigmoid, written as a lane-dense (TB, 128) slab. Lanes 1..127
    # come from zero-padded weight columns (value sigmoid(0)=0.5) and are
    # sliced off in the wrapper.
    z = jnp.dot(h.astype(jnp.bfloat16), w4_ref[...],
                preferred_element_type=jnp.float32) + b4_ref[...]
    out_ref[...] = _sigmoid(z)


def init_params(key):
    """Deterministic init mimicking torch.nn.Linear (uniform +-1/sqrt(fan_in)).

    Weights stored (in, out) so the kernel computes x @ W + b (identical to
    PyTorch's x @ W.T with its (out, in) storage)."""
    def linear(key, fan_in, fan_out):
        kw, kb = jax.random.split(key)
        bound = 1.0 / np.sqrt(fan_in)
        w = jax.random.uniform(kw, (fan_in, fan_out), jnp.float32, -bound, bound)
        b = jax.random.uniform(kb, (1, fan_out), jnp.float32, -bound, bound)
        return w, b

    keys = jax.random.split(key, 4)
    w1, b1 = linear(keys[0], 9, 1024)     # layer1
    w2, b2 = linear(keys[1], 1024, 512)   # layer2
    w3, b3 = linear(keys[2], 512, 256)    # layer3
    w4, b4 = linear(keys[3], 256, 1)      # layer4

    # Zero-pad the 1-wide head to a full 128-lane slab (lane-dense stores).
    w4p = jnp.zeros((256, OUT_PAD), jnp.float32).at[:, :1].set(w4)
    b4p = jnp.zeros((1, OUT_PAD), jnp.float32).at[:, :1].set(b4)

    # bf16 weights halve HBM weight traffic and use the MXU's native bf16 path;
    # biases stay f32 (added post-accumulation).
    return dict(
        w1=w1.astype(jnp.bfloat16), b1=b1,
        w2=w2.astype(jnp.bfloat16), b2=b2,
        w3=w3.astype(jnp.bfloat16), b3=b3,
        w4=w4p.astype(jnp.bfloat16), b4=b4p,
    )


@functools.partial(jax.jit, static_argnames=("tile_b",))
def discriminator_forward(x, label, params, tile_b=128):
    B = x.shape[0]
    assert B % tile_b == 0, (B, tile_b)

    # Tiny concat done in the wrapper: pure layout plumbing, keeps the kernel's
    # first dot a single (TB, 9) x (9, 1024) matmul.
    xin = jnp.concatenate([x, label], axis=1)  # (B, 9)

    weight_order = ["w1", "b1", "w2", "b2", "w3", "b3", "w4", "b4"]
    weights = [params[k] for k in weight_order]

    grid = (B // tile_b,)
    # Grid-invariant weights: full-array blocks with a constant index map, so
    # they are fetched once and revisited across batch tiles.
    weight_specs = [pl.BlockSpec(w.shape, lambda i: (0, 0)) for w in weights]

    flops = 2 * B * (9 * 1024 + 1024 * 512 + 512 * 256 + 256 * OUT_PAD)
    bytes_accessed = (
        sum(int(np.prod(w.shape)) * w.dtype.itemsize for w in weights)
        + B * 9 * 4 + B * OUT_PAD * 4
    )

    out_pad = pl.pallas_call(
        discriminator_kernel,
        grid=grid,
        in_specs=[pl.BlockSpec((tile_b, 9), lambda i: (i, 0))] + weight_specs,
        out_specs=pl.BlockSpec((tile_b, OUT_PAD), lambda i: (i, 0)),
        out_shape=jax.ShapeDtypeStruct((B, OUT_PAD), jnp.float32),
        compiler_params=pltpu.CompilerParams(
            dimension_semantics=("parallel",)),
        cost_estimate=pl.CostEstimate(
            flops=flops,
            transcendentals=B * OUT_PAD,
            bytes_accessed=bytes_accessed),
    )(xin, *weights)

    return out_pad[:, :1]   # (B, 1) — slice the real lane off the padded slab


def discriminator_reference(x, label, p):
    """Pure-JAX reference mirroring the kernel's bf16-weight / f32-accum math."""
    xin = jnp.concatenate([x, label], axis=1)

    def dense(h, w, b):
        return jnp.dot(h.astype(jnp.bfloat16), w,
                       preferred_element_type=jnp.float32) + b

    h = _leaky_relu(dense(xin, p["w1"], p["b1"]))
    h = _leaky_relu(dense(h, p["w2"], p["b2"]))
    h = _leaky_relu(dense(h, p["w3"], p["b3"]))
    out = _sigmoid(dense(h, p["w4"], p["b4"]))
    return out[:, :1]


if __name__ == "__main__":
    key = jax.random.PRNGKey(0)
    kx, kl, kp = jax.random.split(key, 3)

    B = 256                                              # grid=(2,) at tile_b=128
    x = jax.random.normal(kx, (B, 6), jnp.float32)       # sample to discriminate
    label = jax.random.normal(kl, (B, 3), jnp.float32)   # conditioning label
    params = init_params(kp)

    out = discriminator_forward(x, label, params)
    out = jax.block_until_ready(out)

    ref = discriminator_reference(x, label, params)
    np.testing.assert_allclose(np.asarray(out), np.asarray(ref), rtol=1e-3, atol=1e-3)

    assert out.shape == (B, 1)
    print("KERNEL_OK")
</pallas_src>

<mosaic_0001>
module attributes {stable_mosaic.version = 11 : i64} {
  func.func @discriminator_kernel(%arg0: i32, %arg1: memref<128x9xf32, #tpu.memory_space<vmem>>, %arg2: memref<9x1024xbf16, #tpu.memory_space<vmem>>, %arg3: memref<1x1024xf32, #tpu.memory_space<vmem>>, %arg4: memref<1024x512xbf16, #tpu.memory_space<vmem>>, %arg5: memref<1x512xf32, #tpu.memory_space<vmem>>, %arg6: memref<512x256xbf16, #tpu.memory_space<vmem>>, %arg7: memref<1x256xf32, #tpu.memory_space<vmem>>, %arg8: memref<256x128xbf16, #tpu.memory_space<vmem>>, %arg9: memref<1x128xf32, #tpu.memory_space<vmem>>, %arg10: memref<128x128xf32, #tpu.memory_space<vmem>>) attributes {dimension_semantics = [#tpu.dimension_semantics<parallel>], iteration_bounds = array<i64: 2>, scalar_prefetch = 0 : i64, scratch_operands = 0 : i64, tpu.core_type = #tpu.core_type<tc>, window_params = [{transform_indices = @transform_0, window_bounds = array<i64: 128, 9>}, {pipeline_mode = #tpu.pipeline_mode<synchronous>, transform_indices = @transform_1, window_bounds = array<i64: 9, 1024>}, {pipeline_mode = #tpu.pipeline_mode<synchronous>, transform_indices = @transform_2, window_bounds = array<i64: 1, 1024>}, {pipeline_mode = #tpu.pipeline_mode<synchronous>, transform_indices = @transform_3, window_bounds = array<i64: 1024, 512>}, {pipeline_mode = #tpu.pipeline_mode<synchronous>, transform_indices = @transform_4, window_bounds = array<i64: 1, 512>}, {pipeline_mode = #tpu.pipeline_mode<synchronous>, transform_indices = @transform_5, window_bounds = array<i64: 512, 256>}, {pipeline_mode = #tpu.pipeline_mode<synchronous>, transform_indices = @transform_6, window_bounds = array<i64: 1, 256>}, {pipeline_mode = #tpu.pipeline_mode<synchronous>, transform_indices = @transform_7, window_bounds = array<i64: 256, 128>}, {pipeline_mode = #tpu.pipeline_mode<synchronous>, transform_indices = @transform_8, window_bounds = array<i64: 1, 128>}, {transform_indices = @transform_9, window_bounds = array<i64: 128, 128>}]} {
    %c0 = arith.constant 0 : index
    %c0_0 = arith.constant 0 : index
    %0 = vector.load %arg1[%c0, %c0_0] : memref<128x9xf32, #tpu.memory_space<vmem>>, vector<128x9xf32>
    %1 = arith.truncf %0 : vector<128x9xf32> to vector<128x9xbf16>
    %c0_1 = arith.constant 0 : index
    %c0_2 = arith.constant 0 : index
    %2 = vector.load %arg2[%c0_1, %c0_2] : memref<9x1024xbf16, #tpu.memory_space<vmem>>, vector<9x1024xbf16>
    %cst = arith.constant dense<0.000000e+00> : vector<128x1024xf32>
    %3 = tpu.matmul %1, %2, %cst {dimension_numbers = #tpu.dot_dimension_numbers<[1], [0], [0], [1], [0, 0, 1, 1], [], []>} : vector<128x9xbf16>, vector<9x1024xbf16>, vector<128x1024xf32> -> vector<128x1024xf32>
    %c0_3 = arith.constant 0 : index
    %c0_4 = arith.constant 0 : index
    %4 = vector.load %arg3[%c0_3, %c0_4] : memref<1x1024xf32, #tpu.memory_space<vmem>>, vector<1x1024xf32>
    %5 = vector.broadcast %4 : vector<1x1024xf32> to vector<128x1024xf32>
    %6 = arith.addf %3, %5 : vector<128x1024xf32>
    %cst_5 = arith.constant 0.000000e+00 : f32
    %7 = vector.broadcast %cst_5 : f32 to vector<128x1024xf32>
    %8 = arith.cmpf ogt, %6, %7 : vector<128x1024xf32>
    %cst_6 = arith.constant 0.00999999977 : f32
    %9 = vector.broadcast %cst_6 : f32 to vector<128x1024xf32>
    %10 = arith.mulf %9, %6 : vector<128x1024xf32>
    %11 = arith.select %8, %6, %10 : vector<128x1024xi1>, vector<128x1024xf32>
    %12 = arith.truncf %11 : vector<128x1024xf32> to vector<128x1024xbf16>
    %c0_7 = arith.constant 0 : index
    %c0_8 = arith.constant 0 : index
    %13 = vector.load %arg4[%c0_7, %c0_8] : memref<1024x512xbf16, #tpu.memory_space<vmem>>, vector<1024x512xbf16>
    %cst_9 = arith.constant dense<0.000000e+00> : vector<128x512xf32>
    %14 = tpu.matmul %12, %13, %cst_9 {dimension_numbers = #tpu.dot_dimension_numbers<[1], [0], [0], [1], [0, 0, 1, 1], [], []>} : vector<128x1024xbf16>, vector<1024x512xbf16>, vector<128x512xf32> -> vector<128x512xf32>
    %c0_10 = arith.constant 0 : index
    %c0_11 = arith.constant 0 : index
    %15 = vector.load %arg5[%c0_10, %c0_11] : memref<1x512xf32, #tpu.memory_space<vmem>>, vector<1x512xf32>
    %16 = vector.broadcast %15 : vector<1x512xf32> to vector<128x512xf32>
    %17 = arith.addf %14, %16 : vector<128x512xf32>
    %cst_12 = arith.constant 0.000000e+00 : f32
    %18 = vector.broadcast %cst_12 : f32 to vector<128x512xf32>
    %19 = arith.cmpf ogt, %17, %18 : vector<128x512xf32>
    %cst_13 = arith.constant 0.00999999977 : f32
    %20 = vector.broadcast %cst_13 : f32 to vector<128x512xf32>
    %21 = arith.mulf %20, %17 : vector<128x512xf32>
    %22 = arith.select %19, %17, %21 : vector<128x512xi1>, vector<128x512xf32>
    %23 = arith.truncf %22 : vector<128x512xf32> to vector<128x512xbf16>
    %c0_14 = arith.constant 0 : index
    %c0_15 = arith.constant 0 : index
    %24 = vector.load %arg6[%c0_14, %c0_15] : memref<512x256xbf16, #tpu.memory_space<vmem>>, vector<512x256xbf16>
    %cst_16 = arith.constant dense<0.000000e+00> : vector<128x256xf32>
    %25 = tpu.matmul %23, %24, %cst_16 {dimension_numbers = #tpu.dot_dimension_numbers<[1], [0], [0], [1], [0, 0, 1, 1], [], []>} : vector<128x512xbf16>, vector<512x256xbf16>, vector<128x256xf32> -> vector<128x256xf32>
    %c0_17 = arith.constant 0 : index
    %c0_18 = arith.constant 0 : index
    %26 = vector.load %arg7[%c0_17, %c0_18] : memref<1x256xf32, #tpu.memory_space<vmem>>, vector<1x256xf32>
    %27 = vector.broadcast %26 : vector<1x256xf32> to vector<128x256xf32>
    %28 = arith.addf %25, %27 : vector<128x256xf32>
    %cst_19 = arith.constant 0.000000e+00 : f32
    %29 = vector.broadcast %cst_19 : f32 to vector<128x256xf32>
    %30 = arith.cmpf ogt, %28, %29 : vector<128x256xf32>
    %cst_20 = arith.constant 0.00999999977 : f32
    %31 = vector.broadcast %cst_20 : f32 to vector<128x256xf32>
    %32 = arith.mulf %31, %28 : vector<128x256xf32>
    %33 = arith.select %30, %28, %32 : vector<128x256xi1>, vector<128x256xf32>
    %34 = arith.truncf %33 : vector<128x256xf32> to vector<128x256xbf16>
    %c0_21 = arith.constant 0 : index
    %c0_22 = arith.constant 0 : index
    %35 = vector.load %arg8[%c0_21, %c0_22] : memref<256x128xbf16, #tpu.memory_space<vmem>>, vector<256x128xbf16>
    %cst_23 = arith.constant dense<0.000000e+00> : vector<128x128xf32>
    %36 = tpu.matmul %34, %35, %cst_23 {dimension_numbers = #tpu.dot_dimension_numbers<[1], [0], [0], [1], [0, 0, 1, 1], [], []>} : vector<128x256xbf16>, vector<256x128xbf16>, vector<128x128xf32> -> vector<128x128xf32>
    %c0_24 = arith.constant 0 : index
    %c0_25 = arith.constant 0 : index
    %37 = vector.load %arg9[%c0_24, %c0_25] : memref<1x128xf32, #tpu.memory_space<vmem>>, vector<1x128xf32>
    %38 = vector.broadcast %37 : vector<1x128xf32> to vector<128x128xf32>
    %39 = arith.addf %36, %38 : vector<128x128xf32>
    %cst_26 = arith.constant 0.000000e+00 : f32
    %40 = vector.broadcast %cst_26 : f32 to vector<128x128xf32>
    %41 = arith.subf %40, %39 : vector<128x128xf32>
    %42 = math.exp %41 : vector<128x128xf32>
    %cst_27 = arith.constant 1.000000e+00 : f32
    %43 = vector.broadcast %cst_27 : f32 to vector<128x128xf32>
    %44 = arith.addf %43, %42 : vector<128x128xf32>
    %cst_28 = arith.constant 1.000000e+00 : f32
    %45 = vector.broadcast %cst_28 : f32 to vector<128x128xf32>
    %46 = arith.divf %45, %44 : vector<128x128xf32>
    %c0_29 = arith.constant 0 : index
    %c0_30 = arith.constant 0 : index
    %47 = vector.load %arg10[%c0_29, %c0_30] : memref<128x128xf32, #tpu.memory_space<vmem>>, vector<128x128xf32>
    tpu.vector_store %arg10[%c0_29, %c0_30], %46 {strides = array<i32>} : memref<128x128xf32, #tpu.memory_space<vmem>>, vector<128x128xf32>,
    return
  }
  func.func @transform_0(%arg0: i32) -> (i32, i32) {
    %c0_i32 = arith.constant 0 : i32
    %c0_i32_0 = arith.constant 0 : i32
    return %arg0, %c0_i32 : i32, i32
  }
  func.func @transform_1(%arg0: i32) -> (i32, i32) {
    %c0_i32 = arith.constant 0 : i32
    %c0_i32_0 = arith.constant 0 : i32
    %c0_i32_1 = arith.constant 0 : i32
    return %c0_i32, %c0_i32_0 : i32, i32
  }
  func.func @transform_2(%arg0: i32) -> (i32, i32) {
    %c0_i32 = arith.constant 0 : i32
    %c0_i32_0 = arith.constant 0 : i32
    %c0_i32_1 = arith.constant 0 : i32
    return %c0_i32, %c0_i32_0 : i32, i32
  }
  func.func @transform_3(%arg0: i32) -> (i32, i32) {
    %c0_i32 = arith.constant 0 : i32
    %c0_i32_0 = arith.constant 0 : i32
    %c0_i32_1 = arith.constant 0 : i32
    return %c0_i32, %c0_i32_0 : i32, i32
  }
  func.func @transform_4(%arg0: i32) -> (i32, i32) {
    %c0_i32 = arith.constant 0 : i32
    %c0_i32_0 = arith.constant 0 : i32
    %c0_i32_1 = arith.constant 0 : i32
    return %c0_i32, %c0_i32_0 : i32, i32
  }
  func.func @transform_5(%arg0: i32) -> (i32, i32) {
    %c0_i32 = arith.constant 0 : i32
    %c0_i32_0 = arith.constant 0 : i32
    %c0_i32_1 = arith.constant 0 : i32
    return %c0_i32, %c0_i32_0 : i32, i32
  }
  func.func @transform_6(%arg0: i32) -> (i32, i32) {
    %c0_i32 = arith.constant 0 : i32
    %c0_i32_0 = arith.constant 0 : i32
    %c0_i32_1 = arith.constant 0 : i32
    return %c0_i32, %c0_i32_0 : i32, i32
  }
  func.func @transform_7(%arg0: i32) -> (i32, i32) {
    %c0_i32 = arith.constant 0 : i32
    %c0_i32_0 = arith.constant 0 : i32
    %c0_i32_1 = arith.constant 0 : i32
    return %c0_i32, %c0_i32_0 : i32, i32
  }
  func.func @transform_8(%arg0: i32) -> (i32, i32) {
    %c0_i32 = arith.constant 0 : i32
    %c0_i32_0 = arith.constant 0 : i32
    %c0_i32_1 = arith.constant 0 : i32
    return %c0_i32, %c0_i32_0 : i32, i32
  }
  func.func @transform_9(%arg0: i32) -> (i32, i32) {
    %c0_i32 = arith.constant 0 : i32
    %c0_i32_0 = arith.constant 0 : i32
    return %arg0, %c0_i32 : i32, i32
  }
}

</mosaic_0001>

<bundles_post_ra>
// kernel: discriminator_forward.1
= control target key start
LH: loop header
LB: loop body
LE: loop exit
PB: predicated region body
PF: predicated region fallthrough
CT: control target
= control target key end

     0   :  { %14 = vsyncpa [#allocation3], 0  ;;  %s8530_s0 = inlined_call_operand.vmem [shape: f32[256,9], index: 0, kind: input, shape index: {}]   ;;  %s8531_s1 = inlined_call_operand.vmem [shape: bf16[9,1024], index: 1, kind: input, shape index: {}]   ;;  %s8532_s2 = inlined_call_operand.vmem [shape: f32[1,1024], index: 2, kind: input, shape index: {}]   ;;  %s8533_s3 = inlined_call_operand.hbm [shape: bf16[1024,512], index: 3, kind: input, shape index: {}]   ;;  %s8534_s4 = inlined_call_operand.vmem [shape: f32[1,512], index: 4, kind: input, shape index: {}]   ;;  %s8535_s5 = inlined_call_operand.hbm [shape: bf16[512,256], index: 5, kind: input, shape index: {}]   ;;  %s8536_s6 = inlined_call_operand.vmem [shape: f32[1,256], index: 6, kind: input, shape index: {}]   ;;  %s8537_s7 = inlined_call_operand.vmem [shape: bf16[256,128], index: 7, kind: input, shape index: {}]   ;;  %s8538_s8 = inlined_call_operand.vmem [shape: f32[1,128], index: 8, kind: input, shape index: {}]   ;;  %s8539_s9 = inlined_call_operand.vmem [shape: f32[256,128], index: 9, kind: output, shape index: {}]  }
   0x1   :  { %15 = vsyncpa [#allocation5], 0  ;;  %s6447_s30 = smov 0  }
   0x2 LB: > { %s6389_s10 = smov [#allocation2]   ;;  %s5268_s12 = sadd.s32 4294967295, %s6387_s30   ;;  %s6387_s30 = sphi %s6447_s30, %s21_s30  }
   0x3   : > { %s264_s11 = sshll.u32 %s6389_s10, 4  ;;  %p5270_p0 = scmp.ge.s32.totalorder %s6387_s30, 1  ;;  %s265_s11 = int_to_ptr.vmem [resolvable:$true] %s264_s11 }
   0x4   : > { %p246_p1 = scmp.lt.s32.totalorder %s6387_s30, 3  ;;  %p6461_p3 = scmp.eq.s32.totalorder %s5268_s12, 0 }
   0x5   : > { %s6390_s15 = smov [#allocation4]   ;;  %s6332_s18 = scalar_lea.vmem %s265_s11, 32768 }
   0x6   : > { %p6455_p2 = pnand %p5270_p0, %p246_p1  ;;  %s280_s16 = sshll.u32 %s6390_s15, 4  ;;  %s281_s16 = int_to_ptr.vmem [resolvable:$true] %s280_s16 }
   0x7   : > { %p6333_p7 = scmp.ne.s32.totalorder %s265_s11, %s6332_s18  ;;  %p6340_p10 = scmp.lt.s32.totalorder %s265_s11, %s265_s11 }
   0x8   : > { %p5734_p4 = pneg %p6455_p2  ;;  %p6341_p11 = scmp.lt.s32.totalorder %s6332_s18, %s6332_s18 }
   0xa   : > { %p6469_p5 = pnand %p6461_p3, %p5734_p4  ;;  %p6342_p12 = por %p6341_p11, %p6340_p10 }
   0xc   : > { %p6323_p6 = pneg %p6469_p5 }
   0xe   : > { %p6335_p8 = pnand %p6333_p7, %p6323_p6 }
  0x10   : > { %p6336_p9 = pneg %p6335_p8 }
  0x12   : > { %p6343_p13 = pnand %p6342_p12, %p6336_p9 }
  0x14   : > { %6346 = shalt.err (!%p6343_p13)
}
  0x15   : > { %s6391_s19 = smov 256   ;;  %s6392_s20 = smov 16  }
  0x16   : > { %5737 = dma.hbm_to_vmem [thread:$0]  (!%p6469_p5), %s8533_s3, 32768, %s265_s11, [#allocation3], %s6391_s19, %s6391_s19, %s6392_s20  }
  0x17   : > { %s6358_s23 = scalar_lea.vmem %s281_s16, 8192  ;;  %p6366_p7 = scmp.lt.s32.totalorder %s281_s16, %s281_s16 }
  0x18   : > { %p6359_p0 = scmp.ne.s32.totalorder %s281_s16, %s6358_s23  ;;  %p6367_p8 = scmp.lt.s32.totalorder %s6358_s23, %s6358_s23 }
  0x1a   : > { %p6361_p1 = pnand %p6359_p0, %p6323_p6  ;;  %p6368_p10 = por %p6367_p8, %p6366_p7 }
  0x1c   : > { %p6362_p4 = pneg %p6361_p1 }
  0x1e   : > { %p6369_p9 = pnand %p6368_p10, %p6362_p4 }
  0x20   : > { %6372 = shalt.err (!%p6369_p9)
}
  0x21   : > { %s6393_s24 = smov 128   ;;  %s6394_s25 = smov 8  }
  0x22   : > { %5740 = dma.hbm_to_vmem [thread:$0]  (!%p6469_p5), %s8535_s5, 8192, %s281_s16, [#allocation5], %s6393_s24, %s6393_s24, %s6394_s25  }
  0x23   : > { %314 = sbr.rel (%p6455_p2) target bundleno = 1198 (0x4ae), region = 56 }
  0x28   : > { %6378 = dma.done.wait (%p6461_p3), [#allocation3], 32768  }
  0x29   : > { %6380 = vsyncadd (%p6461_p3), [#allocation3], 4294934528 }
  0x2a   : > { %6382 = dma.done.wait (%p6461_p3), [#allocation5], 8192  }
  0x2b   : > { %6384 = vsyncadd (%p6461_p3), [#allocation5], 4294959104  ;;  %vm498_vm0 = vcmask 1043456   ;;  %v6395_v0 = vmov 0   ;;  %s5277_s28 = sshll.u32 %s5268_s12, 4  ;;  %vm499_vm1 = vcmask 1044480  }
  0x2c   : > { %558 = vmatprep.mubr.bf16.mxu0 %v6395_v0  ;;  %598 = vmatprep.mubr.bf16.mxu1 %v6395_v0  ;;  %p355_p2 = scmp.lt.s32.totalorder %s5277_s28, 31  ;;  %v6396_v1 = vmov 65535   ;;  %v391_v3 = vld [vmem:[%s8531_s1] sm:$0xff]  ;;  %v392_v6 = vld [vmem:[%s8531_s1 + $0x8] sm:$0xff]  ;;  %vm473_vm2 = vcmask 72704   ;;  %v394_v22 = vld [vmem:[%s8531_s1 + $0x18] sm:$0xff] }
  0x2d   : > { %v500_v2 = vsel %vm498_vm0, 4294967295, %v6396_v1  ;;  %v395_v4 = vld [vmem:[%s8531_s1 + $0x20] sm:$0x11]  ;;  %v396_v13 = vld [vmem:[%s8531_s1 + $0x28] sm:$0x11]  ;;  %v393_v24 = vld [vmem:[%s8531_s1 + $0x10] sm:$0xff] }
  0x2e   : > { %s8660_s28 = smov (!%p355_p2, %s5277_s28), 31  ;;  %v6514_v5 = vsel %vm499_vm1, %v500_v2, 0  ;;  %v5282_v7 = vcombine.high %v391_v3, %v395_v4  ;;  %v5281_v8 = vcombine.low %v391_v3, %v395_v4  ;;  %v5283_v16 = vcombine.low %v392_v6, %v396_v13  ;;  %v398_v23 = vld [vmem:[%s8531_s1 + $0x38] sm:$0x11]  ;;  %v397_v25 = vld [vmem:[%s8531_s1 + $0x30] sm:$0x11] }
  0x2f   : > { %s5278_s29 = sshll.u32 %s8660_s28, 3  ;;  %v5284_v17 = vcombine.high %v392_v6, %v396_v13  ;;  %v5288_v30 = vcombine.high %v394_v22, %v398_v23  ;;  %v5285_v31 = vcombine.low %v393_v24, %v397_v25  ;;  %v5286_v32 = vcombine.high %v393_v24, %v397_v25  ;;  %v5763_v42 = vld [vmem:[#allocation2 + $0xe4] ss:$16 sps:$4 sm:$0xff]   ;;  %v5761_v53 = vld [vmem:[#allocation2 + $0xe0] ss:$16 sps:$4 sm:$0xff]  }
  0x30   : > { %s6521_s16 = scalar_lea.vmem %s8530_s0, %s5278_s29  ;;  %v506_v14 = vand.u32 %v5282_v7, %v6514_v5  ;;  %v503_v15 = vand.u32 %v5281_v8, %v6514_v5  ;;  %v509_v21 = vand.u32 %v5283_v16, %v6514_v5  ;;  %v5287_v51 = vcombine.low %v394_v22, %v398_v23  ;;  %v5766_v54 = vld [vmem:[#allocation2 + $0xc4] ss:$16 sps:$4 sm:$0xff]   ;;  %v5764_v56 = vld [vmem:[#allocation2 + $0xc0] ss:$16 sps:$4 sm:$0xff]   ;;  %s8502_s17 = scalar_lea.vmem %s8539_s9, %s5278_s29 }
  0x31   : > { %v367_v9 = vld [vmem:[%s6521_s16] sm:$0xff]  ;;  %v368_v10 = vld [vmem:[%s6521_s16 + $0x8] sm:$0xff]  ;;  %v512_v20 = vand.u32 %v5284_v17, %v6514_v5  ;;  %v369_v26 = vld [vmem:[%s6521_s16 + $0x10] sm:$0xff]  ;;  %v524_v33 = vand.u32 %v5288_v30, %v6514_v5  ;;  %v518_v34 = vand.u32 %v5286_v32, %v6514_v5  ;;  %v515_v35 = vand.u32 %v5285_v31, %v6514_v5 }
  0x32   : > { %v375_v11 = vld [vmem:[%s6521_s16 + $0x40] sm:$0xff]  ;;  %v376_v12 = vld [vmem:[%s6521_s16 + $0x48] sm:$0xff]  ;;  %540 = vmatprep.subr.bf16.mxu0 %v506_v14  ;;  %5724 = vmatprep.subr.bf16.mxu1 %v506_v14  ;;  %v6535_v18 = vpack.c.bf16 %v368_v10, %v367_v9  ;;  %v370_v27 = vld [vmem:[%s6521_s16 + $0x18] sm:$0xff]  ;;  %v521_v52 = vand.u32 %v5287_v51, %v6514_v5 }
  0x33   : > { %v6537_v19 = vpack.c.bf16 %v376_v12, %v375_v11  ;;  %541 = vmatpush1.bf16.msra.mxu0 %v503_v15  ;;  %5725 = vmatpush1.bf16.msra.mxu1 %v503_v15  ;;  %v377_v28 = vld [vmem:[%s6521_s16 + $0x50] sm:$0xff]  ;;  %v378_v29 = vld [vmem:[%s6521_s16 + $0x58] sm:$0xff]  ;;  %v6566_v36 = vpack.c.bf16 %v370_v27, %v369_v26  ;;  %v371_v38 = vld [vmem:[%s6521_s16 + $0x20] sm:$0xff] }
  0x34   : > { %653 = vmatprep.subr.bf16.mxu1 %v512_v20  ;;  %766 = vmatprep.subr.bf16.mxu0 %v518_v34  ;;  %v6568_v37 = vpack.c.bf16 %v378_v29, %v377_v28  ;;  %v372_v39 = vld [vmem:[%s6521_s16 + $0x28] sm:$0xff]  ;;  %v379_v40 = vld [vmem:[%s6521_s16 + $0x60] sm:$0xff]  ;;  %v373_v45 = vld [vmem:[%s6521_s16 + $0x30] sm:$0xff] }
  0x35   : > { %v380_v41 = vld [vmem:[%s6521_s16 + $0x68] sm:$0xff]  ;;  %v6580_v43 = vpack.c.bf16 %v372_v39, %v371_v38  ;;  %v374_v46 = vld [vmem:[%s6521_s16 + $0x38] sm:$0xff]  ;;  %v381_v47 = vld [vmem:[%s6521_s16 + $0x70] sm:$0xff] }
  0x36   : > { %5289 = vmatmul.mubr.msk.bf16.vlgmr.msra.gmra.mxu0 %vm473_vm2, %v6535_v18  ;;  %5293 = vmatmul.mubr.msk.bf16.vlgmr.msra.gmra.mxu1 %vm473_vm2, %v6537_v19  ;;  %v6582_v44 = vpack.c.bf16 %v380_v41, %v379_v40  ;;  %v382_v48 = vld [vmem:[%s6521_s16 + $0x78] sm:$0xff]  ;;  %v6594_v49 = vpack.c.bf16 %v374_v46, %v373_v45  ;;  %v5790_v55 = vld [vmem:[#allocation2 + $0x2e4] ss:$16 sps:$4 sm:$0xff]   ;;  %v5767_v58 = vld [vmem:[#allocation2 + $0xa0] ss:$16 sps:$4 sm:$0xff]  }
  0x37   : > { %654 = vmatpush1.bf16.msra.mxu1 %v509_v21  ;;  %568 = vmatprep.mubr.bf16.mxu0 %v6395_v0  ;;  %v6596_v50 = vpack.c.bf16 %v382_v48, %v381_v47  ;;  %v5769_v57 = vld [vmem:[#allocation2 + $0xa4] ss:$16 sps:$4 sm:$0xff]   ;;  %v5770_v60 = vld [vmem:[#allocation2 + $0x80] ss:$16 sps:$4 sm:$0xff]  }
  0x38   : > { %608 = vmatprep.mubr.bf16.mxu1 %v6395_v0  ;;  %879 = vmatprep.subr.bf16.mxu1 %v524_v33  ;;  %v5772_v59 = vld [vmem:[#allocation2 + $0x84] ss:$16 sps:$4 sm:$0xff]   ;;  %v5773_v62 = vld [vmem:[#allocation2 + $0x60] ss:$16 sps:$4 sm:$0xff]  }
  0x39   : > { %767 = vmatpush1.bf16.msra.mxu0 %v515_v35  ;;  %v5775_v61 = vld [vmem:[#allocation2 + $0x64] ss:$16 sps:$4 sm:$0xff]   ;;  %v5776_v1 = vld [vmem:[#allocation2 + $0x40] ss:$16 sps:$4 sm:$0xff]  }
  0x3a   : > { %2984 = vmatprep.subr.bf16.mxu0 %v5763_v42  ;;  %v5778_v63 = vld [vmem:[#allocation2 + $0x44] ss:$16 sps:$4 sm:$0xff]   ;;  %v5779_v3 = vld [vmem:[#allocation2 + $0x20] ss:$16 sps:$4 sm:$0xff]  }
  0x3b   : > { %v5781_v2 = vld [vmem:[#allocation2 + $0x24] ss:$16 sps:$4 sm:$0xff]   ;;  %v5782_v5 = vld [vmem:[#allocation2] ss:$16 sps:$4 sm:$0xff]  }
  0x3c   : > { %v5784_v4 = vld [vmem:[#allocation2 + $0x4] ss:$16 sps:$4 sm:$0xff]   ;;  %v5785_v7 = vld [vmem:[#allocation2 + $0x1e0] ss:$16 sps:$4 sm:$0xff]  }
  0x3d   : > { %v5787_v6 = vld [vmem:[#allocation2 + $0x1e4] ss:$16 sps:$4 sm:$0xff]   ;;  %v5791_v9 = vld [vmem:[#allocation2 + $0x1c0] ss:$16 sps:$4 sm:$0xff]  }
  0x3e   : > { %5290 = vmatmul.mubr.msk.bf16.gmra.mxu0 %vm473_vm2, %v6566_v36  ;;  %5294 = vmatmul.mubr.msk.bf16.gmra.mxu1 %vm473_vm2, %v6568_v37  ;;  %v5793_v8 = vld [vmem:[#allocation2 + $0x1c4] ss:$16 sps:$4 sm:$0xff]   ;;  %v5797_v11 = vld [vmem:[#allocation2 + $0x1a0] ss:$16 sps:$4 sm:$0xff]  }
  0x3f   : > { %578 = vmatprep.mubr.bf16.mxu0 %v6395_v0  ;;  %618 = vmatprep.mubr.bf16.mxu1 %v6395_v0  ;;  %v5799_v10 = vld [vmem:[#allocation2 + $0x1a4] ss:$16 sps:$4 sm:$0xff]   ;;  %v5803_v13 = vld [vmem:[#allocation2 + $0x180] ss:$16 sps:$4 sm:$0xff]  }
  0x40   : > { %v5805_v12 = vld [vmem:[#allocation2 + $0x184] ss:$16 sps:$4 sm:$0xff]   ;;  %v5809_v15 = vld [vmem:[#allocation2 + $0x160] ss:$16 sps:$4 sm:$0xff]  }
  0x41   : > { %v5811_v14 = vld [vmem:[#allocation2 + $0x164] ss:$16 sps:$4 sm:$0xff]   ;;  %v5815_v17 = vld [vmem:[#allocation2 + $0x140] ss:$16 sps:$4 sm:$0xff]  }
  0x42   : > { %v5817_v16 = vld [vmem:[#allocation2 + $0x144] ss:$16 sps:$4 sm:$0xff]   ;;  %v5821_v21 = vld [vmem:[#allocation2 + $0x120] ss:$16 sps:$4 sm:$0xff]  }
  0x43   : > { %v5823_v20 = vld [vmem:[#allocation2 + $0x124] ss:$16 sps:$4 sm:$0xff]   ;;  %v5827_v23 = vld [vmem:[#allocation2 + $0x100] ss:$16 sps:$4 sm:$0xff]  }
  0x44   : > { %v5829_v22 = vld [vmem:[#allocation2 + $0x104] ss:$16 sps:$4 sm:$0xff]   ;;  %v5788_v25 = vld [vmem:[#allocation2 + $0x2e0] ss:$16 sps:$4 sm:$0xff]  }
  0x45   : > { %v5838_v24 = vld [vmem:[#allocation2 + $0x4e4] ss:$16 sps:$4 sm:$0xff]   ;;  %v5794_v27 = vld [vmem:[#allocation2 + $0x2c0] ss:$16 sps:$4 sm:$0xff]  }
  0x46   : > { %5291 = vmatmul.mubr.msk.bf16.gmra.mxu0 %vm473_vm2, %v6580_v43  ;;  %5295 = vmatmul.mubr.msk.bf16.gmra.mxu1 %vm473_vm2, %v6582_v44  ;;  %v5796_v26 = vld [vmem:[#allocation2 + $0x2c4] ss:$16 sps:$4 sm:$0xff]   ;;  %v5800_v29 = vld [vmem:[#allocation2 + $0x2a0] ss:$16 sps:$4 sm:$0xff]  }
  0x47   : > { %588 = vmatprep.mubr.bf16.mxu0 %v6395_v0  ;;  %628 = vmatprep.mubr.bf16.mxu1 %v6395_v0  ;;  %v5802_v28 = vld [vmem:[#allocation2 + $0x2a4] ss:$16 sps:$4 sm:$0xff]   ;;  %v5806_v31 = vld [vmem:[#allocation2 + $0x280] ss:$16 sps:$4 sm:$0xff]  }
  0x48   : > { %v5808_v30 = vld [vmem:[#allocation2 + $0x284] ss:$16 sps:$4 sm:$0xff]   ;;  %v5818_v34 = vld [vmem:[#allocation2 + $0x240] ss:$16 sps:$4 sm:$0xff]  }
  0x49   : > { %v5814_v32 = vld [vmem:[#allocation2 + $0x264] ss:$16 sps:$4 sm:$0xff]   ;;  %v5830_v39 = vld [vmem:[#allocation2 + $0x200] ss:$16 sps:$4 sm:$0xff]  }
  0x4a   : > { %v5820_v33 = vld [vmem:[#allocation2 + $0x244] ss:$16 sps:$4 sm:$0xff]   ;;  %v5833_v41 = vld [vmem:[#allocation2 + $0x3e0] ss:$16 sps:$4 sm:$0xff]  }
  0x4b   : > { %v5826_v35 = vld [vmem:[#allocation2 + $0x224] ss:$16 sps:$4 sm:$0xff]   ;;  %v5845_v46 = vld [vmem:[#allocation2 + $0x3a0] ss:$16 sps:$4 sm:$0xff]  }
  0x4c   : > { %v5832_v38 = vld [vmem:[#allocation2 + $0x204] ss:$16 sps:$4 sm:$0xff]   ;;  %v5851_v48 = vld [vmem:[#allocation2 + $0x380] ss:$16 sps:$4 sm:$0xff]  }
  0x4d   : > { %v5835_v40 = vld [vmem:[#allocation2 + $0x3e4] ss:$16 sps:$4 sm:$0xff]  }
  0x4e   : > { %5292 = vmatmul.mubr.msk.bf16.gmra.mxu0 %vm473_vm2, %v6594_v49  ;;  %5296 = vmatmul.mubr.msk.bf16.gmra.mxu1 %vm473_vm2, %v6596_v50  ;;  %v5841_v42 = vld [vmem:[#allocation2 + $0x3c4] ss:$16 sps:$4 sm:$0xff]  }
  0x4f   : > { %671 = vmatprep.mubr.bf16.mxu1 %v6395_v0  ;;  %784 = vmatprep.mubr.bf16.mxu0 %v6395_v0  ;;  %v5847_v45 = vld [vmem:[#allocation2 + $0x3a4] ss:$16 sps:$4 sm:$0xff]  }
  0x50   : > { %v5853_v47 = vld [vmem:[#allocation2 + $0x384] ss:$16 sps:$4 sm:$0xff]  }
  0x51   : > { %v5865_v51 = vld [vmem:[#allocation2 + $0x344] ss:$16 sps:$4 sm:$0xff]  }
  0x56   : > { %5297 = vmatmul.mubr.msk.bf16.vlgmr.msra.gmra.mxu1 %vm473_vm2, %v6535_v18  ;;  %5305 = vmatmul.mubr.msk.bf16.vlgmr.msra.gmra.mxu0 %vm473_vm2, %v6535_v18 }
  0x57   : > { %880 = vmatpush1.bf16.msra.mxu1 %v521_v52  ;;  %681 = vmatprep.mubr.bf16.mxu1 %v6395_v0  ;;  %v5863_v52 = vld [vmem:[#allocation2 + $0x340] ss:$16 sps:$4 sm:$0xff]  }
  0x58   : > { %794 = vmatprep.mubr.bf16.mxu0 %v6395_v0  ;;  %2985 = vmatpush1.bf16.msra.mxu0 %v5761_v53  ;;  %v5871_v53 = vld [vmem:[#allocation2 + $0x324] ss:$16 sps:$4 sm:$0xff]  }
  0x59   : > { %2986 = vmatprep.subr.bf16.mxu0 %v5766_v54  ;;  %3097 = vmatprep.subr.bf16.mxu1 %v5790_v55  ;;  %v5877_v54 = vld [vmem:[#allocation2 + $0x304] ss:$16 sps:$4 sm:$0xff]   ;;  %v5875_v55 = vld [vmem:[#allocation2 + $0x300] ss:$16 sps:$4 sm:$0xff]  }
  0x5c   : > { %2987 = vmatpush1.bf16.msra.mxu0 %v5764_v56  ;;  %v5886_v56 = vld [vmem:[#allocation2 + $0x6e4] ss:$16 sps:$4 sm:$0xff]  }
  0x5d   : > { %2988 = vmatprep.subr.bf16.mxu0 %v5769_v57 }
  0x5e   : > { %5298 = vmatmul.mubr.msk.bf16.gmra.mxu1 %vm473_vm2, %v6566_v36  ;;  %5306 = vmatmul.mubr.msk.bf16.gmra.mxu0 %vm473_vm2, %v6566_v36 }
  0x5f   : > { %691 = vmatprep.mubr.bf16.mxu1 %v6395_v0  ;;  %804 = vmatprep.mubr.bf16.mxu0 %v6395_v0 }
  0x60   : > { %2989 = vmatpush1.bf16.msra.mxu0 %v5767_v58  ;;  %v6683_v58 = vld [vmem:[%s8532_s2] sm:$0xff] }
  0x61   : > { %2990 = vmatprep.subr.bf16.mxu0 %v5772_v59 }
  0x64   : > { %2991 = vmatpush1.bf16.msra.mxu0 %v5770_v60 }
  0x65   : > { %2992 = vmatprep.subr.bf16.mxu0 %v5775_v61 }
  0x66   : > { %5299 = vmatmul.mubr.msk.bf16.gmra.mxu1 %vm473_vm2, %v6580_v43  ;;  %5307 = vmatmul.mubr.msk.bf16.gmra.mxu0 %vm473_vm2, %v6580_v43 }
  0x67   : > { %701 = vmatprep.mubr.bf16.mxu1 %v6395_v0  ;;  %814 = vmatprep.mubr.bf16.mxu0 %v6395_v0 }
  0x68   : > { %2993 = vmatpush1.bf16.msra.mxu0 %v5773_v62 }
  0x69   : > { %2994 = vmatprep.subr.bf16.mxu0 %v5778_v63 }
  0x6c   : > { %2995 = vmatpush1.bf16.msra.mxu0 %v5776_v1 }
  0x6d   : > { %2996 = vmatprep.subr.bf16.mxu0 %v5781_v2 }
  0x6e   : > { %5300 = vmatmul.mubr.msk.bf16.gmra.mxu1 %vm473_vm2, %v6594_v49  ;;  %5308 = vmatmul.mubr.msk.bf16.gmra.mxu0 %vm473_vm2, %v6594_v49 }
  0x6f   : > { %711 = vmatprep.mubr.bf16.mxu1 %v6395_v0  ;;  %824 = vmatprep.mubr.bf16.mxu0 %v6395_v0 }
  0x70   : > { %2997 = vmatpush1.bf16.msra.mxu0 %v5779_v3 }
  0x71   : > { %2998 = vmatprep.subr.bf16.mxu0 %v5784_v4 }
  0x74   : > { %2999 = vmatpush1.bf16.msra.mxu0 %v5782_v5 }
  0x75   : > { %3000 = vmatprep.subr.bf16.mxu0 %v5787_v6 }
  0x76   : > { %5301 = vmatmul.mubr.msk.bf16.gmra.mxu1 %vm473_vm2, %v6537_v19  ;;  %5309 = vmatmul.mubr.msk.bf16.gmra.mxu0 %vm473_vm2, %v6537_v19 }
  0x77   : > { %721 = vmatprep.mubr.bf16.mxu1 %v6395_v0  ;;  %834 = vmatprep.mubr.bf16.mxu0 %v6395_v0 }
  0x78   : > { %3001 = vmatpush2.bf16.msra.mxu0 %v5785_v7 }
  0x79   : > { %3002 = vmatprep.subr.bf16.mxu0 %v5793_v8 }
  0x7c   : > { %3003 = vmatpush2.bf16.msra.mxu0 %v5791_v9 }
  0x7d   : > { %3004 = vmatprep.subr.bf16.mxu0 %v5799_v10 }
  0x7e   : > { %5302 = vmatmul.mubr.msk.bf16.gmra.mxu1 %vm473_vm2, %v6568_v37  ;;  %5310 = vmatmul.mubr.msk.bf16.gmra.mxu0 %vm473_vm2, %v6568_v37 }
  0x7f   : > { %731 = vmatprep.mubr.bf16.mxu1 %v6395_v0  ;;  %844 = vmatprep.mubr.bf16.mxu0 %v6395_v0 }
  0x80   : > { %3005 = vmatpush2.bf16.msra.mxu0 %v5797_v11 }
  0x81   : > { %3006 = vmatprep.subr.bf16.mxu0 %v5805_v12 }
  0x84   : > { %3007 = vmatpush2.bf16.msra.mxu0 %v5803_v13 }
  0x85   : > { %3008 = vmatprep.subr.bf16.mxu0 %v5811_v14 }
  0x86   : > { %5303 = vmatmul.mubr.msk.bf16.gmra.mxu1 %vm473_vm2, %v6582_v44  ;;  %5311 = vmatmul.mubr.msk.bf16.gmra.mxu0 %vm473_vm2, %v6582_v44 }
  0x87   : > { %741 = vmatprep.mubr.bf16.mxu1 %v6395_v0  ;;  %854 = vmatprep.mubr.bf16.mxu0 %v6395_v0 }
  0x88   : > { %3009 = vmatpush2.bf16.msra.mxu0 %v5809_v15 }
  0x89   : > { %3010 = vmatprep.subr.bf16.mxu0 %v5817_v16 }
  0x8c   : > { %3011 = vmatpush2.bf16.msra.mxu0 %v5815_v17 }
  0x8d   : > { %3012 = vmatprep.subr.bf16.mxu0 %v5823_v20 }
  0x8e   : > { %5304 = vmatmul.mubr.msk.bf16.gmra.mxu1 %vm473_vm2, %v6596_v50  ;;  %5312 = vmatmul.mubr.msk.bf16.gmra.mxu0 %vm473_vm2, %v6596_v50 }
  0x8f   : > { %897 = vmatprep.mubr.bf16.mxu1 %v6395_v0 }
  0x90   : > { %3013 = vmatpush2.bf16.msra.mxu0 %v5821_v21 }
  0x91   : > { %3014 = vmatprep.subr.bf16.mxu0 %v5829_v22 }
  0x94   : > { %3015 = vmatpush2.bf16.msra.mxu0 %v5827_v23 }
  0x95   : > { %3210 = vmatprep.subr.bf16.mxu0 %v5838_v24 }
  0x96   : > { %5313 = vmatmul.mubr.msk.bf16.vlgmr.msra.gmra.mxu1 %vm473_vm2, %v6535_v18  ;;  %v5812_v18 = vld [vmem:[#allocation2 + $0x260] ss:$16 sps:$4 sm:$0xff]  }
  0x97   : > { %907 = vmatprep.mubr.bf16.mxu1 %v6395_v0  ;;  %3098 = vmatpush1.bf16.msra.mxu1 %v5788_v25 }
  0x98   : > { %3099 = vmatprep.subr.bf16.mxu1 %v5796_v26 }
  0x9b   : > { %3100 = vmatpush1.bf16.msra.mxu1 %v5794_v27 }
  0x9c   : > { %3101 = vmatprep.subr.bf16.mxu1 %v5802_v28 }
  0x9e   : > { %5314 = vmatmul.mubr.msk.bf16.gmra.mxu1 %vm473_vm2, %v6566_v36  ;;  %v5824_v36 = vld [vmem:[#allocation2 + $0x220] ss:$16 sps:$4 sm:$0xff]  }
  0x9f   : > { %917 = vmatprep.mubr.bf16.mxu1 %v6395_v0  ;;  %3102 = vmatpush1.bf16.msra.mxu1 %v5800_v29 }
  0xa0   : > { %3103 = vmatprep.subr.bf16.mxu1 %v5808_v30 }
  0xa3   : > { %3104 = vmatpush1.bf16.msra.mxu1 %v5806_v31 }
  0xa4   : > { %3105 = vmatprep.subr.bf16.mxu1 %v5814_v32 }
  0xa6   : > { %5315 = vmatmul.mubr.msk.bf16.gmra.mxu1 %vm473_vm2, %v6580_v43  ;;  %v5839_v43 = vld [vmem:[#allocation2 + $0x3c0] ss:$16 sps:$4 sm:$0xff]  }
  0xa7   : > { %927 = vmatprep.mubr.bf16.mxu1 %v6395_v0  ;;  %3106 = vmatpush1.bf16.msra.mxu1 %v5812_v18  ;;  %v5836_v18 = vld [vmem:[#allocation2 + $0x4e0] ss:$16 sps:$4 sm:$0xff]  }
  0xa8   : > { %3107 = vmatprep.subr.bf16.mxu1 %v5820_v33 }
  0xab   : > { %3108 = vmatpush1.bf16.msra.mxu1 %v5818_v34 }
  0xac   : > { %3109 = vmatprep.subr.bf16.mxu1 %v5826_v35 }
  0xae   : > { %5316 = vmatmul.mubr.msk.bf16.gmra.mxu1 %vm473_vm2, %v6594_v49  ;;  %v5859_v49 = vld [vmem:[#allocation2 + $0x364] ss:$16 sps:$4 sm:$0xff]  }
  0xaf   : > { %937 = vmatprep.mubr.bf16.mxu1 %v6395_v0  ;;  %3110 = vmatpush1.bf16.msra.mxu1 %v5824_v36 }
  0xb0   : > { %3111 = vmatprep.subr.bf16.mxu1 %v5832_v38  ;;  %v5844_v38 = vld [vmem:[#allocation2 + $0x4c4] ss:$16 sps:$4 sm:$0xff]  }
  0xb3   : > { %3112 = vmatpush1.bf16.msra.mxu1 %v5830_v39 }
  0xb4   : > { %3113 = vmatprep.subr.bf16.mxu1 %v5835_v40 }
  0xb6   : > { %5317 = vmatmul.mubr.msk.bf16.gmra.mxu1 %vm473_vm2, %v6537_v19  ;;  %v5857_v19 = vld [vmem:[#allocation2 + $0x360] ss:$16 sps:$4 sm:$0xff]  }
  0xb7   : > { %947 = vmatprep.mubr.bf16.mxu1 %v6395_v0  ;;  %3114 = vmatpush2.bf16.msra.mxu1 %v5833_v41 }
  0xb8   : > { %3115 = vmatprep.subr.bf16.mxu1 %v5841_v42 }
  0xbb   : > { %3116 = vmatpush2.bf16.msra.mxu1 %v5839_v43 }
  0xbc   : > { %3117 = vmatprep.subr.bf16.mxu1 %v5847_v45 }
  0xbe   : > { %5318 = vmatmul.mubr.msk.bf16.gmra.mxu1 %vm473_vm2, %v6568_v37  ;;  %v5869_v37 = vld [vmem:[#allocation2 + $0x320] ss:$16 sps:$4 sm:$0xff]  }
  0xbf   : > { %957 = vmatprep.mubr.bf16.mxu1 %v6395_v0  ;;  %3118 = vmatpush2.bf16.msra.mxu1 %v5845_v46 }
  0xc0   : > { %3119 = vmatprep.subr.bf16.mxu1 %v5853_v47 }
  0xc3   : > { %3120 = vmatpush2.bf16.msra.mxu1 %v5851_v48 }
  0xc4   : > { %3121 = vmatprep.subr.bf16.mxu1 %v5859_v49 }
  0xc6   : > { %5319 = vmatmul.mubr.msk.bf16.gmra.mxu1 %vm473_vm2, %v6582_v44  ;;  %v401_v44 = vlaneseq }
  0xc7   : > { %967 = vmatprep.mubr.bf16.mxu1 %v6395_v0  ;;  %3122 = vmatpush2.bf16.msra.mxu1 %v5857_v19 }
  0xc8   : > { %3123 = vmatprep.subr.bf16.mxu1 %v5865_v51  ;;  %v6675_v57 = vshrl.u32 %v401_v44, 7 }
  0xca   : > { %8573 = vst [vmem:[#allocation8_spill] sm:$0xff] %v6675_v57  ;;  %v6678_v0 = vsub.s32 0, %v6675_v57  ;;  %v6686_v59 = vsub.s32 1, %v6675_v57  ;;  %v8541_v12 = vsub.s32 2, %v6675_v57  ;;  %v8540_v27 = vsub.s32 3, %v6675_v57 }
  0xcb   : > { %3124 = vmatpush2.bf16.msra.mxu1 %v5863_v52  ;;  %v419_v33 = vsub.s32 4, %v6675_v57  ;;  %v423_v39 = vsub.s32 5, %v6675_v57  ;;  %v427_v43 = vsub.s32 6, %v6675_v57  ;;  %v431_v45 = vsub.s32 7, %v6675_v57 }
  0xcc   : > { %3125 = vmatprep.subr.bf16.mxu1 %v5871_v53  ;;  %8574 = vst [vmem:[#allocation9_spill] sm:$0xff] %v6678_v0  ;;  %8575 = vst [vmem:[#allocation10_spill] sm:$0xff] %v6686_v59  ;;  %v6695_v63 = vrot.slane %v6683_v58, %v6686_v59  ;;  %v6712_v26 = vrot.slane %v6683_v58, %v8541_v12  ;;  %v6737_v51 = vrot.slane %v6683_v58, %v8540_v27  ;;  %v5883_v59 = vld [vmem:[#allocation2 + $0x5e4] ss:$16 sps:$4 sm:$0xff]  }
  0xcd   : > { %v6740_v52 = vrot.slane %v6683_v58, %v419_v33 }
  0xce   : > { %5320 = vmatmul.mubr.msk.bf16.gmra.mxu1 %vm473_vm2, %v6596_v50  ;;  %v6690_v50 = vrot.slane %v6683_v58, %v6678_v0  ;;  %v5884_v0 = vld [vmem:[#allocation2 + $0x6e0] ss:$16 sps:$4 sm:$0xff]  }
  0xcf   : > { %3126 = vmatpush2.bf16.msra.mxu1 %v5869_v37 }
  0xd0   : > { %3127 = vmatprep.subr.bf16.mxu1 %v5877_v54  ;;  %v5842_v54 = vld [vmem:[#allocation2 + $0x4c0] ss:$16 sps:$4 sm:$0xff]  }
  0xd3   : > { %3128 = vmatpush2.bf16.msra.mxu1 %v5875_v55 }
  0xd4   : > { %3323 = vmatprep.subr.bf16.mxu1 %v5886_v56 }
  0xf6   : > { %v560_v60 = vpop.f32.mrf.mxu0  ;;  %v600_v61 = vpop.f32.mrf.mxu1 }
  0xf7   : > { %v561_v62 = vadd.f32 %v560_v60, %v6690_v50  ;;  %v601_v25 = vadd.f32 %v600_v61, %v6690_v50 }
  0xf8   : > { %v562_v1 = vpop.f32.mrf.mxu0  ;;  %v602_v2 = vpop.f32.mrf.mxu1 }
  0xf9   : > { %v563_v3 = vadd.f32 %v562_v1, %v6695_v63  ;;  %v1106_v6 = vmul.f32 0.01, %v561_v62  ;;  %vm978_vm3 = vcmp.gt.f32.partialorder %v561_v62, 0.0  ;;  %v1170_v46 = vmul.f32 0.01, %v601_v25 }
  0xfa   : > { %v564_v4 = vpop.f32.mrf.mxu0  ;;  %v604_v5 = vpop.f32.mrf.mxu1  ;;  %vm1042_vm10 = vcmp.gt.f32.partialorder %v601_v25, 0.0  ;;  %v6743_v53 = vadd.f32 %v602_v2, %v6695_v63 }
  0xfb   : > { %v565_v7 = vadd.f32 %v564_v4, %v6690_v50  ;;  %v1107_v8 = vmul.f32 0.01, %v563_v3  ;;  %vm979_vm4 = vcmp.gt.f32.partialorder %v563_v3, 0.0  ;;  %v1234_v16 = vsel %vm978_vm3, %v561_v62, %v1106_v6 }
  0xfc   : > { %v566_v9 = vpop.f32.mrf.mxu0  ;;  %v6699_v10 = vpop.f32.mrf.mxu1  ;;  %v605_v44 = vadd.f32 %v604_v5, %v6690_v50  ;;  %v6752_v2 = vsel %vm1042_vm10, %v601_v25, %v1170_v46  ;;  %v6755_v4 = vrot.slane %v6683_v58, %v423_v39  ;;  %v6758_v6 = vrot.slane %v6683_v58, %v427_v43 }
  0xfd   : > { %vm986_vm5 = vcmp.gt.f32.partialorder %v565_v7, 0.0  ;;  %v1114_v11 = vmul.f32 0.01, %v565_v7  ;;  %v567_v13 = vadd.f32 %v566_v9, %v6695_v63  ;;  %v1235_v24 = vsel %vm979_vm4, %v563_v3, %v1107_v8  ;;  %v5850_v3 = vld [vmem:[#allocation2 + $0x4a4] ss:$16 sps:$4 sm:$0xff]  }
  0xfe   : > { %v570_v14 = vpop.f32.mrf.mxu0  ;;  %v6703_v15 = vpop.f32.mrf.mxu1  ;;  %v6761_v5 = vrot.slane %v6683_v58, %v431_v45  ;;  %vm1043_vm15 = vcmp.gt.f32.partialorder %v6743_v53, 0.0  ;;  %vm1050_vm0 = vcmp.gt.f32.partialorder %v605_v44, 0.0 }
  0xff   : > { %v1242_v17 = vsel %vm986_vm5, %v565_v7, %v1114_v11  ;;  %v571_v20 = vadd.f32 %v570_v14, %v6690_v50  ;;  %vm987_vm6 = vcmp.gt.f32.partialorder %v567_v13, 0.0  ;;  %v1115_v21 = vmul.f32 0.01, %v567_v13 }
 0x100   : > { %v572_v22 = vpop.f32.mrf.mxu0  ;;  %v6706_v23 = vpop.f32.mrf.mxu1  ;;  %v6715_v28 = vpack.c.bf16 %v1242_v17, %v1234_v16  ;;  %v6765_v7 = vadd.f32 %v6699_v10, %v6695_v63  ;;  %v5848_v16 = vld [vmem:[#allocation2 + $0x4a0] ss:$16 sps:$4 sm:$0xff]   ;;  %v1171_v17 = vmul.f32 0.01, %v6743_v53  ;;  %v1178_v10 = vmul.f32 0.01, %v605_v44 }
 0x101   : > { %v573_v29 = vadd.f32 %v572_v22, %v6695_v63  ;;  %v1243_v32 = vsel %vm987_vm6, %v567_v13, %v1115_v21  ;;  %v1122_v34 = vmul.f32 0.01, %v571_v20  ;;  %vm994_vm7 = vcmp.gt.f32.partialorder %v571_v20, 0.0  ;;  %v5856_v22 = vld [vmem:[#allocation2 + $0x484] ss:$16 sps:$4 sm:$0xff]  }
 0x102   : > { %v574_v30 = vpop.f32.mrf.mxu0  ;;  %v6718_v31 = vpop.f32.mrf.mxu1  ;;  %v6722_v36 = vpack.c.bf16 %v1243_v32, %v1235_v24  ;;  %v6778_v24 = vadd.f32 %v6703_v15, %v6690_v50  ;;  %v6784_v32 = vadd.f32 %v6706_v23, %v6695_v63  ;;  %vm1051_vm1 = vcmp.gt.f32.partialorder %v6765_v7, 0.0 }
 0x103   : > { %v575_v35 = vadd.f32 %v574_v30, %v6690_v50  ;;  %v1123_v40 = vmul.f32 0.01, %v573_v29  ;;  %vm995_vm8 = vcmp.gt.f32.partialorder %v573_v29, 0.0  ;;  %v1250_v55 = vsel %vm994_vm7, %v571_v20, %v1122_v34 }
 0x104   : > { %v576_v41 = vpop.f32.mrf.mxu0  ;;  %v6725_v42 = vpop.f32.mrf.mxu1  ;;  %3016 = vmatprep.mubr.bf16.mxu0 %v6722_v36  ;;  %v1179_v23 = vmul.f32 0.01, %v6765_v7  ;;  %vm1059_vm3 = vcmp.gt.f32.partialorder %v6784_v32, 0.0  ;;  %vm1058_vm7 = vcmp.gt.f32.partialorder %v6778_v24, 0.0 }
 0x105   : > { %vm1002_vm9 = vcmp.gt.f32.partialorder %v575_v35, 0.0  ;;  %v1130_v47 = vmul.f32 0.01, %v575_v35  ;;  %v577_v48 = vadd.f32 %v576_v41, %v6695_v63  ;;  %3017 = vmatmul.mubr.bf16.vlgmr.msra.gmra.mxu0 %v6715_v28  ;;  %v1251_v1 = vsel %vm995_vm8, %v573_v29, %v1123_v40 }
 0x106   : > { %v580_v49 = vpop.f32.mrf.mxu0  ;;  %v6732_v19 = vpop.f32.mrf.mxu1  ;;  %3211 = vmatpush1.bf16.msra.mxu0 %v5836_v18 }
 0x107   : > { %v581_v37 = vadd.f32 %v580_v49, %v6690_v50  ;;  %v1258_v56 = vsel %vm1002_vm9, %v575_v35, %v1130_v47  ;;  %vm1003_vm11 = vcmp.gt.f32.partialorder %v577_v48, 0.0  ;;  %v1131_v60 = vmul.f32 0.01, %v577_v48  ;;  %3212 = vmatprep.subr.bf16.mxu0 %v5844_v38  ;;  %v5854_v38 = vld [vmem:[#allocation2 + $0x480] ss:$16 sps:$4 sm:$0xff]  }
 0x108   : > { %v582_v61 = vpop.f32.mrf.mxu0  ;;  %v6748_v62 = vpop.f32.mrf.mxu1  ;;  %v6770_v14 = vpack.c.bf16 %v1258_v56, %v1250_v55  ;;  %v6796_v35 = vadd.f32 %v6718_v31, %v6690_v50  ;;  %v6804_v49 = vmul.f32 0.01, %v6778_v24  ;;  %v1299_v31 = vsel %vm1043_vm15, %v6743_v53, %v1171_v17 }
 0x109   : > { %v583_v8 = vadd.f32 %v582_v61, %v6695_v63  ;;  %v1259_v13 = vsel %vm1003_vm11, %v577_v48, %v1131_v60  ;;  %v1138_v20 = vmul.f32 0.01, %v581_v37  ;;  %vm1010_vm12 = vcmp.gt.f32.partialorder %v581_v37, 0.0  ;;  %v5862_v48 = vld [vmem:[#allocation2 + $0x464] ss:$16 sps:$4 sm:$0xff]  }
 0x10a   : > { %v584_v9 = vpop.f32.mrf.mxu0  ;;  %v6768_v11 = vpop.f32.mrf.mxu1  ;;  %3213 = vmatpush1.bf16.msra.mxu0 %v5842_v54  ;;  %v6774_v58 = vpack.c.bf16 %v1259_v13, %v1251_v1  ;;  %v6813_v54 = vadd.f32 %v6725_v42, %v6695_v63  ;;  %v5860_v42 = vld [vmem:[#allocation2 + $0x460] ss:$16 sps:$4 sm:$0xff]   ;;  %v1187_v13 = vmul.f32 0.01, %v6784_v32  ;;  %vm1066_vm9 = vcmp.gt.f32.partialorder %v6796_v35, 0.0 }
 0x10b   : > { %v585_v21 = vadd.f32 %v584_v9, %v6690_v50  ;;  %v1139_v25 = vmul.f32 0.01, %v583_v8  ;;  %3214 = vmatprep.subr.bf16.mxu0 %v5850_v3  ;;  %vm1011_vm13 = vcmp.gt.f32.partialorder %v583_v8, 0.0  ;;  %v1266_v39 = vsel %vm1010_vm12, %v581_v37, %v1138_v20 }
 0x10c   : > { %v586_v29 = vpop.f32.mrf.mxu0  ;;  %v6780_v30 = vpop.f32.mrf.mxu1  ;;  %3026 = vmatprep.mubr.bf16.mxu0 %v6774_v58  ;;  %v1306_v37 = vsel %vm1050_vm0, %v605_v44, %v1178_v10  ;;  %v6823_v3 = vadd.f32 %v6732_v19, %v6690_v50  ;;  %v1307_v9 = vsel %vm1051_vm1, %v6765_v7, %v1179_v23  ;;  %v6837_v19 = vadd.f32 %v6748_v62, %v6695_v63 }
 0x10d   : > { %vm1018_vm14 = vcmp.gt.f32.partialorder %v585_v21, 0.0  ;;  %v1146_v18 = vmul.f32 0.01, %v585_v21  ;;  %v587_v15 = vadd.f32 %v586_v29, %v6695_v63  ;;  %3027 = vmatmul.mubr.bf16.gmra.mxu0 %v6770_v14  ;;  %v1267_v47 = vsel %vm1011_vm13, %v583_v8, %v1139_v25  ;;  %v5868_v8 = vld [vmem:[#allocation2 + $0x444] ss:$16 sps:$4 sm:$0xff]  }
 0x10e   : > { %v590_v33 = vpop.f32.mrf.mxu0  ;;  %v6791_v34 = vpop.f32.mrf.mxu1  ;;  %3215 = vmatpush1.bf16.msra.mxu0 %v5848_v16  ;;  %v6833_v16 = vmul.f32 0.01, %v6796_v35  ;;  %v6844_v7 = vadd.f32 %v6768_v11, %v6690_v50  ;;  %v5866_v29 = vld [vmem:[#allocation2 + $0x440] ss:$16 sps:$4 sm:$0xff]   ;;  %vm1067_vm8 = vcmp.gt.f32.partialorder %v6813_v54, 0.0  ;;  %v6860_v23 = vadd.f32 %v6780_v30, %v6695_v63 }
 0x10f   : > { %v1274_v40 = vsel %vm1018_vm14, %v585_v21, %v1146_v18  ;;  %vm1019_vm2 = vcmp.gt.f32.partialorder %v587_v15, 0.0  ;;  %v1147_v41 = vmul.f32 0.01, %v587_v15  ;;  %v591_v43 = vadd.f32 %v590_v33, %v6690_v50  ;;  %3216 = vmatprep.subr.bf16.mxu0 %v5856_v22 }
 0x110   : > { %v592_v45 = vpop.f32.mrf.mxu0  ;;  %v6800_v46 = vpop.f32.mrf.mxu1  ;;  %v6819_v1 = vpack.c.bf16 %v1274_v40, %v1266_v39  ;;  %v6848_v18 = vpack.c.bf16 %v1307_v9, %v1299_v31  ;;  %v1195_v33 = vmul.f32 0.01, %v6813_v54  ;;  %v6856_v11 = vmul.f32 0.01, %v6823_v3 }
 0x111   : > { %v593_v55 = vadd.f32 %v592_v45, %v6695_v63  ;;  %v1275_v61 = vsel %vm1019_vm2, %v587_v15, %v1147_v41  ;;  %v1154_v17 = vmul.f32 0.01, %v591_v43  ;;  %vm1026_vm4 = vcmp.gt.f32.partialorder %v591_v43, 0.0  ;;  %v5874_v45 = vld [vmem:[#allocation2 + $0x424] ss:$16 sps:$4 sm:$0xff]  }
 0x112   : > { %v594_v56 = vpop.f32.mrf.mxu0  ;;  %v6816_v60 = vpop.f32.mrf.mxu1  ;;  %3217 = vmatpush1.bf16.msra.mxu0 %v5854_v38  ;;  %v6826_v44 = vpack.c.bf16 %v1275_v61, %v1267_v47  ;;  %vm1075_vm11 = vcmp.gt.f32.partialorder %v6837_v19, 0.0  ;;  %v6884_v9 = vadd.f32 %v6791_v34, %v6690_v50  ;;  %vm1074_vm12 = vcmp.gt.f32.partialorder %v6823_v3, 0.0 }
 0x113   : > { %v595_v53 = vadd.f32 %v594_v56, %v6690_v50  ;;  %3218 = vmatprep.subr.bf16.mxu0 %v5862_v48  ;;  %v1155_v22 = vmul.f32 0.01, %v593_v55  ;;  %vm1027_vm6 = vcmp.gt.f32.partialorder %v593_v55, 0.0  ;;  %v1282_v40 = vsel %vm1026_vm4, %v591_v43, %v1154_v17 }
 0x114   : > { %v596_v20 = vpop.f32.mrf.mxu0  ;;  %v6839_v21 = vpop.f32.mrf.mxu1  ;;  %3036 = vmatprep.mubr.bf16.mxu0 %v6826_v44  ;;  %v6869_v48 = vmul.f32 0.01, %v6837_v19  ;;  %v6874_v56 = vmul.f32 0.01, %v6844_v7  ;;  %vm1083_vm13 = vcmp.gt.f32.partialorder %v6860_v23, 0.0  ;;  %v6900_v34 = vadd.f32 %v6816_v60, %v6690_v50 }
 0x115   : > { %vm1034_vm5 = vcmp.gt.f32.partialorder %v595_v53, 0.0  ;;  %v1162_v10 = vmul.f32 0.01, %v595_v53  ;;  %v597_v25 = vadd.f32 %v596_v20, %v6695_v63  ;;  %3037 = vmatmul.mubr.bf16.gmra.mxu0 %v6819_v1  ;;  %v1283_v31 = vsel %vm1027_vm6, %v593_v55, %v1155_v22 }
 0x116   : > { %v673_v62 = vpop.f32.mrf.mxu1  ;;  %v6850_v15 = vpop.f32.mrf.mxu0  ;;  %3219 = vmatpush1.bf16.msra.mxu0 %v5860_v42  ;;  %v1315_v20 = vsel %vm1059_vm3, %v6784_v32, %v1187_v13  ;;  %vm1082_vm14 = vcmp.gt.f32.partialorder %v6844_v7, 0.0  ;;  %v1323_v60 = vsel %vm1067_vm8, %v6813_v54, %v1195_v33  ;;  %v6928_v54 = vadd.f32 %v6839_v21, %v6695_v63 }
 0x117   : > { %vm1035_vm10 = vcmp.gt.f32.partialorder %v597_v25, 0.0  ;;  %v1163_v38 = vmul.f32 0.01, %v597_v25  ;;  %3220 = vmatprep.subr.bf16.mxu0 %v5868_v8  ;;  %v1290_v41 = vsel %vm1034_vm5, %v595_v53, %v1162_v10  ;;  %v674_v61 = vadd.f32 %v673_v62, %v6712_v26  ;;  %v5872_v10 = vld [vmem:[#allocation2 + $0x420] ss:$16 sps:$4 sm:$0xff]  }
 0x118   : > { %v675_v39 = vpop.f32.mrf.mxu1  ;;  %v6865_v47 = vpop.f32.mrf.mxu0  ;;  %v6878_v53 = vpack.c.bf16 %v1306_v37, %v6752_v2  ;;  %v6887_v55 = vpack.c.bf16 %v1290_v41, %v1282_v40  ;;  %v6896_v2 = vadd.f32 %v6800_v46, %v6695_v63  ;;  %v6916_v40 = vmul.f32 0.01, %v6884_v9 }
 0x119   : > { %v676_v30 = vadd.f32 %v675_v39, %v6737_v51  ;;  %v1291_v42 = vsel %vm1035_vm10, %v597_v25, %v1163_v38  ;;  %v5880_v25 = vld [vmem:[#allocation2 + $0x404] ss:$16 sps:$4 sm:$0xff]   ;;  %v1108_v38 = vmul.f32 0.01, %v674_v61  ;;  %vm980_vm1 = vcmp.gt.f32.partialorder %v674_v61, 0.0 }
 0x11a   : > { %v677_v43 = vpop.f32.mrf.mxu1  ;;  %v6880_v8 = vpop.f32.mrf.mxu0  ;;  %3221 = vmatpush1.bf16.msra.mxu0 %v5866_v29  ;;  %v6902_v22 = vpack.c.bf16 %v1291_v42, %v1283_v31  ;;  %v1211_v29 = vmul.f32 0.01, %v6860_v23  ;;  %vm1091_vm3 = vcmp.gt.f32.partialorder %v6896_v2, 0.0  ;;  %v6924_v31 = vmul.f32 0.01, %v6900_v34 }
 0x11b   : > { %v678_v17 = vadd.f32 %v677_v43, %v6712_v26  ;;  %3222 = vmatprep.subr.bf16.mxu0 %v5874_v45  ;;  %v1109_v32 = vmul.f32 0.01, %v676_v30  ;;  %vm981_vm0 = vcmp.gt.f32.partialorder %v676_v30, 0.0  ;;  %v6921_v45 = vmul.f32 0.01, %v6896_v2 }
 0x11c   : > { %v679_v37 = vpop.f32.mrf.mxu1  ;;  %v6904_v62 = vpop.f32.mrf.mxu0  ;;  %3046 = vmatprep.mubr.bf16.mxu0 %v6902_v22  ;;  %v5878_v42 = vld [vmem:[#allocation2 + $0x400] ss:$16 sps:$4 sm:$0xff]   ;;  %v6939_v63 = vpack.c.bf16 %v1323_v60, %v1315_v20  ;;  %v1236_v21 = vsel %vm980_vm1, %v674_v61, %v1108_v38  ;;  %v5892_v61 = vld [vmem:[#allocation2 + $0x6c4] ss:$16 sps:$4 sm:$0xff]   ;;  %vm1099_vm4 = vcmp.gt.f32.partialorder %v6928_v54, 0.0  ;;  %vm1098_vm6 = vcmp.gt.f32.partialorder %v6900_v34, 0.0 }
 0x11d   : > { %vm988_vm15 = vcmp.gt.f32.partialorder %v678_v17, 0.0  ;;  %v1116_v13 = vmul.f32 0.01, %v678_v17  ;;  %v680_v46 = vadd.f32 %v679_v37, %v6737_v51  ;;  %3047 = vmatmul.mubr.bf16.gmra.mxu0 %v6887_v55  ;;  %v1237_v12 = vsel %vm981_vm0, %v676_v30, %v1109_v32  ;;  %v5889_v38 = vld [vmem:[#allocation2 + $0x5c4] ss:$16 sps:$4 sm:$0xff]  }
 0x11e   : > { %v683_v50 = vpop.f32.mrf.mxu1  ;;  %v6913_v39 = vpop.f32.mrf.mxu0  ;;  %3056 = vmatprep.mubr.bf16.mxu0 %v6848_v18  ;;  %3223 = vmatpush1.bf16.msra.mxu0 %v5872_v10  ;;  %8576 = vst [vmem:[#allocation11_spill] sm:$0xff] %v6939_v63  ;;  %vm1090_vm10 = vcmp.gt.f32.partialorder %v6884_v9, 0.0 }
 0x11f   : > { %vm989_vm2 = vcmp.gt.f32.partialorder %v680_v46, 0.0  ;;  %v1117_v41 = vmul.f32 0.01, %v680_v46  ;;  %v1244_v33 = vsel %vm988_vm15, %v678_v17, %v1116_v13  ;;  %3224 = vmatprep.subr.bf16.mxu0 %v5880_v25  ;;  %v6943_v17 = vadd.f32 %v683_v50, %v6712_v26 }
 0x120   : > { %v685_v43 = vpop.f32.mrf.mxu1  ;;  %v6932_v37 = vpop.f32.mrf.mxu0  ;;  %v1314_v25 = vsel %vm1058_vm7, %v6778_v24, %v6804_v49  ;;  %v6953_v32 = vpack.c.bf16 %v1244_v33, %v1236_v21  ;;  %v1227_v24 = vmul.f32 0.01, %v6928_v54  ;;  %v1331_v50 = vsel %vm1075_vm11, %v6837_v19, %v6869_v48 }
 0x121   : > { %v6935_v27 = vadd.f32 %v685_v43, %v6737_v51  ;;  %v1245_v57 = vsel %vm989_vm2, %v680_v46, %v1117_v41  ;;  %v5881_v46 = vld [vmem:[#allocation2 + $0x5e0] ss:$16 sps:$4 sm:$0xff]   ;;  %v1124_v41 = vmul.f32 0.01, %v6943_v17  ;;  %vm996_vm8 = vcmp.gt.f32.partialorder %v6943_v17, 0.0 }
 0x122   : > { %v687_v10 = vpop.f32.mrf.mxu1  ;;  %v6945_v13 = vpack.c.bf16 %v1245_v57, %v1237_v12  ;;  %v6951_v30 = vpop.f32.mrf.mxu0  ;;  %8577 = vst [vmem:[#allocation12_spill] sm:$0xff] %v6953_v32  ;;  %v1322_v57 = vsel %vm1066_vm9, %v6796_v35, %v6833_v16  ;;  %v1339_v12 = vsel %vm1083_vm13, %v6860_v23, %v1211_v29  ;;  %3225 = vmatpush1.bf16.msra.mxu0 %v5878_v42 }
 0x123   : > { %v688_v20 = vadd.f32 %v687_v10, %v6712_v26  ;;  %v787_v35 = vadd.f32 %v6850_v15, %v6740_v52  ;;  %v1125_v23 = vmul.f32 0.01, %v6935_v27  ;;  %3226 = vmatprep.subr.bf16.mxu0 %v5883_v59  ;;  %vm997_vm7 = vcmp.gt.f32.partialorder %v6935_v27, 0.0  ;;  %v5890_v15 = vld [vmem:[#allocation2 + $0x6c0] ss:$16 sps:$4 sm:$0xff]  }
 0x124   : > { %v689_v49 = vpop.f32.mrf.mxu1  ;;  %3129 = vmatprep.mubr.bf16.mxu1 %v6945_v13  ;;  %v6972_v16 = vpop.f32.mrf.mxu0  ;;  %v6980_v48 = vpack.c.bf16 %v1322_v57, %v1314_v25  ;;  %v6982_v33 = vpack.c.bf16 %v1339_v12, %v1331_v50  ;;  %v5898_v59 = vld [vmem:[#allocation2 + $0x6a4] ss:$16 sps:$4 sm:$0xff]   ;;  %v5887_v10 = vld [vmem:[#allocation2 + $0x5c0] ss:$16 sps:$4 sm:$0xff]   ;;  %v791_v12 = vadd.f32 %v6880_v8, %v6740_v52  ;;  %v1252_v50 = vsel %vm996_vm8, %v6943_v17, %v1124_v41 }
 0x125   : > { %vm1004_vm5 = vcmp.gt.f32.partialorder %v688_v20, 0.0  ;;  %v1132_v29 = vmul.f32 0.01, %v688_v20  ;;  %v690_v60 = vadd.f32 %v689_v49, %v6737_v51  ;;  %3130 = vmatmul.mubr.bf16.vlgmr.msra.gmra.mxu1 %v6953_v32  ;;  %3057 = vmatmul.mubr.bf16.gmra.mxu0 %v6878_v53  ;;  %v1110_v57 = vmul.f32 0.01, %v787_v35 }
 0x126   : > { %v693_v19 = vpop.f32.mrf.mxu1  ;;  %3324 = vmatpush1.bf16.msra.mxu1 %v5884_v0  ;;  %8578 = vst [vmem:[#allocation13_spill] sm:$0xff] %v6980_v48  ;;  %8579 = vst [vmem:[#allocation14_spill] sm:$0xff] %v6982_v33  ;;  %v6984_v43 = vpop.f32.mrf.mxu0  ;;  %v1330_v0 = vsel %vm1074_vm12, %v6823_v3, %v6856_v11  ;;  %3066 = vmatprep.mubr.bf16.mxu0 %v6939_v63  ;;  %v1253_v11 = vsel %vm997_vm7, %v6935_v27, %v1125_v23  ;;  %vm982_vm11 = vcmp.gt.f32.partialorder %v787_v35, 0.0  ;;  %v5901_v41 = vld [vmem:[#allocation2 + $0x584] ss:$16 sps:$4 sm:$0xff]  }
 0x127   : > { %vm1005_vm9 = vcmp.gt.f32.partialorder %v690_v60, 0.0  ;;  %v1133_v42 = vmul.f32 0.01, %v690_v60  ;;  %3325 = vmatprep.subr.bf16.mxu1 %v5892_v61  ;;  %3227 = vmatpush2.bf16.msra.mxu0 %v5881_v46  ;;  %v1260_v25 = vsel %vm1004_vm5, %v688_v20, %v1132_v29  ;;  %v1338_v61 = vsel %vm1082_vm14, %v6844_v7, %v6874_v56  ;;  %v5895_v46 = vld [vmem:[#allocation2 + $0x5a4] ss:$16 sps:$4 sm:$0xff]  }
 0x128   : > { %v695_v21 = vpop.f32.mrf.mxu1  ;;  %v7001_v49 = vpop.f32.mrf.mxu0  ;;  %3228 = vmatprep.subr.bf16.mxu0 %v5889_v38  ;;  %v7011_v7 = vadd.f32 %v693_v19, %v6712_v26  ;;  %v5896_v38 = vld [vmem:[#allocation2 + $0x6a0] ss:$16 sps:$4 sm:$0xff]   ;;  %v7020_v29 = vadd.f32 %v6865_v47, %v6755_v4  ;;  %v1355_v17 = vsel %vm1099_vm4, %v6928_v54, %v1227_v24  ;;  %vm990_vm12 = vcmp.gt.f32.partialorder %v791_v12, 0.0 }
 0x129   : > { %v7004_v3 = vadd.f32 %v695_v21, %v6737_v51  ;;  %v1261_v20 = vsel %vm1005_vm9, %v690_v60, %v1133_v42  ;;  %v7025_v60 = vpack.c.bf16 %v1260_v25, %v1252_v50  ;;  %v5893_v19 = vld [vmem:[#allocation2 + $0x5a0] ss:$16 sps:$4 sm:$0xff]   ;;  %v1347_v42 = vsel %vm1091_vm3, %v6896_v2, %v6921_v45 }
 0x12a   : > { %v697_v56 = vpop.f32.mrf.mxu1  ;;  %3326 = vmatpush1.bf16.msra.mxu1 %v5890_v15  ;;  %v7013_v8 = vpack.c.bf16 %v1261_v20, %v1253_v11  ;;  %v7022_v27 = vpop.f32.mrf.mxu0  ;;  %v5904_v15 = vld [vmem:[#allocation2 + $0x684] ss:$16 sps:$4 sm:$0xff]   ;;  %v7035_v21 = vpack.c.bf16 %v1338_v61, %v1330_v0  ;;  %v1238_v25 = vsel %vm982_vm11, %v787_v35, %v1110_v57  ;;  %v1140_v54 = vmul.f32 0.01, %v7011_v7  ;;  %v5902_v35 = vld [vmem:[#allocation2 + $0x680] ss:$16 sps:$4 sm:$0xff]  }
 0x12b   : > { %v698_v23 = vadd.f32 %v697_v56, %v6712_v26  ;;  %8581 = vst [vmem:[#allocation16_spill] sm:$0xff] %v7025_v60  ;;  %3327 = vmatprep.subr.bf16.mxu1 %v5898_v59  ;;  %3229 = vmatpush2.bf16.msra.mxu0 %v5887_v10  ;;  %v1118_v59 = vmul.f32 0.01, %v791_v12  ;;  %v1141_v20 = vmul.f32 0.01, %v7004_v3  ;;  %vm1013_vm14 = vcmp.gt.f32.partialorder %v7004_v3, 0.0 }
 0x12c   : > { %8580 = vst [vmem:[#allocation15_spill] sm:$0xff] %v7013_v8  ;;  %v699_v47 = vpop.f32.mrf.mxu1  ;;  %3139 = vmatprep.mubr.bf16.mxu1 %v7013_v8  ;;  %8582 = vst [vmem:[#allocation17_spill] sm:$0xff] %v7035_v21  ;;  %v7038_v11 = vpop.f32.mrf.mxu0  ;;  %3230 = vmatprep.subr.bf16.mxu0 %v5895_v46  ;;  %v7045_v0 = vpack.c.bf16 %v1355_v17, %v1347_v42  ;;  %vm983_vm15 = vcmp.gt.f32.partialorder %v7020_v29, 0.0  ;;  %vm1012_vm0 = vcmp.gt.f32.partialorder %v7011_v7, 0.0  ;;  %v5910_v57 = vld [vmem:[#allocation2 + $0x664] ss:$16 sps:$4 sm:$0xff]  }
 0x12d   : > { %vm1020_vm13 = vcmp.gt.f32.partialorder %v698_v23, 0.0  ;;  %v1148_v2 = vmul.f32 0.01, %v698_v23  ;;  %v700_v45 = vadd.f32 %v699_v47, %v6737_v51  ;;  %3140 = vmatmul.mubr.bf16.gmra.mxu1 %v7025_v60  ;;  %3067 = vmatmul.mubr.bf16.gmra.mxu0 %v6980_v48  ;;  %v7054_v46 = vadd.f32 %v6904_v62, %v6755_v4 }
 0x12e   : > { %v703_v24 = vpop.f32.mrf.mxu1  ;;  %3328 = vmatpush1.bf16.msra.mxu1 %v5896_v38  ;;  %8583 = vst [vmem:[#allocation18_spill] sm:$0xff] %v7045_v0  ;;  %v7048_v10 = vpop.f32.mrf.mxu0  ;;  %3076 = vmatprep.mubr.bf16.mxu0 %v6982_v33  ;;  %v5899_v38 = vld [vmem:[#allocation2 + $0x580] ss:$16 sps:$4 sm:$0xff]   ;;  %v1111_v17 = vmul.f32 0.01, %v7020_v29  ;;  %v1246_v47 = vsel %vm990_vm12, %v791_v12, %v1118_v59  ;;  %v1269_v62 = vsel %vm1013_vm14, %v7004_v3, %v1141_v20 }
 0x12f   : > { %vm1021_vm1 = vcmp.gt.f32.partialorder %v700_v45, 0.0  ;;  %v1149_v61 = vmul.f32 0.01, %v700_v45  ;;  %3329 = vmatprep.subr.bf16.mxu1 %v5904_v15  ;;  %v7057_v56 = vadd.f32 %v703_v24, %v6712_v26  ;;  %3231 = vmatpush2.bf16.msra.mxu0 %v5893_v19  ;;  %v1276_v42 = vsel %vm1020_vm13, %v698_v23, %v1148_v2  ;;  %v5907_v24 = vld [vmem:[#allocation2 + $0x564] ss:$16 sps:$4 sm:$0xff]  }
 0x130   : > { %v705_v50 = vpop.f32.mrf.mxu1  ;;  %v7063_v15 = vpop.f32.mrf.mxu0  ;;  %3232 = vmatprep.subr.bf16.mxu0 %v5901_v41  ;;  %v1354_v23 = vsel %vm1098_vm6, %v6900_v34, %v6924_v31  ;;  %v1268_v41 = vsel %vm1012_vm0, %v7011_v7, %v1140_v54  ;;  %v5905_v59 = vld [vmem:[#allocation2 + $0x560] ss:$16 sps:$4 sm:$0xff]   ;;  %v7083_v3 = vadd.f32 %v6913_v39, %v6740_v52  ;;  %v7087_v20 = vadd.f32 %v6932_v37, %v6755_v4 }
 0x131   : > { %v7066_v60 = vadd.f32 %v705_v50, %v6737_v51  ;;  %v1277_v19 = vsel %vm1021_vm1, %v700_v45, %v1149_v61  ;;  %v5908_v50 = vld [vmem:[#allocation2 + $0x660] ss:$16 sps:$4 sm:$0xff]   ;;  %v7092_v31 = vpack.c.bf16 %v1276_v42, %v1268_v41  ;;  %v5916_v61 = vld [vmem:[#allocation2 + $0x644] ss:$16 sps:$4 sm:$0xff]   ;;  %vm991_vm2 = vcmp.gt.f32.partialorder %v7054_v46, 0.0 }
 0x132   : > { %v707_v2 = vpop.f32.mrf.mxu1  ;;  %3330 = vmatpush1.bf16.msra.mxu1 %v5902_v35  ;;  %v7076_v12 = vpack.c.bf16 %v1277_v19, %v1269_v62  ;;  %v7089_v45 = vpop.f32.mrf.mxu0  ;;  %v5913_v35 = vld [vmem:[#allocation2 + $0x544] ss:$16 sps:$4 sm:$0xff]   ;;  %v1346_v39 = vsel %vm1090_vm10, %v6884_v9, %v6916_v40  ;;  %v1156_v7 = vmul.f32 0.01, %v7057_v56  ;;  %v5914_v54 = vld [vmem:[#allocation2 + $0x640] ss:$16 sps:$4 sm:$0xff]   ;;  %v7101_v62 = vpack.c.bf16 %v1246_v47, %v1238_v25 }
 0x133   : > { %v708_v34 = vadd.f32 %v707_v2, %v6712_v26  ;;  %8585 = vst [vmem:[#allocation20_spill] sm:$0xff] %v7092_v31  ;;  %3331 = vmatprep.subr.bf16.mxu1 %v5910_v57  ;;  %3233 = vmatpush2.bf16.msra.mxu0 %v5899_v38  ;;  %v1119_v57 = vmul.f32 0.01, %v7054_v46  ;;  %v7104_v42 = vpack.c.bf16 %v1354_v23, %v1346_v39  ;;  %v1157_v2 = vmul.f32 0.01, %v7066_v60 }
 0x134   : > { %8584 = vst [vmem:[#allocation19_spill] sm:$0xff] %v7076_v12  ;;  %v709_v37 = vpop.f32.mrf.mxu1  ;;  %3149 = vmatprep.mubr.bf16.mxu1 %v7076_v12  ;;  %v7106_v19 = vpop.f32.mrf.mxu0  ;;  %3234 = vmatprep.subr.bf16.mxu0 %v5907_v24  ;;  %vm1028_vm4 = vcmp.gt.f32.partialorder %v7057_v56, 0.0  ;;  %vm1029_vm5 = vcmp.gt.f32.partialorder %v7066_v60, 0.0  ;;  %v7114_v25 = vmul.f32 0.01, %v7083_v3  ;;  %vm999_vm6 = vcmp.gt.f32.partialorder %v7087_v20, 0.0 }
 0x135   : > { %8586 = vst [vmem:[#allocation21_spill] sm:$0xff] %v7104_v42  ;;  %vm1036_vm3 = vcmp.gt.f32.partialorder %v708_v34, 0.0  ;;  %v1164_v41 = vmul.f32 0.01, %v708_v34  ;;  %v710_v9 = vadd.f32 %v709_v37, %v6737_v51  ;;  %3150 = vmatmul.mubr.bf16.gmra.mxu1 %v7092_v31  ;;  %3077 = vmatmul.mubr.bf16.gmra.mxu0 %v7035_v21  ;;  %v5922_v23 = vld [vmem:[#allocation2 + $0x624] ss:$16 sps:$4 sm:$0xff]   ;;  %v7122_v24 = vadd.f32 %v6951_v30, %v6740_v52 }
 0x136   : > { %v713_v40 = vpop.f32.mrf.mxu1  ;;  %3332 = vmatpush1.bf16.msra.mxu1 %v5908_v50  ;;  %v7117_v38 = vpop.f32.mrf.mxu0  ;;  %v7126_v50 = vadd.f32 %v6972_v16, %v6755_v4  ;;  %3086 = vmatprep.mubr.bf16.mxu0 %v7045_v0  ;;  %v5911_v37 = vld [vmem:[#allocation2 + $0x540] ss:$16 sps:$4 sm:$0xff]   ;;  %vm998_vm8 = vcmp.gt.f32.partialorder %v7083_v3, 0.0  ;;  %v1239_v30 = vsel %vm983_vm15, %v7020_v29, %v1111_v17  ;;  %v1247_v16 = vsel %vm991_vm2, %v7054_v46, %v1119_v57  ;;  %v5919_v29 = vld [vmem:[#allocation2 + $0x524] ss:$16 sps:$4 sm:$0xff]  }
 0x137   : > { %vm1037_vm7 = vcmp.gt.f32.partialorder %v710_v9, 0.0  ;;  %v1165_v47 = vmul.f32 0.01, %v710_v9  ;;  %3333 = vmatprep.subr.bf16.mxu1 %v5916_v61  ;;  %3235 = vmatpush2.bf16.msra.mxu0 %v5905_v59  ;;  %v1292_v31 = vsel %vm1036_vm3, %v708_v34, %v1164_v41  ;;  %v7132_v61 = vmul.f32 0.01, %v7087_v20 }
 0x138   : > { %v715_v39 = vpop.f32.mrf.mxu1  ;;  %v7140_v21 = vpop.f32.mrf.mxu0  ;;  %3236 = vmatprep.subr.bf16.mxu0 %v5913_v35  ;;  %v1285_v34 = vsel %vm1029_vm5, %v7066_v60, %v1157_v2  ;;  %v1284_v0 = vsel %vm1028_vm4, %v7057_v56, %v1156_v7  ;;  %v7151_v17 = vadd.f32 %v713_v40, %v6712_v26  ;;  %v5920_v35 = vld [vmem:[#allocation2 + $0x620] ss:$16 sps:$4 sm:$0xff]   ;;  %v7157_v12 = vadd.f32 %v6984_v43, %v6740_v52 }
 0x139   : > { %v716_v59 = vadd.f32 %v715_v39, %v6737_v51  ;;  %v1293_v41 = vsel %vm1037_vm7, %v710_v9, %v1165_v47  ;;  %v5917_v39 = vld [vmem:[#allocation2 + $0x520] ss:$16 sps:$4 sm:$0xff]   ;;  %v7161_v60 = vadd.f32 %v7001_v49, %v6755_v4  ;;  %v7166_v7 = vpack.c.bf16 %v1292_v31, %v1284_v0  ;;  %v5928_v9 = vld [vmem:[#allocation2 + $0x604] ss:$16 sps:$4 sm:$0xff]  }
 0x13a   : > { %v717_v46 = vpop.f32.mrf.mxu1  ;;  %3334 = vmatpush1.bf16.msra.mxu1 %v5914_v54  ;;  %v7153_v57 = vpack.c.bf16 %v1293_v41, %v1285_v34  ;;  %v7163_v2 = vpop.f32.mrf.mxu0  ;;  %v5925_v54 = vld [vmem:[#allocation2 + $0x504] ss:$16 sps:$4 sm:$0xff]   ;;  %vm1006_vm9 = vcmp.gt.f32.partialorder %v7122_v24, 0.0  ;;  %v1134_v40 = vmul.f32 0.01, %v7122_v24  ;;  %vm1007_vm10 = vcmp.gt.f32.partialorder %v7126_v50, 0.0 }
 0x13b   : > { %v718_v56 = vadd.f32 %v717_v46, %v6712_v26  ;;  %8588 = vst [vmem:[#allocation23_spill] sm:$0xff] %v7166_v7  ;;  %3335 = vmatprep.subr.bf16.mxu1 %v5922_v23  ;;  %3237 = vmatpush2.bf16.msra.mxu0 %v5911_v37  ;;  %v5926_v47 = vld [vmem:[#allocation2 + $0x600] ss:$16 sps:$4 sm:$0xff]   ;;  %v1135_v49 = vmul.f32 0.01, %v7126_v50  ;;  %v7173_v34 = vpack.c.bf16 %v1247_v16, %v1239_v30  ;;  %vm1045_vm12 = vcmp.gt.f32.partialorder %v716_v59, 0.0 }
 0x13c   : > { %8587 = vst [vmem:[#allocation22_spill] sm:$0xff] %v7153_v57  ;;  %v719_v43 = vpop.f32.mrf.mxu1  ;;  %3159 = vmatprep.mubr.bf16.mxu1 %v7153_v57  ;;  %v7177_v0 = vadd.f32 %v7022_v27, %v6740_v52  ;;  %v7179_v31 = vpop.f32.mrf.mxu0  ;;  %v1173_v23 = vmul.f32 0.01, %v716_v59  ;;  %3238 = vmatprep.subr.bf16.mxu0 %v5919_v29  ;;  %v5931_v46 = vld [vmem:[#allocation2 + $0x7e4] ss:$16 sps:$4 sm:$0xff]   ;;  %vm1015_vm13 = vcmp.gt.f32.partialorder %v7161_v60, 0.0  ;;  %v7202_v8 = vadd.f32 %v7038_v11, %v6755_v4 }
 0x13d   : > { %8589 = vst [vmem:[#allocation24_spill] sm:$0xff] %v7173_v34  ;;  %vm1052_vm11 = vcmp.gt.f32.partialorder %v718_v56, 0.0  ;;  %v1180_v41 = vmul.f32 0.01, %v718_v56  ;;  %v720_v37 = vadd.f32 %v719_v43, %v6737_v51  ;;  %3160 = vmatmul.mubr.bf16.gmra.mxu1 %v7166_v7  ;;  %v1172_v57 = vmul.f32 0.01, %v7151_v17  ;;  %3087 = vmatmul.mubr.bf16.gmra.mxu0 %v7104_v42 }
 0x13e   : > { %v723_v30 = vpop.f32.mrf.mxu1  ;;  %3336 = vmatpush1.bf16.msra.mxu1 %v5920_v35  ;;  %v7185_v16 = vmul.f32 0.01, %v7157_v12  ;;  %vm1044_vm14 = vcmp.gt.f32.partialorder %v7151_v17, 0.0  ;;  %v7191_v29 = vmul.f32 0.01, %v7161_v60  ;;  %v7193_v43 = vpop.f32.mrf.mxu0  ;;  %3242 = vmatprep.mubr.bf16.mxu0 %v7173_v34  ;;  %v1301_v34 = vsel %vm1045_vm12, %v716_v59, %v1173_v23 }
 0x13f   : > { %vm1053_vm15 = vcmp.gt.f32.partialorder %v720_v37, 0.0  ;;  %v1181_v27 = vmul.f32 0.01, %v720_v37  ;;  %3337 = vmatprep.subr.bf16.mxu1 %v5928_v9  ;;  %3239 = vmatpush2.bf16.msra.mxu0 %v5917_v39  ;;  %v5923_v35 = vld [vmem:[#allocation2 + $0x500] ss:$16 sps:$4 sm:$0xff]   ;;  %v1308_v33 = vsel %vm1052_vm11, %v718_v56, %v1180_v41  ;;  %v1255_v9 = vsel %vm999_vm6, %v7087_v20, %v7132_v61 }
 0x140   : > { %v725_v7 = vpop.f32.mrf.mxu1  ;;  %v7198_v48 = vmul.f32 0.01, %v7177_v0  ;;  %3240 = vmatprep.subr.bf16.mxu0 %v5925_v54  ;;  %v5934_v41 = vld [vmem:[#allocation2 + $0xec] ss:$16 sps:$4 sm:$0xff]   ;;  %v1263_v42 = vsel %vm1007_vm10, %v7126_v50, %v1135_v49  ;;  %v7217_v11 = vadd.f32 %v723_v30, %v6712_v26  ;;  %v1300_v20 = vsel %vm1044_vm14, %v7151_v17, %v1172_v57  ;;  %v5929_v61 = vld [vmem:[#allocation2 + $0x7e0] ss:$16 sps:$4 sm:$0xff]  }
 0x141   : > { %v7209_v39 = vadd.f32 %v725_v7, %v6737_v51  ;;  %v1309_v56 = vsel %vm1053_vm15, %v720_v37, %v1181_v27  ;;  %vm1014_vm0 = vcmp.gt.f32.partialorder %v7157_v12, 0.0  ;;  %v7227_v59 = vadd.f32 %v7048_v10, %v6740_v52  ;;  %v5932_v54 = vld [vmem:[#allocation2 + $0xe8] ss:$16 sps:$4 sm:$0xff]   ;;  %v7240_v10 = vpop.f32.mrf.mxu0  ;;  %v5940_v49 = vld [vmem:[#allocation2 + $0xcc] ss:$16 sps:$4 sm:$0xff]  }
 0x142   : > { %v727_v63 = vpop.f32.mrf.mxu1  ;;  %3338 = vmatpush1.bf16.msra.mxu1 %v5926_v47  ;;  %v7219_v32 = vpack.c.bf16 %v1309_v56, %v1301_v34  ;;  %v7230_v7 = vpack.c.bf16 %v1308_v33, %v1300_v20  ;;  %v5937_v47 = vld [vmem:[#allocation2 + $0x7c4] ss:$16 sps:$4 sm:$0xff]   ;;  %vm1022_vm1 = vcmp.gt.f32.partialorder %v7177_v0, 0.0  ;;  %v1254_v17 = vsel %vm998_vm8, %v7083_v3, %v7114_v25  ;;  %v5935_v33 = vld [vmem:[#allocation2 + $0x7c0] ss:$16 sps:$4 sm:$0xff]  }
 0x143   : > { %v728_v50 = vadd.f32 %v727_v63, %v6712_v26  ;;  %3339 = vmatprep.subr.bf16.mxu1 %v5931_v46  ;;  %v1262_v57 = vsel %vm1006_vm9, %v7122_v24, %v1134_v40  ;;  %3241 = vmatpush2.bf16.msra.mxu0 %v5923_v35  ;;  %vm1023_vm2 = vcmp.gt.f32.partialorder %v7202_v8, 0.0  ;;  %v1151_v34 = vmul.f32 0.01, %v7202_v8  ;;  %v5943_v27 = vld [vmem:[#allocation2 + $0x7a4] ss:$16 sps:$4 sm:$0xff]  }
 0x144   : > { %v729_v63 = vpop.f32.mrf.mxu1  ;;  %3169 = vmatprep.mubr.bf16.mxu1 %v7219_v32  ;;  %v7245_v23 = vpack.c.bf16 %v1263_v42, %v1255_v9  ;;  %v7249_v3 = vadd.f32 %v7063_v15, %v6755_v4  ;;  %v1189_v25 = vmul.f32 0.01, %v7209_v39  ;;  %3436 = vmatprep.subr.bf16.mxu0 %v5934_v41  ;;  %v1188_v37 = vmul.f32 0.01, %v7217_v11  ;;  %v7267_v9 = vpop.f32.mrf.mxu0  ;;  %v5938_v41 = vld [vmem:[#allocation2 + $0xc8] ss:$16 sps:$4 sm:$0xff]  }
 0x145   : > { %vm1068_vm3 = vcmp.gt.f32.partialorder %v728_v50, 0.0  ;;  %v1196_v24 = vmul.f32 0.01, %v728_v50  ;;  %v730_v40 = vadd.f32 %v729_v63, %v6737_v51  ;;  %3170 = vmatmul.mubr.bf16.gmra.mxu1 %v7230_v7  ;;  %vm1061_vm4 = vcmp.gt.f32.partialorder %v7209_v39, 0.0 }
 0x146   : > { %v733_v46 = vpop.f32.mrf.mxu1  ;;  %3340 = vmatpush2.bf16.msra.mxu1 %v5929_v61  ;;  %v7256_v42 = vpack.c.bf16 %v1262_v57, %v1254_v17  ;;  %v7259_v15 = vmul.f32 0.01, %v7227_v59  ;;  %vm1060_vm5 = vcmp.gt.f32.partialorder %v7217_v11, 0.0  ;;  %3243 = vmatmul.mubr.bf16.vlgmr.msra.gmra.mxu0 %v7101_v62  ;;  %v7265_v35 = vadd.f32 %v7089_v45, %v6740_v52  ;;  %v5946_v17 = vld [vmem:[#allocation2 + $0xac] ss:$16 sps:$4 sm:$0xff]  }
 0x147   : > { %vm1069_vm6 = vcmp.gt.f32.partialorder %v730_v40, 0.0  ;;  %v1197_v30 = vmul.f32 0.01, %v730_v40  ;;  %3341 = vmatprep.subr.bf16.mxu1 %v5937_v47  ;;  %3437 = vmatpush1.bf16.msra.mxu0 %v5932_v54  ;;  %v1324_v20 = vsel %vm1068_vm3, %v728_v50, %v1196_v24  ;;  %vm1031_vm7 = vcmp.gt.f32.partialorder %v7249_v3, 0.0 }
 0x148   : > { %v735_v56 = vpop.f32.mrf.mxu1  ;;  %3252 = vmatprep.mubr.bf16.mxu0 %v7245_v23  ;;  %v7274_v61 = vadd.f32 %v7106_v19, %v6755_v4  ;;  %v1271_v45 = vsel %vm1015_vm13, %v7161_v60, %v7191_v29  ;;  %3438 = vmatprep.subr.bf16.mxu0 %v5940_v49  ;;  %v1317_v54 = vsel %vm1061_vm4, %v7209_v39, %v1189_v25  ;;  %v5941_v49 = vld [vmem:[#allocation2 + $0x7a0] ss:$16 sps:$4 sm:$0xff]   ;;  %v1159_v39 = vmul.f32 0.01, %v7249_v3 }
 0x149   : > { %v736_v47 = vadd.f32 %v735_v56, %v6737_v51  ;;  %v1325_v50 = vsel %vm1069_vm6, %v730_v40, %v1197_v30  ;;  %v1279_v19 = vsel %vm1023_vm2, %v7202_v8, %v1151_v34  ;;  %v7289_v57 = vadd.f32 %v733_v46, %v6712_v26  ;;  %v5949_v8 = vld [vmem:[#allocation2 + $0x784] ss:$16 sps:$4 sm:$0xff]   ;;  %v5952_v56 = vld [vmem:[#allocation2 + $0x8c] ss:$16 sps:$4 sm:$0xff]  }
 0x14a   : > { %v737_v63 = vpop.f32.mrf.mxu1  ;;  %3342 = vmatpush2.bf16.msra.mxu1 %v5935_v33  ;;  %v7291_v60 = vpack.c.bf16 %v1325_v50, %v1317_v54  ;;  %v1316_v29 = vsel %vm1060_vm5, %v7217_v11, %v1188_v37  ;;  %vm1030_vm8 = vcmp.gt.f32.partialorder %v7227_v59, 0.0  ;;  %vm1038_vm9 = vcmp.gt.f32.partialorder %v7265_v35, 0.0  ;;  %v7302_v33 = vpop.f32.mrf.mxu0  ;;  %v5944_v11 = vld [vmem:[#allocation2 + $0xa8] ss:$16 sps:$4 sm:$0xff]  }
 0x14b   : > { %v1205_v25 = vmul.f32 0.01, %v736_v47  ;;  %v738_v24 = vadd.f32 %v737_v63, %v6712_v26  ;;  %v7298_v40 = vpack.c.bf16 %v1324_v20, %v1316_v29  ;;  %3343 = vmatprep.subr.bf16.mxu1 %v5943_v27  ;;  %vm1077_vm10 = vcmp.gt.f32.partialorder %v736_v47, 0.0  ;;  %3439 = vmatpush1.bf16.msra.mxu0 %v5938_v41 }
 0x14c   : > { %v739_v34 = vpop.f32.mrf.mxu1  ;;  %3179 = vmatprep.mubr.bf16.mxu1 %v7291_v60  ;;  %vm1039_vm11 = vcmp.gt.f32.partialorder %v7274_v61, 0.0  ;;  %v1167_v37 = vmul.f32 0.01, %v7274_v61  ;;  %v7307_v46 = vpack.c.bf16 %v1279_v19, %v1271_v45  ;;  %3440 = vmatprep.subr.bf16.mxu0 %v5946_v17  ;;  %v1270_v41 = vsel %vm1014_vm0, %v7157_v12, %v7185_v16  ;;  %v5947_v45 = vld [vmem:[#allocation2 + $0x780] ss:$16 sps:$4 sm:$0xff]   ;;  %v7331_v29 = vpop.f32.mrf.mxu0 }
 0x14d   : > { %vm1084_vm12 = vcmp.gt.f32.partialorder %v738_v24, 0.0  ;;  %v1212_v30 = vmul.f32 0.01, %v738_v24  ;;  %v740_v27 = vadd.f32 %v739_v34, %v6737_v51  ;;  %3180 = vmatmul.mubr.bf16.gmra.mxu1 %v7298_v40  ;;  %vm1076_vm13 = vcmp.gt.f32.partialorder %v7289_v57, 0.0  ;;  %v5955_v16 = vld [vmem:[#allocation2 + $0x764] ss:$16 sps:$4 sm:$0xff]  }
 0x14e   : > { %v1204_v20 = vmul.f32 0.01, %v7289_v57  ;;  %v743_v54 = vpop.f32.mrf.mxu1  ;;  %3344 = vmatpush2.bf16.msra.mxu1 %v5941_v49  ;;  %v1278_v50 = vsel %vm1022_vm1, %v7177_v0, %v7198_v48  ;;  %v7323_v17 = vadd.f32 %v7117_v38, %v6740_v52  ;;  %3253 = vmatmul.mubr.bf16.gmra.mxu0 %v7256_v42  ;;  %v1333_v12 = vsel %vm1077_vm10, %v736_v47, %v1205_v25  ;;  %v5950_v0 = vld [vmem:[#allocation2 + $0x88] ss:$16 sps:$4 sm:$0xff]   ;;  %v5958_v34 = vld [vmem:[#allocation2 + $0x6c] ss:$16 sps:$4 sm:$0xff]  }
 0x14f   : > { %vm1085_vm14 = vcmp.gt.f32.partialorder %v740_v27, 0.0  ;;  %v1213_v19 = vmul.f32 0.01, %v740_v27  ;;  %3345 = vmatprep.subr.bf16.mxu1 %v5949_v8  ;;  %v7329_v63 = vadd.f32 %v7140_v21, %v6755_v4  ;;  %v7334_v48 = vadd.f32 %v743_v54, %v6712_v26  ;;  %3441 = vmatpush1.bf16.msra.mxu0 %v5944_v11 }
 0x150   : > { %v745_v38 = vpop.f32.mrf.mxu1  ;;  %v1166_v49 = vmul.f32 0.01, %v7265_v35  ;;  %3262 = vmatprep.mubr.bf16.mxu0 %v7307_v46  ;;  %v1340_v8 = vsel %vm1084_vm12, %v738_v24, %v1212_v30  ;;  %v7341_v47 = vadd.f32 %v7163_v2, %v6740_v52  ;;  %3442 = vmatprep.subr.bf16.mxu0 %v5952_v56  ;;  %v1287_v11 = vsel %vm1031_vm7, %v7249_v3, %v1159_v39 }
 0x151   : > { %v7344_v21 = vadd.f32 %v745_v38, %v6737_v51  ;;  %v1341_v25 = vsel %vm1085_vm14, %v740_v27, %v1213_v19  ;;  %v1295_v54 = vsel %vm1039_vm11, %v7274_v61, %v1167_v37  ;;  %v1332_v2 = vsel %vm1076_vm13, %v7289_v57, %v1204_v20  ;;  %v5953_v27 = vld [vmem:[#allocation2 + $0x760] ss:$16 sps:$4 sm:$0xff]   ;;  %v5956_v19 = vld [vmem:[#allocation2 + $0x68] ss:$16 sps:$4 sm:$0xff]   ;;  %v5961_v37 = vld [vmem:[#allocation2 + $0x744] ss:$16 sps:$4 sm:$0xff]  }
 0x152   : > { %v747_v24 = vpop.f32.mrf.mxu1  ;;  %3346 = vmatpush2.bf16.msra.mxu1 %v5947_v45  ;;  %v7353_v30 = vpack.c.bf16 %v1341_v25, %v1333_v12  ;;  %v7358_v56 = vpack.c.bf16 %v1278_v50, %v1270_v41  ;;  %v7361_v38 = vmul.f32 0.01, %v7323_v17  ;;  %v7364_v39 = vpack.c.bf16 %v1340_v8, %v1332_v2  ;;  %v7370_v45 = vpop.f32.mrf.mxu0  ;;  %v5959_v25 = vld [vmem:[#allocation2 + $0x740] ss:$16 sps:$4 sm:$0xff]  }
 0x153   : > { %v748_v3 = vadd.f32 %v747_v24, %v6712_v26  ;;  %3347 = vmatprep.subr.bf16.mxu1 %v5955_v16  ;;  %vm1047_vm15 = vcmp.gt.f32.partialorder %v7329_v63, 0.0  ;;  %v7368_v61 = vmul.f32 0.01, %v7329_v63  ;;  %vm1092_vm0 = vcmp.gt.f32.partialorder %v7334_v48, 0.0  ;;  %3443 = vmatpush1.bf16.msra.mxu0 %v5950_v0  ;;  %v5964_v26 = vld [vmem:[#allocation2 + $0x4c] ss:$16 sps:$4 sm:$0xff]  }
 0x154   : > { %8590 = vst [vmem:[#allocation25_spill] sm:$0xff] %v7358_v56  ;;  %8591 = vst [vmem:[#allocation26_spill] sm:$0xff] %v7364_v39  ;;  %v1220_v57 = vmul.f32 0.01, %v7334_v48  ;;  %v749_v41 = vpop.f32.mrf.mxu1  ;;  %3189 = vmatprep.mubr.bf16.mxu1 %v7353_v30  ;;  %vm1046_vm1 = vcmp.gt.f32.partialorder %v7323_v17, 0.0  ;;  %v833_v20 = vadd.f32 %v7179_v31, %v6755_v4  ;;  %v7378_v50 = vpack.c.bf16 %v1295_v54, %v1287_v11 }
 0x155   : > { %v1221_v12 = vmul.f32 0.01, %v7344_v21  ;;  %vm1100_vm2 = vcmp.gt.f32.partialorder %v748_v3, 0.0  ;;  %v1228_v16 = vmul.f32 0.01, %v748_v3  ;;  %v750_v8 = vadd.f32 %v749_v41, %v6737_v51  ;;  %3190 = vmatmul.mubr.bf16.gmra.mxu1 %v7364_v39  ;;  %3444 = vmatprep.subr.bf16.mxu0 %v5958_v34 }
 0x156   : > { %8592 = vst [vmem:[#allocation27_spill] sm:$0xff] %v7378_v50  ;;  %vm1054_vm3 = vcmp.gt.f32.partialorder %v7341_v47, 0.0  ;;  %vm1093_vm4 = vcmp.gt.f32.partialorder %v7344_v21, 0.0  ;;  %v899_v0 = vpop.f32.mrf.mxu1  ;;  %3348 = vmatpush2.bf16.msra.mxu1 %v5953_v27  ;;  %v1286_v31 = vsel %vm1030_vm8, %v7227_v59, %v7259_v15  ;;  %v1294_v11 = vsel %vm1038_vm9, %v7265_v35, %v1166_v49  ;;  %v5967_v51 = vld [vmem:[#allocation2 + $0x724] ss:$16 sps:$4 sm:$0xff]   ;;  %3263 = vmatmul.mubr.bf16.gmra.mxu0 %v7358_v56  ;;  %v7404_v15 = vpop.f32.mrf.mxu0 }
 0x157   : > { %v7394_v34 = vadd.f32 %v7193_v43, %v6740_v52  ;;  %vm1101_vm5 = vcmp.gt.f32.partialorder %v750_v8, 0.0  ;;  %v1229_v54 = vmul.f32 0.01, %v750_v8  ;;  %3349 = vmatprep.subr.bf16.mxu1 %v5961_v37  ;;  %v7398_v24 = vmul.f32 0.01, %v7341_v47  ;;  %3445 = vmatpush1.bf16.msra.mxu0 %v5956_v19 }
 0x158   : > { %v7402_v59 = vadd.f32 %v7240_v10, %v6755_v4  ;;  %v901_v35 = vpop.f32.mrf.mxu1  ;;  %v5962_v49 = vld [vmem:[#allocation2 + $0x48] ss:$16 sps:$4 sm:$0xff]   ;;  %vm1055_vm6 = vcmp.gt.f32.partialorder %v833_v20, 0.0  ;;  %v1183_v43 = vmul.f32 0.01, %v833_v20  ;;  %3272 = vmatprep.mubr.bf16.mxu0 %v7378_v50  ;;  %v1348_v2 = vsel %vm1092_vm0, %v7334_v48, %v1220_v57  ;;  %3446 = vmatprep.subr.bf16.mxu0 %v5964_v26 }
 0x159   : > { %v1356_v27 = vsel %vm1100_vm2, %v748_v3, %v1228_v16  ;;  %v7412_v37 = vadd.f32 %v901_v35, %v6761_v5  ;;  %v1349_v10 = vsel %vm1093_vm4, %v7344_v21, %v1221_v12  ;;  %v1357_v19 = vsel %vm1101_vm5, %v750_v8, %v1229_v54  ;;  %v5970_v56 = vld [vmem:[#allocation2 + $0x2c] ss:$16 sps:$4 sm:$0xff]   ;;  %v5965_v3 = vld [vmem:[#allocation2 + $0x720] ss:$16 sps:$4 sm:$0xff]   ;;  %v5973_v8 = vld [vmem:[#allocation2 + $0x704] ss:$16 sps:$4 sm:$0xff]  }
 0x15a   : > { %v7418_v41 = vpack.c.bf16 %v1294_v11, %v1286_v31  ;;  %v900_v50 = vadd.f32 %v899_v0, %v6758_v6  ;;  %v903_v39 = vpop.f32.mrf.mxu1  ;;  %3350 = vmatpush2.bf16.msra.mxu1 %v5959_v25  ;;  %v7421_v48 = vpack.c.bf16 %v1357_v19, %v1349_v10  ;;  %v7424_v57 = vmul.f32 0.01, %v7394_v34  ;;  %v7437_v0 = vpop.f32.mrf.mxu0  ;;  %v5971_v11 = vld [vmem:[#allocation2 + $0x700] ss:$16 sps:$4 sm:$0xff]  }
 0x15b   : > { %v7428_v26 = vadd.f32 %v7267_v9, %v6740_v52  ;;  %v904_v21 = vadd.f32 %v903_v39, %v6758_v6  ;;  %v7431_v12 = vpack.c.bf16 %v1356_v27, %v1348_v2  ;;  %3351 = vmatprep.subr.bf16.mxu1 %v5967_v51  ;;  %vm1063_vm7 = vcmp.gt.f32.partialorder %v7402_v59, 0.0  ;;  %3447 = vmatpush1.bf16.msra.mxu0 %v5962_v49  ;;  %v5968_v9 = vld [vmem:[#allocation2 + $0x28] ss:$16 sps:$4 sm:$0xff]   ;;  %v5976_v2 = vld [vmem:[#allocation2 + $0xc] ss:$16 sps:$4 sm:$0xff]  }
 0x15c   : > { %v7435_v16 = vmul.f32 0.01, %v7402_v59  ;;  %v1113_v25 = vmul.f32 0.01, %v7412_v37  ;;  %v905_v31 = vpop.f32.mrf.mxu1  ;;  %3199 = vmatprep.mubr.bf16.mxu1 %v7421_v48  ;;  %v7443_v39 = vadd.f32 %v7302_v33, %v6755_v4  ;;  %v1303_v51 = vsel %vm1047_vm15, %v7329_v63, %v7368_v61  ;;  %3448 = vmatprep.subr.bf16.mxu0 %v5970_v56  ;;  %v5982_v61 = vld [vmem:[#allocation2 + $0x2ec] ss:$16 sps:$4 sm:$0xff]  }
 0x15d   : > { %v1311_v54 = vsel %vm1055_vm6, %v833_v20, %v1183_v43  ;;  %vm992_vm8 = vcmp.gt.f32.partialorder %v904_v21, 0.0  ;;  %v1120_v35 = vmul.f32 0.01, %v904_v21  ;;  %v906_v49 = vadd.f32 %v905_v31, %v6761_v5  ;;  %3200 = vmatmul.mubr.bf16.gmra.mxu1 %v7431_v12  ;;  %v7466_v43 = vpop.f32.mrf.mxu0 }
 0x15e   : > { %vm1062_vm9 = vcmp.gt.f32.partialorder %v7394_v34, 0.0  ;;  %v7453_v27 = vpack.c.bf16 %v1311_v54, %v1303_v51  ;;  %vm984_vm10 = vcmp.gt.f32.partialorder %v900_v50, 0.0  ;;  %v1112_v33 = vmul.f32 0.01, %v900_v50  ;;  %v909_v10 = vpop.f32.mrf.mxu1  ;;  %3352 = vmatpush2.bf16.msra.mxu1 %v5965_v3  ;;  %3273 = vmatmul.mubr.bf16.gmra.mxu0 %v7418_v41  ;;  %v5979_v54 = vld [vmem:[#allocation2 + $0x1ec] ss:$16 sps:$4 sm:$0xff]  }
 0x15f   : > { %vm985_vm11 = vcmp.gt.f32.partialorder %v7412_v37, 0.0  ;;  %vm1070_vm12 = vcmp.gt.f32.partialorder %v7428_v26, 0.0  ;;  %vm993_vm13 = vcmp.gt.f32.partialorder %v906_v49, 0.0  ;;  %v1121_v63 = vmul.f32 0.01, %v906_v49  ;;  %3353 = vmatprep.subr.bf16.mxu1 %v5973_v8  ;;  %3449 = vmatpush1.bf16.msra.mxu0 %v5968_v9 }
 0x160   : > { %v1302_v56 = vsel %vm1046_vm1, %v7323_v17, %v7361_v38  ;;  %v7464_v20 = vadd.f32 %v7331_v29, %v6740_v52  ;;  %v1248_v19 = vsel %vm992_vm8, %v904_v21, %v1120_v35  ;;  %v7470_v3 = vadd.f32 %v909_v10, %v6758_v6  ;;  %v911_v31 = vpop.f32.mrf.mxu1  ;;  %v5974_v8 = vld [vmem:[#allocation2 + $0x8] ss:$16 sps:$4 sm:$0xff]   ;;  %3282 = vmatprep.mubr.bf16.mxu0 %v7453_v27 }
 0x161   : > { %v1198_v51 = vmul.f32 0.01, %v7428_v26  ;;  %v1310_v17 = vsel %vm1054_vm3, %v7341_v47, %v7398_v24  ;;  %v7479_v29 = vadd.f32 %v911_v31, %v6761_v5  ;;  %3450 = vmatprep.subr.bf16.mxu0 %v5976_v2  ;;  %v1199_v38 = vmul.f32 0.01, %v7443_v39  ;;  %v5980_v24 = vld [vmem:[#allocation2 + $0x2e8] ss:$16 sps:$4 sm:$0xff]  }
 0x162   : > { %v1241_v21 = vsel %vm985_vm11, %v7412_v37, %v1113_v25  ;;  %v1249_v9 = vsel %vm993_vm13, %v906_v49, %v1121_v63  ;;  %v1240_v35 = vsel %vm984_vm10, %v900_v50, %v1112_v33  ;;  %v913_v10 = vpop.f32.mrf.mxu1  ;;  %3354 = vmatpush2.bf16.msra.mxu1 %v5971_v11  ;;  %vm1071_vm14 = vcmp.gt.f32.partialorder %v7443_v39, 0.0  ;;  %v5977_v49 = vld [vmem:[#allocation2 + $0x1e8] ss:$16 sps:$4 sm:$0xff]   ;;  %v5988_v11 = vld [vmem:[#allocation2 + $0x2cc] ss:$16 sps:$4 sm:$0xff]   ;;  %v7502_v33 = vpop.f32.mrf.mxu0 }
 0x163   : > { %v7488_v47 = vpack.c.bf16 %v1249_v9, %v1241_v21  ;;  %v7492_v2 = vadd.f32 %v7370_v45, %v6755_v4  ;;  %v7494_v31 = vpack.c.bf16 %v1248_v19, %v1240_v35  ;;  %v914_v37 = vadd.f32 %v913_v10, %v6758_v6  ;;  %3549 = vmatprep.subr.bf16.mxu1 %v5982_v61  ;;  %v5985_v21 = vld [vmem:[#allocation2 + $0x1cc] ss:$16 sps:$4 sm:$0xff]   ;;  %v5986_v35 = vld [vmem:[#allocation2 + $0x2c8] ss:$16 sps:$4 sm:$0xff]  }
 0x164   : > { %v7497_v25 = vpack.c.bf16 %v1310_v17, %v1302_v56  ;;  %v7500_v50 = vmul.f32 0.01, %v7464_v20  ;;  %vm1000_vm15 = vcmp.gt.f32.partialorder %v7470_v3, 0.0  ;;  %v1128_v63 = vmul.f32 0.01, %v7470_v3  ;;  %3451 = vmatpush1.bf16.msra.mxu0 %v5974_v8  ;;  %v915_v19 = vpop.f32.mrf.mxu1 }
 0x165   : > { %v1129_v45 = vmul.f32 0.01, %v7479_v29  ;;  %3355 = vmatprep.mubr.bf16.mxu1 %v7488_v47  ;;  %v1319_v56 = vsel %vm1063_vm7, %v7402_v59, %v7435_v16  ;;  %vm1008_vm0 = vcmp.gt.f32.partialorder %v914_v37, 0.0  ;;  %v1136_v61 = vmul.f32 0.01, %v914_v37  ;;  %3452 = vmatprep.subr.bf16.mxu0 %v5979_v54 }
 0x166   : > { %v916_v17 = vadd.f32 %v915_v19, %v6761_v5  ;;  %3356 = vmatmul.mubr.bf16.vlgmr.msra.gmra.mxu1 %v7494_v31  ;;  %v1327_v8 = vsel %vm1071_vm14, %v7443_v39, %v1199_v38  ;;  %vm1001_vm1 = vcmp.gt.f32.partialorder %v7479_v29, 0.0  ;;  %v919_v9 = vpop.f32.mrf.mxu1  ;;  %vm1079_vm2 = vcmp.gt.f32.partialorder %v7492_v2, 0.0  ;;  %3283 = vmatmul.mubr.bf16.gmra.mxu0 %v7497_v25  ;;  %v5994_v10 = vld [vmem:[#allocation2 + $0x2ac] ss:$16 sps:$4 sm:$0xff]  }
 0x167   : > { %3550 = vmatpush1.bf16.msra.mxu1 %v5980_v24  ;;  %v7521_v59 = vadd.f32 %v7404_v15, %v6740_v52  ;;  %v7523_v16 = vpack.c.bf16 %v1327_v8, %v1319_v56  ;;  %vm1078_vm4 = vcmp.gt.f32.partialorder %v7464_v20, 0.0  ;;  %v920_v39 = vadd.f32 %v919_v9, %v6758_v6  ;;  %v7530_v24 = vpop.f32.mrf.mxu0  ;;  %v5983_v8 = vld [vmem:[#allocation2 + $0x1c8] ss:$16 sps:$4 sm:$0xff]  }
 0x168   : > { %vm1009_vm3 = vcmp.gt.f32.partialorder %v916_v17, 0.0  ;;  %v1137_v54 = vmul.f32 0.01, %v916_v17  ;;  %3551 = vmatprep.subr.bf16.mxu1 %v5988_v11  ;;  %v853_v38 = vadd.f32 %v7437_v0, %v6755_v4  ;;  %v1264_v15 = vsel %vm1008_vm0, %v914_v37, %v1136_v61  ;;  %3453 = vmatpush2.bf16.msra.mxu0 %v5977_v49  ;;  %v921_v56 = vpop.f32.mrf.mxu1 }
 0x169   : > { %8593 = vst [vmem:[#allocation28_spill] sm:$0xff] %v7523_v16  ;;  %v1207_v19 = vmul.f32 0.01, %v7492_v2  ;;  %3292 = vmatprep.mubr.bf16.mxu0 %v7523_v16  ;;  %v1318_v11 = vsel %vm1062_vm9, %v7394_v34, %v7424_v57  ;;  %v1326_v0 = vsel %vm1070_vm12, %v7428_v26, %v1198_v51  ;;  %v1256_v37 = vsel %vm1000_vm15, %v7470_v3, %v1128_v63  ;;  %v5991_v16 = vld [vmem:[#allocation2 + $0x1ac] ss:$16 sps:$4 sm:$0xff]  }
 0x16a   : > { %v1144_v49 = vmul.f32 0.01, %v920_v39  ;;  %3454 = vmatprep.subr.bf16.mxu0 %v5985_v21  ;;  %v1257_v61 = vsel %vm1001_vm1, %v7479_v29, %v1129_v45  ;;  %v1265_v9 = vsel %vm1009_vm3, %v916_v17, %v1137_v54  ;;  %vm1016_vm5 = vcmp.gt.f32.partialorder %v920_v39, 0.0  ;;  %v923_v57 = vpop.f32.mrf.mxu1  ;;  %v5992_v51 = vld [vmem:[#allocation2 + $0x2a8] ss:$16 sps:$4 sm:$0xff]   ;;  %v862_v54 = vpop.f32.mrf.mxu0 }
 0x16b   : > { %v7550_v34 = vadd.f32 %v921_v56, %v6761_v5  ;;  %3552 = vmatpush1.bf16.msra.mxu1 %v5986_v35  ;;  %v7552_v26 = vpack.c.bf16 %v1265_v9, %v1257_v61  ;;  %v7556_v3 = vadd.f32 %v7466_v43, %v6740_v52  ;;  %v7558_v63 = vpack.c.bf16 %v1264_v15, %v1256_v37  ;;  %v6000_v21 = vld [vmem:[#allocation2 + $0x28c] ss:$16 sps:$4 sm:$0xff]   ;;  %v5989_v43 = vld [vmem:[#allocation2 + $0x1a8] ss:$16 sps:$4 sm:$0xff]  }
 0x16c   : > { %v924_v29 = vadd.f32 %v923_v57, %v6758_v6  ;;  %v1215_v45 = vmul.f32 0.01, %v853_v38  ;;  %v7561_v17 = vpack.c.bf16 %v1326_v0, %v1318_v11  ;;  %3553 = vmatprep.subr.bf16.mxu1 %v5994_v10  ;;  %vm1086_vm6 = vcmp.gt.f32.partialorder %v7521_v59, 0.0  ;;  %3455 = vmatpush2.bf16.msra.mxu0 %v5983_v8  ;;  %v925_v56 = vpop.f32.mrf.mxu1  ;;  %v5997_v0 = vld [vmem:[#allocation2 + $0x18c] ss:$16 sps:$4 sm:$0xff]  }
 0x16d   : > { %8594 = vst [vmem:[#allocation29_spill] sm:$0xff] %v7552_v26  ;;  %8595 = vst [vmem:[#allocation30_spill] sm:$0xff] %v7558_v63  ;;  %v1214_v35 = vmul.f32 0.01, %v7521_v59  ;;  %vm1087_vm7 = vcmp.gt.f32.partialorder %v853_v38, 0.0  ;;  %3365 = vmatprep.mubr.bf16.mxu1 %v7552_v26  ;;  %v859_v15 = vadd.f32 %v7502_v33, %v6755_v4  ;;  %v1272_v37 = vsel %vm1016_vm5, %v920_v39, %v1144_v49 }
 0x16e   : > { %vm1024_vm8 = vcmp.gt.f32.partialorder %v924_v29, 0.0  ;;  %v1152_v11 = vmul.f32 0.01, %v924_v29  ;;  %v926_v10 = vadd.f32 %v925_v56, %v6761_v5  ;;  %3366 = vmatmul.mubr.bf16.gmra.mxu1 %v7558_v63  ;;  %3456 = vmatprep.subr.bf16.mxu0 %v5991_v16  ;;  %vm1017_vm9 = vcmp.gt.f32.partialorder %v7550_v34, 0.0  ;;  %v929_v61 = vpop.f32.mrf.mxu1  ;;  %v5998_v9 = vld [vmem:[#allocation2 + $0x288] ss:$16 sps:$4 sm:$0xff]  }
 0x16f   : > { %v1145_v8 = vmul.f32 0.01, %v7550_v34  ;;  %vm1094_vm10 = vcmp.gt.f32.partialorder %v7556_v3, 0.0  ;;  %3554 = vmatpush1.bf16.msra.mxu1 %v5992_v51  ;;  %v863_v33 = vadd.f32 %v862_v54, %v6755_v4  ;;  %3293 = vmatmul.mubr.bf16.gmra.mxu0 %v7561_v17  ;;  %v1335_v16 = vsel %vm1079_vm2, %v7492_v2, %v1207_v19  ;;  %v6006_v57 = vld [vmem:[#allocation2 + $0x26c] ss:$16 sps:$4 sm:$0xff]  }
 0x170   : > { %vm1025_vm11 = vcmp.gt.f32.partialorder %v926_v10, 0.0  ;;  %v1153_v39 = vmul.f32 0.01, %v926_v10  ;;  %3555 = vmatprep.subr.bf16.mxu1 %v6000_v21  ;;  %v1343_v49 = vsel %vm1087_vm7, %v853_v38, %v1215_v45  ;;  %v1280_v56 = vsel %vm1024_vm8, %v924_v29, %v1152_v11  ;;  %3457 = vmatpush2.bf16.msra.mxu0 %v5989_v43  ;;  %v931_v26 = vpop.f32.mrf.mxu1  ;;  %v5995_v4 = vld [vmem:[#allocation2 + $0x188] ss:$16 sps:$4 sm:$0xff]  }
 0x171   : > { %v1222_v63 = vmul.f32 0.01, %v7556_v3  ;;  %v1223_v51 = vmul.f32 0.01, %v859_v15  ;;  %v861_v54 = vadd.f32 %v7530_v24, %v6740_v52  ;;  %vm1095_vm12 = vcmp.gt.f32.partialorder %v859_v15, 0.0  ;;  %3458 = vmatprep.subr.bf16.mxu0 %v5997_v0 }
 0x172   : > { %v932_v21 = vadd.f32 %v931_v26, %v6761_v5  ;;  %vm1103_vm13 = vcmp.gt.f32.partialorder %v863_v33, 0.0  ;;  %v1231_v2 = vmul.f32 0.01, %v863_v33  ;;  %v6003_v19 = vld [vmem:[#allocation2 + $0x16c] ss:$16 sps:$4 sm:$0xff]   ;;  %v933_v38 = vpop.f32.mrf.mxu1  ;;  %v7585_v45 = vpack.c.bf16 %v1343_v49, %v1335_v16 }
 0x173   : > { %3556 = vmatpush1.bf16.msra.mxu1 %v5998_v9  ;;  %v1281_v29 = vsel %vm1025_vm11, %v926_v10, %v1153_v39  ;;  %v1334_v43 = vsel %vm1078_vm4, %v7464_v20, %v7500_v50  ;;  %v1342_v52 = vsel %vm1086_vm6, %v7521_v59, %v1214_v35  ;;  %v6004_v24 = vld [vmem:[#allocation2 + $0x268] ss:$16 sps:$4 sm:$0xff]   ;;  %v7595_v26 = vpack.c.bf16 %v1280_v56, %v1272_v37  ;;  %v6012_v35 = vld [vmem:[#allocation2 + $0x24c] ss:$16 sps:$4 sm:$0xff]  }
 0x174   : > { %v930_v11 = vadd.f32 %v929_v61, %v6758_v6  ;;  %v934_v0 = vadd.f32 %v933_v38, %v6758_v6  ;;  %v1273_v10 = vsel %vm1017_vm9, %v7550_v34, %v1145_v8  ;;  %3557 = vmatprep.subr.bf16.mxu1 %v6006_v57  ;;  %v1230_v9 = vmul.f32 0.01, %v861_v54  ;;  %3459 = vmatpush2.bf16.msra.mxu0 %v5995_v4  ;;  %v935_v39 = vpop.f32.mrf.mxu1  ;;  %v6001_v59 = vld [vmem:[#allocation2 + $0x168] ss:$16 sps:$4 sm:$0xff]   ;;  %v6009_v34 = vld [vmem:[#allocation2 + $0x14c] ss:$16 sps:$4 sm:$0xff]  }
 0x175   : > { %3302 = vmatprep.mubr.bf16.mxu0 %v7585_v45  ;;  %v7603_v20 = vpack.c.bf16 %v1281_v29, %v1273_v10  ;;  %v7605_v50 = vpack.c.bf16 %v1342_v52, %v1334_v43  ;;  %v1351_v37 = vsel %vm1095_vm12, %v859_v15, %v1223_v51  ;;  %v1161_v61 = vmul.f32 0.01, %v932_v21  ;;  %3460 = vmatprep.subr.bf16.mxu0 %v6003_v19  ;;  %v6010_v56 = vld [vmem:[#allocation2 + $0x248] ss:$16 sps:$4 sm:$0xff]   ;;  %v6018_v51 = vld [vmem:[#allocation2 + $0x22c] ss:$16 sps:$4 sm:$0xff]  }
 0x176   : > { %vm1102_vm14 = vcmp.gt.f32.partialorder %v861_v54, 0.0  ;;  %v936_v16 = vadd.f32 %v935_v39, %v6761_v5  ;;  %v1359_v8 = vsel %vm1103_vm13, %v863_v33, %v1231_v2  ;;  %vm1033_vm15 = vcmp.gt.f32.partialorder %v932_v21, 0.0  ;;  %v939_v57 = vpop.f32.mrf.mxu1  ;;  %v6007_v2 = vld [vmem:[#allocation2 + $0x148] ss:$16 sps:$4 sm:$0xff]   ;;  %v6015_v10 = vld [vmem:[#allocation2 + $0x12c] ss:$16 sps:$4 sm:$0xff]  }
 0x177   : > { %v1168_v49 = vmul.f32 0.01, %v934_v0  ;;  %3375 = vmatprep.mubr.bf16.mxu1 %v7603_v20  ;;  %3558 = vmatpush1.bf16.msra.mxu1 %v6004_v24  ;;  %v7611_v4 = vpack.c.bf16 %v1359_v8, %v1351_v37  ;;  %vm1040_vm0 = vcmp.gt.f32.partialorder %v934_v0, 0.0  ;;  %v1160_v19 = vmul.f32 0.01, %v930_v11 }
 0x178   : > { %vm1041_vm1 = vcmp.gt.f32.partialorder %v936_v16, 0.0  ;;  %v1169_v15 = vmul.f32 0.01, %v936_v16  ;;  %3303 = vmatmul.mubr.bf16.gmra.mxu0 %v7605_v50  ;;  %3376 = vmatmul.mubr.bf16.gmra.mxu1 %v7595_v26  ;;  %v941_v33 = vpop.f32.mrf.mxu1  ;;  %v1350_v38 = vsel %vm1094_vm10, %v7556_v3, %v1222_v63  ;;  %v1358_v29 = vsel %vm1102_vm14, %v861_v54, %v1230_v9  ;;  %v6016_v3 = vld [vmem:[#allocation2 + $0x228] ss:$16 sps:$4 sm:$0xff]  }
 0x179   : > { %3461 = vmatpush2.bf16.msra.mxu0 %v6001_v59  ;;  %3559 = vmatprep.subr.bf16.mxu1 %v6012_v35  ;;  %vm1032_vm2 = vcmp.gt.f32.partialorder %v930_v11, 0.0  ;;  %v942_v43 = vadd.f32 %v941_v33, %v6761_v5  ;;  %v1289_v52 = vsel %vm1033_vm15, %v932_v21, %v1161_v61  ;;  %v1296_v39 = vsel %vm1040_vm0, %v934_v0, %v1168_v49  ;;  %v6013_v61 = vld [vmem:[#allocation2 + $0x128] ss:$16 sps:$4 sm:$0xff]   ;;  %v6021_v8 = vld [vmem:[#allocation2 + $0x10c] ss:$16 sps:$4 sm:$0xff]  }
 0x17a   : > { %3462 = vmatprep.subr.bf16.mxu0 %v6009_v34  ;;  %3312 = vmatprep.mubr.bf16.mxu0 %v7611_v4  ;;  %v1297_v24 = vsel %vm1041_vm1, %v936_v16, %v1169_v15  ;;  %v943_v59 = vpop.f32.mrf.mxu1  ;;  %v7627_v54 = vpack.c.bf16 %v1358_v29, %v1350_v38  ;;  %v1288_v9 = vsel %vm1032_vm2, %v930_v11, %v1160_v19  ;;  %v6024_v49 = vld [vmem:[#allocation2 + $0x20c] ss:$16 sps:$4 sm:$0xff]   ;;  %v6022_v11 = vld [vmem:[#allocation2 + $0x208] ss:$16 sps:$4 sm:$0xff]  }
 0x17b   : > { %3560 = vmatpush1.bf16.msra.mxu1 %v6010_v56  ;;  %v7624_v35 = vpack.c.bf16 %v1297_v24, %v1289_v52  ;;  %v944_v63 = vadd.f32 %v943_v59, %v6758_v6  ;;  %v940_v37 = vadd.f32 %v939_v57, %v6758_v6  ;;  %v7631_v16 = vpack.c.bf16 %v1296_v39, %v1288_v9  ;;  %v6030_v24 = vld [vmem:[#allocation2 + $0x4ec] ss:$16 sps:$4 sm:$0xff]  }
 0x17c   : > { %3561 = vmatprep.subr.bf16.mxu1 %v6018_v51  ;;  %v945_v21 = vpop.f32.mrf.mxu1  ;;  %v1177_v0 = vmul.f32 0.01, %v942_v43  ;;  %vm1049_vm3 = vcmp.gt.f32.partialorder %v942_v43, 0.0  ;;  %v6027_v51 = vld [vmem:[#allocation2 + $0x3ec] ss:$16 sps:$4 sm:$0xff]  }
 0x17d   : > { %3463 = vmatpush2.bf16.msra.mxu0 %v6007_v2  ;;  %3385 = vmatprep.mubr.bf16.mxu1 %v7624_v35  ;;  %v946_v34 = vadd.f32 %v945_v21, %v6761_v5  ;;  %v1184_v56 = vmul.f32 0.01, %v944_v63  ;;  %vm1056_vm4 = vcmp.gt.f32.partialorder %v944_v63, 0.0  ;;  %v1176_v19 = vmul.f32 0.01, %v940_v37 }
 0x17e   : > { %3464 = vmatprep.subr.bf16.mxu0 %v6015_v10  ;;  %v949_v15 = vpop.f32.mrf.mxu1  ;;  %v6019_v2 = vld [vmem:[#allocation2 + $0x108] ss:$16 sps:$4 sm:$0xff]   ;;  %vm1048_vm6 = vcmp.gt.f32.partialorder %v940_v37, 0.0  ;;  %v1305_v29 = vsel %vm1049_vm3, %v942_v43, %v1177_v0 }
 0x17f   : > { %3562 = vmatpush1.bf16.msra.mxu1 %v6016_v3  ;;  %vm1057_vm5 = vcmp.gt.f32.partialorder %v946_v34, 0.0  ;;  %v1185_v57 = vmul.f32 0.01, %v946_v34  ;;  %v1312_v10 = vsel %vm1056_vm4, %v944_v63, %v1184_v56  ;;  %v6025_v3 = vld [vmem:[#allocation2 + $0x3e8] ss:$16 sps:$4 sm:$0xff]   ;;  %v1304_v9 = vsel %vm1048_vm6, %v940_v37, %v1176_v19 }
 0x180   : > { %3313 = vmatmul.mubr.bf16.gmra.mxu0 %v7627_v54  ;;  %3386 = vmatmul.mubr.bf16.gmra.mxu1 %v7631_v16  ;;  %v951_v33 = vpop.f32.mrf.mxu1  ;;  %v950_v21 = vadd.f32 %v949_v15, %v6758_v6  ;;  %v6028_v43 = vld [vmem:[#allocation2 + $0x4e8] ss:$16 sps:$4 sm:$0xff]   ;;  %v7645_v0 = vpack.c.bf16 %v1312_v10, %v1304_v9 }
 0x181   : > { %3465 = vmatpush2.bf16.msra.mxu0 %v6013_v61  ;;  %3468 = vmatprep.mubr.bf16.mxu0 %v6722_v36  ;;  %v952_v38 = vadd.f32 %v951_v33, %v6761_v5  ;;  %v1313_v52 = vsel %vm1057_vm5, %v946_v34, %v1185_v57  ;;  %v6031_v37 = vld [vmem:[#allocation2 + $0x3c8] ss:$16 sps:$4 sm:$0xff]   ;;  %v6039_v57 = vld [vmem:[#allocation2 + $0x3ac] ss:$16 sps:$4 sm:$0xff]  }
 0x182   : > { %3466 = vmatprep.subr.bf16.mxu0 %v6021_v8  ;;  %3563 = vmatprep.subr.bf16.mxu1 %v6024_v49  ;;  %v953_v39 = vpop.f32.mrf.mxu1  ;;  %v7640_v59 = vpack.c.bf16 %v1313_v52, %v1305_v29  ;;  %v6033_v8 = vld [vmem:[#allocation2 + $0x3cc] ss:$16 sps:$4 sm:$0xff]   ;;  %v6034_v33 = vld [vmem:[#allocation2 + $0x4c8] ss:$16 sps:$4 sm:$0xff]   ;;  %vm1064_vm10 = vcmp.gt.f32.partialorder %v950_v21, 0.0 }
 0x183   : > { %3564 = vmatpush1.bf16.msra.mxu1 %v6022_v11  ;;  %v954_v36 = vadd.f32 %v953_v39, %v6758_v6  ;;  %v1193_v34 = vmul.f32 0.01, %v952_v38  ;;  %v6036_v49 = vld [vmem:[#allocation2 + $0x4cc] ss:$16 sps:$4 sm:$0xff]   ;;  %vm1065_vm7 = vcmp.gt.f32.partialorder %v952_v38, 0.0 }
 0x184   : > { %3565 = vmatprep.subr.bf16.mxu1 %v6027_v51  ;;  %v955_v61 = vpop.f32.mrf.mxu1  ;;  %3395 = vmatprep.mubr.bf16.mxu1 %v7640_v59  ;;  %v1192_v51 = vmul.f32 0.01, %v950_v21 }
 0x185   : > { %3467 = vmatpush2.bf16.msra.mxu0 %v6019_v2  ;;  %v956_v63 = vadd.f32 %v955_v61, %v6761_v5  ;;  %v1200_v56 = vmul.f32 0.01, %v954_v36  ;;  %vm1072_vm8 = vcmp.gt.f32.partialorder %v954_v36, 0.0  ;;  %v1321_v29 = vsel %vm1065_vm7, %v952_v38, %v1193_v34  ;;  %v6040_v38 = vld [vmem:[#allocation2 + $0x4a8] ss:$16 sps:$4 sm:$0xff]  }
 0x186   : > { %3662 = vmatprep.subr.bf16.mxu0 %v6030_v24  ;;  %v959_v11 = vpop.f32.mrf.mxu1  ;;  %v6042_v24 = vld [vmem:[#allocation2 + $0x4ac] ss:$16 sps:$4 sm:$0xff]   ;;  %v1320_v9 = vsel %vm1064_vm10, %v950_v21, %v1192_v51  ;;  %v6043_v21 = vld [vmem:[#allocation2 + $0x388] ss:$16 sps:$4 sm:$0xff]  }
 0x187   : > { %3566 = vmatpush2.bf16.msra.mxu1 %v6025_v3  ;;  %vm1073_vm9 = vcmp.gt.f32.partialorder %v956_v63, 0.0  ;;  %v1201_v15 = vmul.f32 0.01, %v956_v63  ;;  %v1328_v10 = vsel %vm1072_vm8, %v954_v36, %v1200_v56  ;;  %v6037_v3 = vld [vmem:[#allocation2 + $0x3a8] ss:$16 sps:$4 sm:$0xff]   ;;  %v960_v61 = vadd.f32 %v959_v11, %v6758_v6 }
 0x188   : > { %3396 = vmatmul.mubr.bf16.gmra.mxu1 %v7645_v0  ;;  %3469 = vmatmul.mubr.bf16.vlgmr.msra.gmra.mxu0 %v6715_v28  ;;  %v961_v19 = vpop.f32.mrf.mxu1  ;;  %v7659_v34 = vpack.c.bf16 %v1328_v10, %v1320_v9 }
 0x189   : > { %3478 = vmatprep.mubr.bf16.mxu0 %v6774_v58  ;;  %3663 = vmatpush1.bf16.msra.mxu0 %v6028_v43  ;;  %v962_v2 = vadd.f32 %v961_v19, %v6761_v5  ;;  %v1329_v52 = vsel %vm1073_vm9, %v956_v63, %v1201_v15  ;;  %v6051_v15 = vld [vmem:[#allocation2 + $0x36c] ss:$16 sps:$4 sm:$0xff]   ;;  %v6046_v19 = vld [vmem:[#allocation2 + $0x488] ss:$16 sps:$4 sm:$0xff]   ;;  %vm1080_vm14 = vcmp.gt.f32.partialorder %v960_v61, 0.0 }
 0x18a   : > { %3567 = vmatprep.subr.bf16.mxu1 %v6033_v8  ;;  %3664 = vmatprep.subr.bf16.mxu0 %v6036_v49  ;;  %v963_v39 = vpop.f32.mrf.mxu1  ;;  %v7654_v28 = vpack.c.bf16 %v1329_v52, %v1321_v29  ;;  %v6045_v8 = vld [vmem:[#allocation2 + $0x38c] ss:$16 sps:$4 sm:$0xff]  }
 0x18b   : > { %3568 = vmatpush2.bf16.msra.mxu1 %v6031_v37  ;;  %v964_v58 = vadd.f32 %v963_v39, %v6758_v6  ;;  %v1209_v63 = vmul.f32 0.01, %v962_v2  ;;  %v6048_v49 = vld [vmem:[#allocation2 + $0x48c] ss:$16 sps:$4 sm:$0xff]   ;;  %vm1081_vm11 = vcmp.gt.f32.partialorder %v962_v2, 0.0 }
 0x18c   : > { %3569 = vmatprep.subr.bf16.mxu1 %v6039_v57  ;;  %v965_v43 = vpop.f32.mrf.mxu1  ;;  %3405 = vmatprep.mubr.bf16.mxu1 %v7654_v28  ;;  %v1208_v57 = vmul.f32 0.01, %v960_v61 }
 0x18d   : > { %3665 = vmatpush1.bf16.msra.mxu0 %v6034_v33  ;;  %v966_v36 = vadd.f32 %v965_v43, %v6761_v5  ;;  %v1216_v56 = vmul.f32 0.01, %v964_v58  ;;  %vm1088_vm12 = vcmp.gt.f32.partialorder %v964_v58, 0.0  ;;  %v1337_v29 = vsel %vm1081_vm11, %v962_v2, %v1209_v63  ;;  %v6052_v2 = vld [vmem:[#allocation2 + $0x468] ss:$16 sps:$4 sm:$0xff]  }
 0x18e   : > { %3666 = vmatprep.subr.bf16.mxu0 %v6042_v24  ;;  %v969_v37 = vpop.f32.mrf.mxu1  ;;  %v6054_v24 = vld [vmem:[#allocation2 + $0x46c] ss:$16 sps:$4 sm:$0xff]   ;;  %v1336_v9 = vsel %vm1080_vm14, %v960_v61, %v1208_v57 }
 0x18f   : > { %3570 = vmatpush2.bf16.msra.mxu1 %v6037_v3  ;;  %vm1089_vm13 = vcmp.gt.f32.partialorder %v966_v36, 0.0  ;;  %v1217_v11 = vmul.f32 0.01, %v966_v36  ;;  %v1344_v10 = vsel %vm1088_vm12, %v964_v58, %v1216_v56  ;;  %v6049_v3 = vld [vmem:[#allocation2 + $0x368] ss:$16 sps:$4 sm:$0xff]   ;;  %v970_v43 = vadd.f32 %v969_v37, %v6758_v6 }
 0x190   : > { %3406 = vmatmul.mubr.bf16.gmra.mxu1 %v7659_v34  ;;  %3479 = vmatmul.mubr.bf16.gmra.mxu0 %v6770_v14  ;;  %v971_v51 = vpop.f32.mrf.mxu1  ;;  %v7673_v63 = vpack.c.bf16 %v1344_v10, %v1336_v9  ;;  %v6063_v61 = vld [vmem:[#allocation2 + $0x32c] ss:$16 sps:$4 sm:$0xff]   ;;  %v6073_v9 = vld [vmem:[#allocation2 + $0x5e8] ss:$16 sps:$4 sm:$0xff]  }
 0x191   : > { %3488 = vmatprep.mubr.bf16.mxu0 %v6826_v44  ;;  %3667 = vmatpush1.bf16.msra.mxu0 %v6040_v38  ;;  %v972_v33 = vadd.f32 %v971_v51, %v6761_v5  ;;  %v1345_v52 = vsel %vm1089_vm13, %v966_v36, %v1217_v11  ;;  %v1224_v37 = vmul.f32 0.01, %v970_v43  ;;  %vm1096_vm2 = vcmp.gt.f32.partialorder %v970_v43, 0.0  ;;  %v6066_v57 = vld [vmem:[#allocation2 + $0x42c] ss:$16 sps:$4 sm:$0xff]  }
 0x192   : > { %3571 = vmatprep.subr.bf16.mxu1 %v6045_v8  ;;  %3668 = vmatprep.subr.bf16.mxu0 %v6048_v49  ;;  %v973_v39 = vpop.f32.mrf.mxu1  ;;  %v7668_v14 = vpack.c.bf16 %v1345_v52, %v1337_v29  ;;  %v6057_v8 = vld [vmem:[#allocation2 + $0x34c] ss:$16 sps:$4 sm:$0xff]   ;;  %v6061_v29 = vld [vmem:[#allocation2 + $0x328] ss:$16 sps:$4 sm:$0xff]  }
 0x193   : > { %3572 = vmatpush2.bf16.msra.mxu1 %v6043_v21  ;;  %v974_v44 = vadd.f32 %v973_v39, %v6758_v6  ;;  %v1225_v36 = vmul.f32 0.01, %v972_v33  ;;  %v6060_v49 = vld [vmem:[#allocation2 + $0x44c] ss:$16 sps:$4 sm:$0xff]   ;;  %vm1097_vm15 = vcmp.gt.f32.partialorder %v972_v33, 0.0 }
 0x194   : > { %3573 = vmatprep.subr.bf16.mxu1 %v6051_v15  ;;  %v975_v38 = vpop.f32.mrf.mxu1  ;;  %3415 = vmatprep.mubr.bf16.mxu1 %v7668_v14  ;;  %v6055_v21 = vld [vmem:[#allocation2 + $0x348] ss:$16 sps:$4 sm:$0xff]   ;;  %v6072_v10 = vld [vmem:[#allocation2 + $0x40c] ss:$16 sps:$4 sm:$0xff]  }
 0x195   : > { %3669 = vmatpush1.bf16.msra.mxu0 %v6046_v19  ;;  %v976_v58 = vadd.f32 %v975_v38, %v6761_v5  ;;  %v1232_v56 = vmul.f32 0.01, %v974_v44  ;;  %vm1104_vm0 = vcmp.gt.f32.partialorder %v974_v44, 0.0  ;;  %v6058_v5 = vld [vmem:[#allocation2 + $0x448] ss:$16 sps:$4 sm:$0xff]   ;;  %v1353_v11 = vsel %vm1097_vm15, %v972_v33, %v1225_v36 }
 0x196   : > { %3670 = vmatprep.subr.bf16.mxu0 %v6054_v24  ;;  %v6064_v52 = vld [vmem:[#allocation2 + $0x428] ss:$16 sps:$4 sm:$0xff]   ;;  %v6069_v24 = vld [vmem:[#allocation2 + $0x30c] ss:$16 sps:$4 sm:$0xff]  }
 0x197   : > { %3574 = vmatpush2.bf16.msra.mxu1 %v6049_v3  ;;  %vm1105_vm1 = vcmp.gt.f32.partialorder %v976_v58, 0.0  ;;  %v1233_v6 = vmul.f32 0.01, %v976_v58  ;;  %v1360_v51 = vsel %vm1104_vm0, %v974_v44, %v1232_v56  ;;  %v6067_v33 = vld [vmem:[#allocation2 + $0x308] ss:$16 sps:$4 sm:$0xff]  }
 0x198   : > { %3416 = vmatmul.mubr.bf16.gmra.mxu1 %v7673_v63  ;;  %3489 = vmatmul.mubr.bf16.gmra.mxu0 %v6819_v1  ;;  %v1352_v1 = vsel %vm1096_vm2, %v970_v43, %v1224_v37  ;;  %v6078_v39 = vld [vmem:[#allocation2 + $0x6ec] ss:$16 sps:$4 sm:$0xff]   ;;  %v6070_v3 = vld [vmem:[#allocation2 + $0x408] ss:$16 sps:$4 sm:$0xff]   ;;  %v8600_v37 = vld [vmem:[#allocation16_spill] sm:$0xff] }
 0x199   : > { %3498 = vmatprep.mubr.bf16.mxu0 %v6902_v22  ;;  %3671 = vmatpush1.bf16.msra.mxu0 %v6052_v2  ;;  %v1361_v15 = vsel %vm1105_vm1, %v976_v58, %v1233_v6  ;;  %v7684_v22 = vpack.c.bf16 %v1360_v51, %v1352_v1  ;;  %v6075_v44 = vld [vmem:[#allocation2 + $0x5ec] ss:$16 sps:$4 sm:$0xff]   ;;  %v6076_v43 = vld [vmem:[#allocation2 + $0x6e8] ss:$16 sps:$4 sm:$0xff]  }
 0x19a   : > { %3575 = vmatprep.subr.bf16.mxu1 %v6057_v8  ;;  %3672 = vmatprep.subr.bf16.mxu0 %v6060_v49  ;;  %v7681_v19 = vpack.c.bf16 %v1361_v15, %v1353_v11  ;;  %v6081_v38 = vld [vmem:[#allocation2 + $0x5cc] ss:$16 sps:$4 sm:$0xff]   ;;  %v6079_v36 = vld [vmem:[#allocation2 + $0x5c8] ss:$16 sps:$4 sm:$0xff]  }
 0x19b   : > { %3576 = vmatpush2.bf16.msra.mxu1 %v6055_v21  ;;  %v6084_v2 = vld [vmem:[#allocation2 + $0x6cc] ss:$16 sps:$4 sm:$0xff]   ;;  %v6082_v58 = vld [vmem:[#allocation2 + $0x6c8] ss:$16 sps:$4 sm:$0xff]  }
 0x19c   : > { %3577 = vmatprep.subr.bf16.mxu1 %v6063_v61  ;;  %3425 = vmatprep.mubr.bf16.mxu1 %v7681_v19  ;;  %v6087_v8 = vld [vmem:[#allocation2 + $0x5ac] ss:$16 sps:$4 sm:$0xff]   ;;  %v6085_v56 = vld [vmem:[#allocation2 + $0x5a8] ss:$16 sps:$4 sm:$0xff]  }
 0x19d   : > { %3673 = vmatpush1.bf16.msra.mxu0 %v6058_v5  ;;  %v6090_v49 = vld [vmem:[#allocation2 + $0x6ac] ss:$16 sps:$4 sm:$0xff]   ;;  %v6088_v21 = vld [vmem:[#allocation2 + $0x6a8] ss:$16 sps:$4 sm:$0xff]   ;;  %v8601_v5 = vld [vmem:[#allocation14_spill] sm:$0xff] }
 0x19e   : > { %3674 = vmatprep.subr.bf16.mxu0 %v6066_v57  ;;  %v6096_v6 = vld [vmem:[#allocation2 + $0x68c] ss:$16 sps:$4 sm:$0xff]   ;;  %v6091_v15 = vld [vmem:[#allocation2 + $0x588] ss:$16 sps:$4 sm:$0xff]  }
 0x19f   : > { %3578 = vmatpush2.bf16.msra.mxu1 %v6061_v29  ;;  %v8599_v61 = vld [vmem:[#allocation13_spill] sm:$0xff]  ;;  %v8602_v11 = vld [vmem:[#allocation19_spill] sm:$0xff] }
 0x1a0   : > { %3426 = vmatmul.mubr.bf16.gmra.mxu1 %v7684_v22  ;;  %3499 = vmatmul.mubr.bf16.gmra.mxu0 %v6887_v55  ;;  %v8596_v55 = vld [vmem:[#allocation12_spill] sm:$0xff]  ;;  %v6094_v57 = vld [vmem:[#allocation2 + $0x688] ss:$16 sps:$4 sm:$0xff]   ;;  %v6099_v51 = vld [vmem:[#allocation2 + $0x56c] ss:$16 sps:$4 sm:$0xff]  }
 0x1a1   : > { %3508 = vmatprep.mubr.bf16.mxu0 %v6848_v18  ;;  %3581 = vmatprep.mubr.bf16.mxu1 %v6945_v13  ;;  %v8597_v18 = vld [vmem:[#allocation11_spill] sm:$0xff] }
 0x1a2   : > { %3675 = vmatpush1.bf16.msra.mxu0 %v6064_v52  ;;  %3579 = vmatprep.subr.bf16.mxu1 %v6069_v24  ;;  %v8598_v13 = vld [vmem:[#allocation15_spill] sm:$0xff] }
 0x1a3   : > { %3676 = vmatprep.subr.bf16.mxu0 %v6072_v10  ;;  %3580 = vmatpush2.bf16.msra.mxu1 %v6067_v33  ;;  %v6102_v29 = vld [vmem:[#allocation2 + $0x66c] ss:$16 sps:$4 sm:$0xff]   ;;  %v6097_v1 = vld [vmem:[#allocation2 + $0x568] ss:$16 sps:$4 sm:$0xff]  }
 0x1a4   : > { %3775 = vmatprep.subr.bf16.mxu1 %v6078_v39  ;;  %v6100_v52 = vld [vmem:[#allocation2 + $0x668] ss:$16 sps:$4 sm:$0xff]   ;;  %v6105_v24 = vld [vmem:[#allocation2 + $0x54c] ss:$16 sps:$4 sm:$0xff]   ;;  %v8604_v39 = vld [vmem:[#allocation20_spill] sm:$0xff] }
 0x1a5   : > { %v6108_v33 = vld [vmem:[#allocation2 + $0x64c] ss:$16 sps:$4 sm:$0xff]  }
 0x1a6   : > { %3677 = vmatpush1.bf16.msra.mxu0 %v6070_v3  ;;  %v8603_v10 = vld [vmem:[#allocation17_spill] sm:$0xff]  ;;  %v8605_v3 = vld [vmem:[#allocation18_spill] sm:$0xff] }
 0x1a7   : > { %3678 = vmatprep.subr.bf16.mxu0 %v6075_v44  ;;  %v8606_v44 = vld [vmem:[#allocation22_spill] sm:$0xff] }
 0x1a8   : > { %3509 = vmatmul.mubr.bf16.gmra.mxu0 %v6878_v53  ;;  %3582 = vmatmul.mubr.bf16.vlgmr.msra.gmra.mxu1 %v8596_v55  ;;  %v6093_v53 = vld [vmem:[#allocation2 + $0x58c] ss:$16 sps:$4 sm:$0xff]   ;;  %v6109_v55 = vld [vmem:[#allocation2 + $0x528] ss:$16 sps:$4 sm:$0xff]  }
 0x1a9   : > { %3518 = vmatprep.mubr.bf16.mxu0 %v8597_v18  ;;  %3591 = vmatprep.mubr.bf16.mxu1 %v8598_v13  ;;  %v6112_v18 = vld [vmem:[#allocation2 + $0x628] ss:$16 sps:$4 sm:$0xff]   ;;  %v6117_v13 = vld [vmem:[#allocation2 + $0x50c] ss:$16 sps:$4 sm:$0xff]  }
 0x1aa   : > { %3679 = vmatpush2.bf16.msra.mxu0 %v6073_v9  ;;  %3776 = vmatpush1.bf16.msra.mxu1 %v6076_v43  ;;  %v6103_v9 = vld [vmem:[#allocation2 + $0x548] ss:$16 sps:$4 sm:$0xff]  }
 0x1ab   : > { %3680 = vmatprep.subr.bf16.mxu0 %v6081_v38  ;;  %3777 = vmatprep.subr.bf16.mxu1 %v6084_v2  ;;  %v6106_v43 = vld [vmem:[#allocation2 + $0x648] ss:$16 sps:$4 sm:$0xff]   ;;  %v6111_v38 = vld [vmem:[#allocation2 + $0x52c] ss:$16 sps:$4 sm:$0xff]  }
 0x1ac   : > { %v6114_v2 = vld [vmem:[#allocation2 + $0x62c] ss:$16 sps:$4 sm:$0xff]  }
 0x1ae   : > { %3681 = vmatpush2.bf16.msra.mxu0 %v6079_v36  ;;  %3778 = vmatpush1.bf16.msra.mxu1 %v6082_v58  ;;  %v6120_v36 = vld [vmem:[#allocation2 + $0x60c] ss:$16 sps:$4 sm:$0xff]  }
 0x1af   : > { %3682 = vmatprep.subr.bf16.mxu0 %v6087_v8  ;;  %3779 = vmatprep.subr.bf16.mxu1 %v6090_v49  ;;  %v8607_v58 = vld [vmem:[#allocation21_spill] sm:$0xff]  ;;  %v8608_v8 = vld [vmem:[#allocation23_spill] sm:$0xff]  ;;  %v8609_v49 = vld [vmem:[#allocation24_spill] sm:$0xff] }
 0x1b0   : > { %3519 = vmatmul.mubr.bf16.gmra.mxu0 %v8599_v61  ;;  %3592 = vmatmul.mubr.bf16.gmra.mxu1 %v8600_v37  ;;  %v6121_v61 = vld [vmem:[#allocation2 + $0x7e8] ss:$16 sps:$4 sm:$0xff]  }
 0x1b1   : > { %3528 = vmatprep.mubr.bf16.mxu0 %v8601_v5  ;;  %3601 = vmatprep.mubr.bf16.mxu1 %v8602_v11  ;;  %v6126_v5 = vld [vmem:[#allocation2 + $0x7cc] ss:$16 sps:$4 sm:$0xff]   ;;  %v6145_v11 = vld [vmem:[#allocation4 + $0x70] ss:$8 sps:$4 sm:$0xff]  }
 0x1b2   : > { %3683 = vmatpush2.bf16.msra.mxu0 %v6085_v56  ;;  %3780 = vmatpush1.bf16.msra.mxu1 %v6088_v21  ;;  %v6115_v56 = vld [vmem:[#allocation2 + $0x508] ss:$16 sps:$4 sm:$0xff]  }
 0x1b3   : > { %3684 = vmatprep.subr.bf16.mxu0 %v6093_v53  ;;  %3781 = vmatprep.subr.bf16.mxu1 %v6096_v6  ;;  %v6118_v21 = vld [vmem:[#allocation2 + $0x608] ss:$16 sps:$4 sm:$0xff]   ;;  %v6123_v53 = vld [vmem:[#allocation2 + $0x7ec] ss:$16 sps:$4 sm:$0xff]  }
 0x1b4   : > { %v6147_v6 = vld [vmem:[#allocation4 + $0x74] ss:$8 sps:$4 sm:$0xff]  }
 0x1b6   : > { %3685 = vmatpush2.bf16.msra.mxu0 %v6091_v15  ;;  %3782 = vmatpush1.bf16.msra.mxu1 %v6094_v57  ;;  %v6124_v57 = vld [vmem:[#allocation2 + $0x7c8] ss:$16 sps:$4 sm:$0xff]  }
 0x1b7   : > { %3686 = vmatprep.subr.bf16.mxu0 %v6099_v51  ;;  %3783 = vmatprep.subr.bf16.mxu1 %v6102_v29  ;;  %v6129_v29 = vld [vmem:[#allocation2 + $0x7ac] ss:$16 sps:$4 sm:$0xff]  }
 0x1b8   : > { %3529 = vmatmul.mubr.bf16.gmra.mxu0 %v8603_v10  ;;  %3602 = vmatmul.mubr.bf16.gmra.mxu1 %v8604_v39  ;;  %v6130_v39 = vld [vmem:[#allocation2 + $0x788] ss:$16 sps:$4 sm:$0xff]  }
 0x1b9   : > { %3538 = vmatprep.mubr.bf16.mxu0 %v8605_v3  ;;  %3611 = vmatprep.mubr.bf16.mxu1 %v8606_v44  ;;  %v6135_v44 = vld [vmem:[#allocation2 + $0x76c] ss:$16 sps:$4 sm:$0xff]  }
 0x1ba   : > { %3687 = vmatpush2.bf16.msra.mxu0 %v6097_v1  ;;  %3784 = vmatpush1.bf16.msra.mxu1 %v6100_v52  ;;  %v6148_v1 = vld [vmem:[#allocation4 + $0x60] ss:$8 sps:$4 sm:$0xff]   ;;  %v6153_v52 = vld [vmem:[#allocation4 + $0x54] ss:$8 sps:$4 sm:$0xff]  }
 0x1bb   : > { %3688 = vmatprep.subr.bf16.mxu0 %v6105_v24  ;;  %3785 = vmatprep.subr.bf16.mxu1 %v6108_v33  ;;  %v6156_v33 = vld [vmem:[#allocation4 + $0x44] ss:$8 sps:$4 sm:$0xff]  }
 0x1be   : > { %3689 = vmatpush2.bf16.msra.mxu0 %v6103_v9  ;;  %3786 = vmatpush1.bf16.msra.mxu1 %v6106_v43  ;;  %v6154_v9 = vld [vmem:[#allocation4 + $0x40] ss:$8 sps:$4 sm:$0xff]  }
 0x1bf   : > { %3690 = vmatprep.subr.bf16.mxu0 %v6111_v38  ;;  %3787 = vmatprep.subr.bf16.mxu1 %v6114_v2  ;;  %v8610_v2 = vld [vmem:[#allocation26_spill] sm:$0xff] }
 0x1c0   : > { %3539 = vmatmul.mubr.bf16.gmra.mxu0 %v8607_v58  ;;  %3612 = vmatmul.mubr.bf16.gmra.mxu1 %v8608_v8  ;;  %v6136_v58 = vld [vmem:[#allocation2 + $0x748] ss:$16 sps:$4 sm:$0xff]  }
 0x1c1   : > { %3621 = vmatprep.mubr.bf16.mxu1 %v7219_v32  ;;  %3694 = vmatprep.mubr.bf16.mxu0 %v8609_v49  ;;  %v6150_v32 = vld [vmem:[#allocation4 + $0x64] ss:$8 sps:$4 sm:$0xff]  }
 0x1c2   : > { %3691 = vmatpush2.bf16.msra.mxu0 %v6109_v55  ;;  %3788 = vmatpush1.bf16.msra.mxu1 %v6112_v18  ;;  %v6162_v55 = vld [vmem:[#allocation4 + $0x24] ss:$8 sps:$4 sm:$0xff]  }
 0x1c3   : > { %3692 = vmatprep.subr.bf16.mxu0 %v6117_v13  ;;  %3789 = vmatprep.subr.bf16.mxu1 %v6120_v36  ;;  %v8611_v18 = vld [vmem:[#allocation25_spill] sm:$0xff]  ;;  %v8612_v36 = vld [vmem:[#allocation27_spill] sm:$0xff] }
 0x1c4   : > { %v6141_v49 = vld [vmem:[#allocation2 + $0x72c] ss:$16 sps:$4 sm:$0xff]  }
 0x1c5   : > { %v7706_v37 = vpop.f32.mrf.mxu0 }
 0x1c6   : > { %3693 = vmatpush2.bf16.msra.mxu0 %v6115_v56  ;;  %3790 = vmatpush1.bf16.msra.mxu1 %v6118_v21  ;;  %v6160_v56 = vld [vmem:[#allocation4 + $0x20] ss:$8 sps:$4 sm:$0xff]   ;;  %v6165_v21 = vld [vmem:[#allocation4 + $0x14] ss:$8 sps:$4 sm:$0xff]  }
 0x1c7   : > { %3791 = vmatprep.subr.bf16.mxu1 %v6123_v53  ;;  %4508 = vmatprep.subr.bf16.mxu0 %v6147_v6  ;;  %v7711_v15 = vpop.f32.mrf.mxu0  ;;  %v6139_v6 = vld [vmem:[#allocation2 + $0x728] ss:$16 sps:$4 sm:$0xff]  }
 0x1c8   : > { %3622 = vmatmul.mubr.bf16.gmra.mxu1 %v7230_v7 }
 0x1c9   : > { %3695 = vmatmul.mubr.bf16.vlgmr.msra.gmra.mxu0 %v7101_v62  ;;  %3631 = vmatprep.mubr.bf16.mxu1 %v7291_v60  ;;  %v7714_v51 = vpop.f32.mrf.mxu0  ;;  %v6127_v62 = vld [vmem:[#allocation2 + $0x7a8] ss:$16 sps:$4 sm:$0xff]   ;;  %v6132_v60 = vld [vmem:[#allocation2 + $0x78c] ss:$16 sps:$4 sm:$0xff]  }
 0x1ca   : > { %3704 = vmatprep.mubr.bf16.mxu0 %v7245_v23  ;;  %3792 = vmatpush2.bf16.msra.mxu1 %v6121_v61  ;;  %v6151_v23 = vld [vmem:[#allocation4 + $0x50] ss:$8 sps:$4 sm:$0xff]   ;;  %v6144_v61 = vld [vmem:[#allocation2 + $0x70c] ss:$16 sps:$4 sm:$0xff]  }
 0x1cb   : > { %3793 = vmatprep.subr.bf16.mxu1 %v6126_v5  ;;  %4509 = vmatpush1.bf16.msra.mxu0 %v6145_v11  ;;  %v7716_v7 = vpop.f32.mrf.mxu0  ;;  %v6163_v5 = vld [vmem:[#allocation4 + $0x10] ss:$8 sps:$4 sm:$0xff]  }
 0x1cc   : > { %4510 = vmatprep.subr.bf16.mxu0 %v6150_v32  ;;  %v6168_v32 = vld [vmem:[#allocation4 + $0x4] ss:$8 sps:$4 sm:$0xff]  }
 0x1cd   : > { %v7718_v24 = vpop.f32.mrf.mxu0 }
 0x1ce   : > { %3794 = vmatpush2.bf16.msra.mxu1 %v6124_v57  ;;  %v8614_v57 = vld [vmem:[#allocation9_spill] sm:$0xff] }
 0x1cf   : > { %3795 = vmatprep.subr.bf16.mxu1 %v6129_v29  ;;  %4511 = vmatpush1.bf16.msra.mxu0 %v6148_v1  ;;  %v7723_v10 = vpop.f32.mrf.mxu0 }
 0x1d0   : > { %3632 = vmatmul.mubr.bf16.gmra.mxu1 %v7298_v40  ;;  %4512 = vmatprep.subr.bf16.mxu0 %v6153_v52  ;;  %v6159_v40 = vld [vmem:[#allocation4 + $0x34] ss:$8 sps:$4 sm:$0xff]   ;;  %v6142_v52 = vld [vmem:[#allocation2 + $0x708] ss:$16 sps:$4 sm:$0xff]  }
 0x1d1   : > { %3705 = vmatmul.mubr.bf16.gmra.mxu0 %v7256_v42  ;;  %3641 = vmatprep.mubr.bf16.mxu1 %v7353_v30  ;;  %v7726_v3 = vpop.f32.mrf.mxu0  ;;  %v6133_v42 = vld [vmem:[#allocation2 + $0x768] ss:$16 sps:$4 sm:$0xff]   ;;  %v6138_v30 = vld [vmem:[#allocation2 + $0x74c] ss:$16 sps:$4 sm:$0xff]  }
 0x1d2   : > { %3714 = vmatprep.mubr.bf16.mxu0 %v7307_v46  ;;  %3796 = vmatpush2.bf16.msra.mxu1 %v6127_v62  ;;  %v6157_v46 = vld [vmem:[#allocation4 + $0x30] ss:$8 sps:$4 sm:$0xff]  }
 0x1d3   : > { %3797 = vmatprep.subr.bf16.mxu1 %v6132_v60  ;;  %4513 = vmatpush1.bf16.msra.mxu0 %v6151_v23  ;;  %v7728_v43 = vpop.f32.mrf.mxu0  ;;  %v8615_v62 = vld [vmem:[#allocation10_spill] sm:$0xff] }
 0x1d4   : > { %4514 = vmatprep.subr.bf16.mxu0 %v6156_v33  ;;  %v6171_v33 = vld [vmem:[#allocation4 + $0xf4] ss:$8 sps:$4 sm:$0xff]  }
 0x1d5   : > { %v7730_v38 = vpop.f32.mrf.mxu0 }
 0x1d6   : > { %3798 = vmatpush2.bf16.msra.mxu1 %v6130_v39 }
 0x1d7   : > { %3799 = vmatprep.subr.bf16.mxu1 %v6135_v44  ;;  %4515 = vmatpush1.bf16.msra.mxu0 %v6154_v9  ;;  %v7735_v13 = vpop.f32.mrf.mxu0  ;;  %v6169_v9 = vld [vmem:[#allocation4 + $0xf0] ss:$8 sps:$4 sm:$0xff]  }
 0x1d8   : > { %3642 = vmatmul.mubr.bf16.gmra.mxu1 %v8610_v2  ;;  %4516 = vmatprep.subr.bf16.mxu0 %v6159_v40  ;;  %v8616_v2 = vld [vmem:[#allocation28_spill] sm:$0xff] }
 0x1d9   : > { %3715 = vmatmul.mubr.bf16.gmra.mxu0 %v8611_v18  ;;  %3651 = vmatprep.mubr.bf16.mxu1 %v7421_v48  ;;  %v7738_v8 = vpop.f32.mrf.mxu0  ;;  %v7745_v48 = vld [vmem:[%s8534_s4] sm:$0xf] }
 0x1da   : > { %3724 = vmatprep.mubr.bf16.mxu0 %v8612_v36  ;;  %3800 = vmatpush2.bf16.msra.mxu1 %v6133_v42  ;;  %8613 = vst [vmem:[#allocation12_spill] sm:$0xff] %v7745_v48  ;;  %v7752_v29 = vrot.slane %v7745_v48, %v8614_v57  ;;  %v7761_v60 = vrot.slane %v7745_v48, %v8615_v62  ;;  %v6220_v57 = vld [vmem:[#allocation4 + $0x1e0] ss:$8 sps:$4 sm:$0xff]   ;;  %v6222_v62 = vld [vmem:[#allocation4 + $0x1e4] ss:$8 sps:$4 sm:$0xff]  }
 0x1db   : > { %3801 = vmatprep.subr.bf16.mxu1 %v6138_v30  ;;  %4517 = vmatpush1.bf16.msra.mxu0 %v6157_v46  ;;  %v7740_v53 = vpop.f32.mrf.mxu0  ;;  %v6174_v30 = vld [vmem:[#allocation4 + $0xe4] ss:$8 sps:$4 sm:$0xff]  }
 0x1dc   : > { %4518 = vmatprep.subr.bf16.mxu0 %v6162_v55  ;;  %v3021_v39 = vadd.f32 %v7711_v15, %v7761_v60  ;;  %v3023_v46 = vadd.f32 %v7714_v51, %v7752_v29  ;;  %v8617_v15 = vld [vmem:[#allocation29_spill] sm:$0xff] }
 0x1dd   : > { %v7747_v11 = vpop.f32.mrf.mxu0 }
 0x1de   : > { %3802 = vmatpush2.bf16.msra.mxu1 %v6136_v58  ;;  %v6172_v58 = vld [vmem:[#allocation4 + $0xe0] ss:$8 sps:$4 sm:$0xff]  }
 0x1df   : > { %3803 = vmatprep.subr.bf16.mxu1 %v6141_v49  ;;  %4519 = vmatpush1.bf16.msra.mxu0 %v6160_v56  ;;  %v7757_v1 = vpop.f32.mrf.mxu0 }
 0x1e0   : > { %3652 = vmatmul.mubr.bf16.gmra.mxu1 %v7431_v12  ;;  %4520 = vmatprep.subr.bf16.mxu0 %v6165_v21  ;;  %v6166_v12 = vld [vmem:[#allocation4] ss:$8 sps:$4 sm:$0xff]  }
 0x1e1   : > { %3725 = vmatmul.mubr.bf16.gmra.mxu0 %v7418_v41  ;;  %3807 = vmatprep.mubr.bf16.mxu1 %v7488_v47  ;;  %v7763_v23 = vpop.f32.mrf.mxu0  ;;  %v3019_v41 = vadd.f32 %v7706_v37, %v7752_v29 }
 0x1e2   : > { %3734 = vmatprep.mubr.bf16.mxu0 %v7453_v27  ;;  %3804 = vmatpush2.bf16.msra.mxu1 %v6139_v6  ;;  %v3031_v6 = vadd.f32 %v7723_v10, %v7761_v60 }
 0x1e3   : > { %3805 = vmatprep.subr.bf16.mxu1 %v6144_v61  ;;  %4521 = vmatpush1.bf16.msra.mxu0 %v6163_v5  ;;  %v7767_v27 = vpop.f32.mrf.mxu0  ;;  %v6175_v5 = vld [vmem:[#allocation4 + $0xd0] ss:$8 sps:$4 sm:$0xff]  }
 0x1e4   : > { %4522 = vmatprep.subr.bf16.mxu0 %v6168_v32 }
 0x1e5   : > { %v3131_v47 = vpop.f32.mrf.mxu1  ;;  %v7773_v40 = vpop.f32.mrf.mxu0 }
 0x1e6   : > { %3806 = vmatpush2.bf16.msra.mxu1 %v6142_v52  ;;  %v7771_v44 = vadd.f32 %v3131_v47, %v3019_v41 }
 0x1e7   : > { %4523 = vmatpush1.bf16.msra.mxu0 %v6166_v12  ;;  %v3133_v42 = vpop.f32.mrf.mxu1  ;;  %v7783_v55 = vpop.f32.mrf.mxu0  ;;  %v6180_v12 = vld [vmem:[#allocation4 + $0xc4] ss:$8 sps:$4 sm:$0xff]  }
 0x1e8   : > { %4524 = vmatprep.subr.bf16.mxu0 %v6171_v33  ;;  %v7779_v37 = vadd.f32 %v3133_v42, %v3021_v39  ;;  %v3033_v33 = vadd.f32 %v7726_v3, %v7752_v29 }
 0x1e9   : > { %3735 = vmatmul.mubr.bf16.gmra.mxu0 %v7497_v25  ;;  %3808 = vmatmul.mubr.bf16.vlgmr.msra.gmra.mxu1 %v7494_v31  ;;  %v3135_v18 = vpop.f32.mrf.mxu1  ;;  %v7787_v49 = vpop.f32.mrf.mxu0  ;;  %v6177_v25 = vld [vmem:[#allocation4 + $0xd4] ss:$8 sps:$4 sm:$0xff]   ;;  %v3029_v31 = vadd.f32 %v7718_v24, %v7752_v29 }
 0x1ea   : > { %3744 = vmatprep.mubr.bf16.mxu0 %v8616_v2  ;;  %3817 = vmatprep.mubr.bf16.mxu1 %v8617_v15  ;;  %v7785_v36 = vadd.f32 %v3135_v18, %v3023_v46  ;;  %v8618_v24 = vld [vmem:[#allocation30_spill] sm:$0xff] }
 0x1eb   : > { %4525 = vmatpush2.bf16.msra.mxu0 %v6169_v9  ;;  %v7789_v51 = vpop.f32.mrf.mxu1  ;;  %v7793_v56 = vpop.f32.mrf.mxu0  ;;  %v6178_v9 = vld [vmem:[#allocation4 + $0xc0] ss:$8 sps:$4 sm:$0xff]   ;;  %v6181_v15 = vld [vmem:[#allocation4 + $0xb0] ss:$8 sps:$4 sm:$0xff]   ;;  %v6195_v18 = vld [vmem:[#allocation4 + $0x174] ss:$8 sps:$4 sm:$0xff]  }
 0x1ec   : > { %4526 = vmatprep.subr.bf16.mxu0 %v6174_v30  ;;  %v3039_v30 = vadd.f32 %v7730_v38, %v7752_v29  ;;  %v3043_v38 = vadd.f32 %v7738_v8, %v7752_v29  ;;  %4621 = vmatprep.subr.bf16.mxu1 %v6195_v18  ;;  %v6192_v18 = vld [vmem:[#allocation4 + $0x84] ss:$8 sps:$4 sm:$0xff]  }
 0x1ed   : > { %v3141_v21 = vpop.f32.mrf.mxu1  ;;  %v7799_v32 = vpop.f32.mrf.mxu0 }
 0x1ee   : > { %v7797_v61 = vadd.f32 %v3141_v21, %v3029_v31  ;;  %v6186_v31 = vld [vmem:[#allocation4 + $0xa4] ss:$8 sps:$4 sm:$0xff]   ;;  %v6193_v21 = vld [vmem:[#allocation4 + $0x170] ss:$8 sps:$4 sm:$0xff]  }
 0x1ef   : > { %4527 = vmatpush2.bf16.msra.mxu0 %v6172_v58  ;;  %v3143_v52 = vpop.f32.mrf.mxu1  ;;  %v7809_v10 = vpop.f32.mrf.mxu0  ;;  %4622 = vmatpush1.bf16.msra.mxu1 %v6193_v21 }
 0x1f0   : > { %4528 = vmatprep.subr.bf16.mxu0 %v6177_v25  ;;  %v7805_v41 = vadd.f32 %v3143_v52, %v3031_v6 }
 0x1f1   : > { %3745 = vmatmul.mubr.bf16.gmra.mxu0 %v7561_v17  ;;  %3818 = vmatmul.mubr.bf16.gmra.mxu1 %v8618_v24  ;;  %v3145_v47 = vpop.f32.mrf.mxu1  ;;  %v7813_v42 = vpop.f32.mrf.mxu0  ;;  %v6183_v17 = vld [vmem:[#allocation4 + $0xb4] ss:$8 sps:$4 sm:$0xff]   ;;  %v6196_v24 = vld [vmem:[#allocation4 + $0x160] ss:$8 sps:$4 sm:$0xff]  }
 0x1f2   : > { %3754 = vmatprep.mubr.bf16.mxu0 %v7585_v45  ;;  %3827 = vmatprep.mubr.bf16.mxu1 %v7603_v20  ;;  %v7811_v39 = vadd.f32 %v3145_v47, %v3033_v33  ;;  %v3041_v20 = vadd.f32 %v7735_v13, %v7761_v60  ;;  %v6198_v33 = vld [vmem:[#allocation4 + $0x164] ss:$8 sps:$4 sm:$0xff]  }
 0x1f3   : > { %4529 = vmatpush2.bf16.msra.mxu0 %v6175_v5  ;;  %v7815_v3 = vpop.f32.mrf.mxu1  ;;  %v7819_v46 = vpop.f32.mrf.mxu0  ;;  %4623 = vmatprep.subr.bf16.mxu1 %v6198_v33 }
 0x1f4   : > { %4530 = vmatprep.subr.bf16.mxu0 %v6180_v12  ;;  %v6184_v12 = vld [vmem:[#allocation4 + $0xa0] ss:$8 sps:$4 sm:$0xff]   ;;  %4624 = vmatpush1.bf16.msra.mxu1 %v6196_v24 }
 0x1f5   : > { %v3151_v45 = vpop.f32.mrf.mxu1  ;;  %v7825_v58 = vpop.f32.mrf.mxu0 }
 0x1f6   : > { %v7823_v2 = vadd.f32 %v3151_v45, %v3039_v30  ;;  %v6187_v30 = vld [vmem:[#allocation4 + $0x90] ss:$8 sps:$4 sm:$0xff]   ;;  %v6201_v45 = vld [vmem:[#allocation4 + $0x154] ss:$8 sps:$4 sm:$0xff]  }
 0x1f7   : > { %4531 = vmatpush2.bf16.msra.mxu0 %v6178_v9  ;;  %v3153_v25 = vpop.f32.mrf.mxu1  ;;  %v7835_v13 = vpop.f32.mrf.mxu0  ;;  %v3051_v9 = vadd.f32 %v7757_v1, %v7761_v60  ;;  %4625 = vmatprep.subr.bf16.mxu1 %v6201_v45 }
 0x1f8   : > { %4532 = vmatprep.subr.bf16.mxu0 %v6183_v17  ;;  %v7831_v6 = vadd.f32 %v3153_v25, %v3041_v20  ;;  %v6199_v25 = vld [vmem:[#allocation4 + $0x150] ss:$8 sps:$4 sm:$0xff]  }
 0x1f9   : > { %3755 = vmatmul.mubr.bf16.gmra.mxu0 %v7605_v50  ;;  %3828 = vmatmul.mubr.bf16.gmra.mxu1 %v7595_v26  ;;  %v3155_v5 = vpop.f32.mrf.mxu1  ;;  %v7839_v8 = vpop.f32.mrf.mxu0  ;;  %v6189_v26 = vld [vmem:[#allocation4 + $0x94] ss:$8 sps:$4 sm:$0xff]  }
 0x1fa   : > { %3764 = vmatprep.mubr.bf16.mxu0 %v7611_v4  ;;  %3837 = vmatprep.mubr.bf16.mxu1 %v7624_v35  ;;  %v7837_v52 = vadd.f32 %v3155_v5, %v3043_v38  ;;  %v3049_v4 = vadd.f32 %v7747_v11, %v7752_v29  ;;  %v3053_v11 = vadd.f32 %v7763_v23, %v7752_v29  ;;  %v6204_v23 = vld [vmem:[#allocation4 + $0x144] ss:$8 sps:$4 sm:$0xff]  }
 0x1fb   : > { %4533 = vmatpush2.bf16.msra.mxu0 %v6181_v15  ;;  %v7841_v50 = vpop.f32.mrf.mxu1  ;;  %v7845_v35 = vpop.f32.mrf.mxu0  ;;  %v3055_v38 = vadd.f32 %v7767_v27, %v7761_v60  ;;  %4626 = vmatpush1.bf16.msra.mxu1 %v6199_v25 }
 0x1fc   : > { %4534 = vmatprep.subr.bf16.mxu0 %v6186_v31  ;;  %4627 = vmatprep.subr.bf16.mxu1 %v6204_v23  ;;  %v6210_v23 = vld [vmem:[#allocation4 + $0x124] ss:$8 sps:$4 sm:$0xff]  }
 0x1fd   : > { %v3161_v47 = vpop.f32.mrf.mxu1  ;;  %v7851_v20 = vpop.f32.mrf.mxu0 }
 0x1fe   : > { %v7849_v17 = vadd.f32 %v3161_v47, %v3049_v4  ;;  %v3061_v4 = vadd.f32 %v7783_v55, %v7761_v60 }
 0x1ff   : > { %4535 = vmatpush2.bf16.msra.mxu0 %v6184_v12  ;;  %v3163_v15 = vpop.f32.mrf.mxu1  ;;  %v7860_v31 = vpop.f32.mrf.mxu0  ;;  %v6190_v12 = vld [vmem:[#allocation4 + $0x80] ss:$8 sps:$4 sm:$0xff]  }
 0x200   : > { %4536 = vmatprep.subr.bf16.mxu0 %v6189_v26  ;;  %v7857_v1 = vadd.f32 %v3163_v15, %v3051_v9  ;;  %v6207_v9 = vld [vmem:[#allocation4 + $0x134] ss:$8 sps:$4 sm:$0xff]   ;;  %v6205_v15 = vld [vmem:[#allocation4 + $0x130] ss:$8 sps:$4 sm:$0xff]  }
 0x201   : > { %3765 = vmatmul.mubr.bf16.gmra.mxu0 %v7627_v54  ;;  %3838 = vmatmul.mubr.bf16.gmra.mxu1 %v7631_v16  ;;  %v3165_v21 = vpop.f32.mrf.mxu1  ;;  %v7866_v33 = vpop.f32.mrf.mxu0  ;;  %v6202_v16 = vld [vmem:[#allocation4 + $0x140] ss:$8 sps:$4 sm:$0xff]  }
 0x202   : > { %3847 = vmatprep.mubr.bf16.mxu1 %v7640_v59  ;;  %v7864_v5 = vadd.f32 %v3165_v21, %v3053_v11  ;;  %v3059_v59 = vadd.f32 %v7773_v40, %v7752_v29  ;;  %4628 = vmatpush1.bf16.msra.mxu1 %v6202_v16  ;;  %v3063_v40 = vadd.f32 %v7787_v49, %v7752_v29 }
 0x203   : > { %4537 = vmatpush2.bf16.msra.mxu0 %v6187_v30  ;;  %v3167_v54 = vpop.f32.mrf.mxu1  ;;  %v7872_v24 = vpop.f32.mrf.mxu0  ;;  %4629 = vmatprep.subr.bf16.mxu1 %v6207_v9  ;;  %v6213_v9 = vld [vmem:[#allocation4 + $0x114] ss:$8 sps:$4 sm:$0xff]   ;;  %v3093_v48 = vadd.f32 %v7866_v33, %v7752_v29 }
 0x204   : > { %4538 = vmatprep.subr.bf16.mxu0 %v6192_v18  ;;  %v7870_v26 = vadd.f32 %v3167_v54, %v3055_v38  ;;  %8619 = vst [vmem:[#allocation11_spill] sm:$0xff] %v7872_v24 }
 0x205   : > { %v3171_v27 = vpop.f32.mrf.mxu1 }
 0x206   : > { %v7876_v47 = vadd.f32 %v3171_v27, %v3059_v59  ;;  %v7878_v30 = vpop.f32.mrf.mxu0  ;;  %4630 = vmatpush1.bf16.msra.mxu1 %v6205_v15 }
 0x207   : > { %4539 = vmatpush2.bf16.msra.mxu0 %v6190_v12  ;;  %v3173_v45 = vpop.f32.mrf.mxu1  ;;  %v6208_v12 = vld [vmem:[#allocation4 + $0x120] ss:$8 sps:$4 sm:$0xff]   ;;  %4631 = vmatprep.subr.bf16.mxu1 %v6210_v23 }
 0x208   : > { %v7883_v18 = vadd.f32 %v3173_v45, %v3061_v4  ;;  %v7886_v55 = vpop.f32.mrf.mxu0  ;;  %v6211_v4 = vld [vmem:[#allocation4 + $0x110] ss:$8 sps:$4 sm:$0xff]   ;;  %v3073_v45 = vadd.f32 %v7813_v42, %v7752_v29  ;;  %v6214_v23 = vld [vmem:[#allocation4 + $0x100] ss:$8 sps:$4 sm:$0xff]  }
 0x209   : > { %3848 = vmatmul.mubr.bf16.gmra.mxu1 %v7645_v0  ;;  %v3175_v25 = vpop.f32.mrf.mxu1  ;;  %v3069_v0 = vadd.f32 %v7799_v32, %v7752_v29 }
 0x20a   : > { %3857 = vmatprep.mubr.bf16.mxu1 %v7654_v28  ;;  %v7888_v11 = vadd.f32 %v3175_v25, %v3063_v40  ;;  %v7890_v21 = vpop.f32.mrf.mxu0  ;;  %v3071_v28 = vadd.f32 %v7809_v10, %v7761_v60  ;;  %4632 = vmatpush1.bf16.msra.mxu1 %v6208_v12 }
 0x20b   : > { %v7892_v38 = vpop.f32.mrf.mxu1  ;;  %4633 = vmatprep.subr.bf16.mxu1 %v6213_v9 }
 0x20c   : > { %v7896_v49 = vpop.f32.mrf.mxu0 }
 0x20d   : > { %v3181_v54 = vpop.f32.mrf.mxu1 }
 0x20e   : > { %v7900_v16 = vadd.f32 %v3181_v54, %v3069_v0  ;;  %v7902_v59 = vpop.f32.mrf.mxu0  ;;  %4634 = vmatpush1.bf16.msra.mxu1 %v6211_v4  ;;  %v6216_v0 = vld [vmem:[#allocation4 + $0x104] ss:$8 sps:$4 sm:$0xff]   ;;  %v6219_v4 = vld [vmem:[#allocation4 + $0x1f4] ss:$8 sps:$4 sm:$0xff]  }
 0x20f   : > { %v3183_v27 = vpop.f32.mrf.mxu1  ;;  %4635 = vmatprep.subr.bf16.mxu1 %v6216_v0 }
 0x210   : > { %v7907_v32 = vadd.f32 %v3183_v27, %v3071_v28  ;;  %v7910_v15 = vpop.f32.mrf.mxu0 }
 0x211   : > { %3858 = vmatmul.mubr.bf16.gmra.mxu1 %v7659_v34  ;;  %v3185_v10 = vpop.f32.mrf.mxu1  ;;  %v3079_v34 = vadd.f32 %v7825_v58, %v7752_v29 }
 0x212   : > { %3867 = vmatprep.mubr.bf16.mxu1 %v7668_v14  ;;  %v7912_v40 = vadd.f32 %v3185_v10, %v3073_v45  ;;  %v7914_v25 = vpop.f32.mrf.mxu0  ;;  %v3081_v14 = vadd.f32 %v7835_v13, %v7761_v60  ;;  %4636 = vmatpush1.bf16.msra.mxu1 %v6214_v23  ;;  %v6217_v45 = vld [vmem:[#allocation4 + $0x1f0] ss:$8 sps:$4 sm:$0xff]   ;;  %v3083_v10 = vadd.f32 %v7839_v8, %v7752_v29 }
 0x213   : > { %v7916_v12 = vpop.f32.mrf.mxu1  ;;  %4637 = vmatprep.subr.bf16.mxu1 %v6219_v4 }
 0x214   : > { %v7920_v42 = vpop.f32.mrf.mxu0 }
 0x215   : > { %v3191_v54 = vpop.f32.mrf.mxu1 }
 0x216   : > { %v7924_v28 = vadd.f32 %v3191_v54, %v3079_v34  ;;  %v7926_v27 = vpop.f32.mrf.mxu0  ;;  %4638 = vmatpush2.bf16.msra.mxu1 %v6217_v45  ;;  %v6225_v45 = vld [vmem:[#allocation4 + $0x1d4] ss:$8 sps:$4 sm:$0xff]  }
 0x217   : > { %v3193_v9 = vpop.f32.mrf.mxu1  ;;  %4639 = vmatprep.subr.bf16.mxu1 %v6222_v62 }
 0x218   : > { %v7931_v58 = vadd.f32 %v3193_v9, %v3081_v14  ;;  %v7934_v0 = vpop.f32.mrf.mxu0 }
 0x219   : > { %3868 = vmatmul.mubr.bf16.gmra.mxu1 %v7673_v63  ;;  %v3195_v13 = vpop.f32.mrf.mxu1  ;;  %v3089_v63 = vadd.f32 %v7851_v20, %v7752_v29  ;;  %v3245_v29 = vadd.f32 %v7878_v30, %v7771_v44  ;;  %v3249_v30 = vadd.f32 %v7890_v21, %v7785_v36  ;;  %v3035_v36 = vadd.f32 %v7728_v43, %v7761_v60 }
 0x21a   : > { %8620 = vst [vmem:[#allocation15_spill] sm:$0xff] %v7931_v58  ;;  %3877 = vmatprep.mubr.bf16.mxu1 %v7681_v19  ;;  %v7936_v34 = vadd.f32 %v3195_v13, %v3083_v10  ;;  %v7938_v54 = vpop.f32.mrf.mxu0  ;;  %v3091_v19 = vadd.f32 %v7860_v31, %v7761_v60  ;;  %4640 = vmatpush2.bf16.msra.mxu1 %v6220_v57  ;;  %v6223_v13 = vld [vmem:[#allocation4 + $0x1d0] ss:$8 sps:$4 sm:$0xff]   ;;  %v6226_v57 = vld [vmem:[#allocation4 + $0x1c0] ss:$8 sps:$4 sm:$0xff]  }
 0x21b   : > { %v7940_v23 = vpop.f32.mrf.mxu1  ;;  %4641 = vmatprep.subr.bf16.mxu1 %v6225_v45  ;;  %v3148_v43 = vadd.f32 %v7815_v3, %v3035_v36 }
 0x21c   : > { %8621 = vst [vmem:[#allocation13_spill] sm:$0xff] %v7936_v34  ;;  %8622 = vst [vmem:[#allocation16_spill] sm:$0xff] %v7940_v23  ;;  %v7944_v8 = vpop.f32.mrf.mxu0 }
 0x21d   : > { %v3201_v14 = vpop.f32.mrf.mxu1 }
 0x21e   : > { %v7948_v9 = vadd.f32 %v3201_v14, %v3089_v63  ;;  %v7950_v4 = vpop.f32.mrf.mxu0  ;;  %4642 = vmatpush2.bf16.msra.mxu1 %v6223_v13  ;;  %v6229_v13 = vld [vmem:[#allocation4 + $0x1b0] ss:$8 sps:$4 sm:$0xff]  }
 0x21f   : > { %v3203_v10 = vpop.f32.mrf.mxu1 }
 0x220   : > { %8623 = vst [vmem:[#allocation14_spill] sm:$0xff] %v7948_v9  ;;  %v7955_v20 = vadd.f32 %v3203_v10, %v3091_v19  ;;  %v7957_v24 = vpop.f32.mrf.mxu0  ;;  %v6228_v9 = vld [vmem:[#allocation4 + $0x1c4] ss:$8 sps:$4 sm:$0xff]   ;;  %v3025_v19 = vadd.f32 %v7716_v7, %v7761_v60 }
 0x221   : > { %3878 = vmatmul.mubr.bf16.gmra.mxu1 %v7684_v22  ;;  %v3205_v62 = vpop.f32.mrf.mxu1  ;;  %4643 = vmatprep.subr.bf16.mxu1 %v6228_v9 }
 0x222   : > { %8624 = vst [vmem:[#allocation19_spill] sm:$0xff] %v7955_v20  ;;  %v7959_v31 = vadd.f32 %v3205_v62, %v3093_v48  ;;  %v7961_v63 = vpop.f32.mrf.mxu0  ;;  %v3247_v48 = vadd.f32 %v7886_v55, %v7779_v37  ;;  %4644 = vmatpush2.bf16.msra.mxu1 %v6226_v57  ;;  %v3255_v57 = vadd.f32 %v7902_v59, %v7797_v61 }
 0x223   : > { %v7963_v14 = vpop.f32.mrf.mxu1  ;;  %v3257_v61 = vadd.f32 %v7910_v15, %v7805_v41  ;;  %v3261_v15 = vadd.f32 %v7920_v42, %v3148_v43  ;;  %v6240_v43 = vld [vmem:[#allocation4 + $0x184] ss:$8 sps:$4 sm:$0xff]  }
 0x224   : > { %8625 = vst [vmem:[#allocation17_spill] sm:$0xff] %v7959_v31  ;;  %8626 = vst [vmem:[#allocation20_spill] sm:$0xff] %v7963_v14  ;;  %v7967_v33 = vpop.f32.mrf.mxu0  ;;  %v6231_v31 = vld [vmem:[#allocation4 + $0x1b4] ss:$8 sps:$4 sm:$0xff]   ;;  %v3138_v14 = vadd.f32 %v7789_v51, %v3025_v19 }
 0x225   : > { %4645 = vmatprep.subr.bf16.mxu1 %v6231_v31 }
 0x226   : > { %v3357_v22 = vpop.f32.mrf.mxu1  ;;  %v7973_v10 = vpop.f32.mrf.mxu0  ;;  %v3251_v7 = vadd.f32 %v7896_v49, %v3138_v14  ;;  %4646 = vmatpush2.bf16.msra.mxu1 %v6229_v13  ;;  %v6232_v14 = vld [vmem:[#allocation4 + $0x1a0] ss:$8 sps:$4 sm:$0xff]  }
 0x227   : > { %v3358_v45 = vadd.f32 %v3357_v22, %v3245_v29 }
 0x228   : > { %v3359_v62 = vpop.f32.mrf.mxu1  ;;  %v7978_v9 = vpop.f32.mrf.mxu0 }
 0x229   : > { %v3360_v44 = vadd.f32 %v3359_v62, %v3247_v48  ;;  %v3952_v37 = vmul.f32 0.01, %v3358_v45  ;;  %vm3888_vm3 = vcmp.gt.f32.partialorder %v3358_v45, 0.0  ;;  %v6234_v62 = vld [vmem:[#allocation4 + $0x1a4] ss:$8 sps:$4 sm:$0xff]  }
 0x22a   : > { %v3361_v20 = vpop.f32.mrf.mxu1  ;;  %v7981_v55 = vpop.f32.mrf.mxu0  ;;  %4647 = vmatprep.subr.bf16.mxu1 %v6234_v62 }
 0x22b   : > { %v3362_v29 = vadd.f32 %v3361_v20, %v3249_v30  ;;  %v3953_v51 = vmul.f32 0.01, %v3360_v44  ;;  %vm3889_vm5 = vcmp.gt.f32.partialorder %v3360_v44, 0.0  ;;  %v4016_v59 = vsel %vm3888_vm3, %v3358_v45, %v3952_v37  ;;  %4648 = vmatpush2.bf16.msra.mxu1 %v6232_v14 }
 0x22c   : > { %v3363_v22 = vpop.f32.mrf.mxu1  ;;  %v7987_v31 = vpop.f32.mrf.mxu0  ;;  %v3265_v14 = vadd.f32 %v7926_v27, %v7823_v2 }
 0x22d   : > { %v3364_v19 = vadd.f32 %v3363_v22, %v3251_v7  ;;  %vm3892_vm4 = vcmp.gt.f32.partialorder %v3362_v29, 0.0  ;;  %v3956_v21 = vmul.f32 0.01, %v3362_v29  ;;  %v3259_v22 = vadd.f32 %v7914_v25, %v7811_v39  ;;  %v6235_v25 = vld [vmem:[#allocation4 + $0x190] ss:$8 sps:$4 sm:$0xff]  }
 0x22e   : > { %v3367_v49 = vpop.f32.mrf.mxu1 }
 0x22f   : > { %vm3893_vm6 = vcmp.gt.f32.partialorder %v3364_v19, 0.0  ;;  %v3957_v20 = vmul.f32 0.01, %v3364_v19  ;;  %v3368_v48 = vadd.f32 %v3367_v49, %v3255_v57  ;;  %v4020_v13 = vsel %vm3892_vm4, %v3362_v29, %v3956_v21  ;;  %v7991_v30 = vpop.f32.mrf.mxu0 }
 0x230   : > { %v3369_v7 = vpop.f32.mrf.mxu1  ;;  %v4080_v34 = vpack.c.bf16 %v4020_v13, %v4016_v59  ;;  %v4017_v49 = vsel %vm3889_vm5, %v3360_v44, %v3953_v51 }
 0x231   : > { %v7996_v23 = vpop.f32.mrf.mxu0  ;;  %v3370_v58 = vadd.f32 %v3369_v7, %v3257_v61  ;;  %v4021_v41 = vsel %vm3893_vm6, %v3364_v19, %v3957_v20  ;;  %v3960_v45 = vmul.f32 0.01, %v3368_v48  ;;  %vm3896_vm7 = vcmp.gt.f32.partialorder %v3368_v48, 0.0  ;;  %v6237_v61 = vld [vmem:[#allocation4 + $0x194] ss:$8 sps:$4 sm:$0xff]  }
 0x232   : > { %v3371_v57 = vpop.f32.mrf.mxu1  ;;  %v4081_v29 = vpack.c.bf16 %v4021_v41, %v4017_v49  ;;  %4649 = vmatprep.subr.bf16.mxu1 %v6237_v61  ;;  %v6238_v7 = vld [vmem:[#allocation4 + $0x180] ss:$8 sps:$4 sm:$0xff]  }
 0x233   : > { %v3372_v37 = vadd.f32 %v3371_v57, %v3259_v22  ;;  %v3961_v3 = vmul.f32 0.01, %v3370_v58  ;;  %v8001_v36 = vpop.f32.mrf.mxu0  ;;  %vm3897_vm9 = vcmp.gt.f32.partialorder %v3370_v58, 0.0  ;;  %v4024_v51 = vsel %vm3896_vm7, %v3368_v48, %v3960_v45  ;;  %4650 = vmatpush2.bf16.msra.mxu1 %v6235_v25 }
 0x234   : > { %v3373_v39 = vpop.f32.mrf.mxu1  ;;  %4540 = vmatprep.mubr.bf16.mxu0 %v4081_v29  ;;  %v3045_v22 = vadd.f32 %v7740_v53, %v7761_v60  ;;  %v3267_v57 = vadd.f32 %v7934_v0, %v7831_v6  ;;  %4651 = vmatprep.subr.bf16.mxu1 %v6240_v43  ;;  %v3269_v45 = vadd.f32 %v7938_v54, %v7837_v52 }
 0x235   : > { %vm3900_vm8 = vcmp.gt.f32.partialorder %v3372_v37, 0.0  ;;  %v3964_v21 = vmul.f32 0.01, %v3372_v37  ;;  %v3374_v62 = vadd.f32 %v3373_v39, %v3261_v15  ;;  %v8003_v44 = vpop.f32.mrf.mxu0  ;;  %4541 = vmatmul.mubr.bf16.vlgmr.msra.gmra.mxu0 %v4080_v34  ;;  %v4025_v34 = vsel %vm3897_vm9, %v3370_v58, %v3961_v3 }
 0x236   : > { %v3158_v15 = vadd.f32 %v7841_v50, %v3045_v22  ;;  %v3275_v50 = vadd.f32 %v7950_v4, %v7849_v17  ;;  %v3279_v4 = vadd.f32 %v7961_v63, %v7864_v5  ;;  %v3285_v5 = vadd.f32 %v7973_v10, %v7876_v47 }
 0x237   : > { %v4028_v42 = vsel %vm3900_vm8, %v3372_v37, %v3964_v21  ;;  %vm3901_vm10 = vcmp.gt.f32.partialorder %v3374_v62, 0.0  ;;  %v3965_v19 = vmul.f32 0.01, %v3374_v62  ;;  %4652 = vmatpush2.bf16.msra.mxu1 %v6238_v7  ;;  %v3287_v47 = vadd.f32 %v7978_v9, %v7883_v18 }
 0x238   : > { %v4084_v20 = vpack.c.bf16 %v4028_v42, %v4024_v51  ;;  %v8007_v59 = vpop.f32.mrf.mxu0  ;;  %v3377_v13 = vpop.f32.mrf.mxu1  ;;  %v3271_v58 = vadd.f32 %v7944_v8, %v3158_v15  ;;  %v3277_v51 = vadd.f32 %v7957_v24, %v7857_v1  ;;  %v3065_v15 = vadd.f32 %v7793_v56, %v7761_v60 }
 0x239   : > { %v4029_v48 = vsel %vm3901_vm10, %v3374_v62, %v3965_v19  ;;  %v3378_v49 = vadd.f32 %v3377_v13, %v3265_v14 }
 0x23a   : > { %v8014_v41 = vpop.f32.mrf.mxu0  ;;  %v3379_v2 = vpop.f32.mrf.mxu1  ;;  %v4085_v27 = vpack.c.bf16 %v4029_v48, %v4025_v34  ;;  %v3178_v56 = vadd.f32 %v7892_v38, %v3065_v15  ;;  %v3295_v38 = vadd.f32 %v7991_v30, %v7900_v16  ;;  %v3297_v16 = vadd.f32 %v7996_v23, %v7907_v32 }
 0x23b   : > { %v3380_v37 = vadd.f32 %v3379_v2, %v3267_v57  ;;  %v3968_v6 = vmul.f32 0.01, %v3378_v49  ;;  %vm3904_vm11 = vcmp.gt.f32.partialorder %v3378_v49, 0.0  ;;  %v3281_v57 = vadd.f32 %v7967_v33, %v7870_v26 }
 0x23c   : > { %v8019_v29 = vpop.f32.mrf.mxu0  ;;  %v3381_v53 = vpop.f32.mrf.mxu1  ;;  %4550 = vmatprep.mubr.bf16.mxu0 %v4085_v27 }
 0x23d   : > { %v3382_v0 = vadd.f32 %v3381_v53, %v3269_v45  ;;  %4551 = vmatmul.mubr.bf16.gmra.mxu0 %v4084_v20  ;;  %v3969_v52 = vmul.f32 0.01, %v3380_v37  ;;  %vm3905_vm13 = vcmp.gt.f32.partialorder %v3380_v37, 0.0  ;;  %v4032_v42 = vsel %vm3904_vm11, %v3378_v49, %v3968_v6 }
 0x23e   : > { %v8022_v3 = vpop.f32.mrf.mxu0  ;;  %v3383_v39 = vpop.f32.mrf.mxu1 }
 0x23f   : > { %v3384_v25 = vadd.f32 %v3383_v39, %v3271_v58  ;;  %vm3908_vm12 = vcmp.gt.f32.partialorder %v3382_v0, 0.0  ;;  %v3972_v54 = vmul.f32 0.01, %v3382_v0  ;;  %v4033_v34 = vsel %vm3905_vm13, %v3380_v37, %v3969_v52 }
 0x240   : > { %v8026_v21 = vpop.f32.mrf.mxu0  ;;  %v3387_v62 = vpop.f32.mrf.mxu1 }
 0x241   : > { %vm3909_vm14 = vcmp.gt.f32.partialorder %v3384_v25, 0.0  ;;  %v3973_v8 = vmul.f32 0.01, %v3384_v25  ;;  %v3388_v61 = vadd.f32 %v3387_v62, %v3275_v50  ;;  %v4036_v19 = vsel %vm3908_vm12, %v3382_v0, %v3972_v54 }
 0x242   : > { %v8030_v14 = vpop.f32.mrf.mxu0  ;;  %v3389_v17 = vpop.f32.mrf.mxu1  ;;  %v4088_v20 = vpack.c.bf16 %v4036_v19, %v4032_v42  ;;  %v3289_v50 = vadd.f32 %v7981_v55, %v7888_v11 }
 0x243   : > { %v3976_v13 = vmul.f32 0.01, %v3388_v61  ;;  %v3390_v7 = vadd.f32 %v3389_v17, %v3277_v51  ;;  %v4037_v48 = vsel %vm3909_vm14, %v3384_v25, %v3973_v8  ;;  %vm3912_vm15 = vcmp.gt.f32.partialorder %v3388_v61, 0.0 }
 0x244   : > { %v8034_v43 = vpop.f32.mrf.mxu0  ;;  %v3391_v22 = vpop.f32.mrf.mxu1  ;;  %v4089_v24 = vpack.c.bf16 %v4037_v48, %v4033_v34  ;;  %v3075_v17 = vadd.f32 %v7819_v46, %v7761_v60 }
 0x245   : > { %v3392_v1 = vadd.f32 %v3391_v22, %v3279_v4  ;;  %v4040_v45 = vsel %vm3912_vm15, %v3388_v61, %v3976_v13  ;;  %v3977_v37 = vmul.f32 0.01, %v3390_v7  ;;  %vm3913_vm2 = vcmp.gt.f32.partialorder %v3390_v7, 0.0 }
 0x246   : > { %v8038_v49 = vpop.f32.mrf.mxu0  ;;  %v3393_v2 = vpop.f32.mrf.mxu1  ;;  %4560 = vmatprep.mubr.bf16.mxu0 %v4089_v24  ;;  %v3291_v61 = vadd.f32 %v7987_v31, %v3178_v56  ;;  %v3188_v46 = vadd.f32 %v7916_v12, %v3075_v17  ;;  %v3305_v12 = vadd.f32 %v8007_v59, %v7924_v28 }
 0x247   : > { %vm3916_vm0 = vcmp.gt.f32.partialorder %v3392_v1, 0.0  ;;  %v3980_v63 = vmul.f32 0.01, %v3392_v1  ;;  %v3394_v27 = vadd.f32 %v3393_v2, %v3281_v57  ;;  %4561 = vmatmul.mubr.bf16.gmra.mxu0 %v4088_v20  ;;  %v4041_v9 = vsel %vm3913_vm2, %v3390_v7, %v3977_v37 }
 0x248   : > { %v3397_v26 = vpop.f32.mrf.mxu1  ;;  %v8044_v33 = vpop.f32.mrf.mxu0  ;;  %v3301_v15 = vadd.f32 %v8003_v44, %v3188_v46 }
 0x249   : > { %v4044_v53 = vsel %vm3916_vm0, %v3392_v1, %v3980_v63  ;;  %vm3917_vm1 = vcmp.gt.f32.partialorder %v3394_v27, 0.0  ;;  %v3981_v58 = vmul.f32 0.01, %v3394_v27  ;;  %v3398_v6 = vadd.f32 %v3397_v26, %v3285_v5 }
 0x24a   : > { %v4092_v10 = vpack.c.bf16 %v4044_v53, %v4040_v45  ;;  %v3399_v0 = vpop.f32.mrf.mxu1  ;;  %v8048_v39 = vpop.f32.mrf.mxu0  ;;  %v3299_v1 = vadd.f32 %v8001_v36, %v7912_v40  ;;  %v3085_v53 = vadd.f32 %v7845_v35, %v7761_v60  ;;  %v8628_v35 = vld [vmem:[#allocation16_spill] sm:$0xff] }
 0x24b   : > { %v3984_v25 = vmul.f32 0.01, %v3398_v6  ;;  %v3400_v52 = vadd.f32 %v3399_v0, %v3287_v47  ;;  %v4045_v8 = vsel %vm3917_vm1, %v3394_v27, %v3981_v58  ;;  %vm3920_vm3 = vcmp.gt.f32.partialorder %v3398_v6, 0.0 }
 0x24c   : > { %v3401_v54 = vpop.f32.mrf.mxu1  ;;  %v8053_v62 = vpop.f32.mrf.mxu0  ;;  %v4093_v19 = vpack.c.bf16 %v4045_v8, %v4041_v9  ;;  %v8629_v8 = vld [vmem:[#allocation13_spill] sm:$0xff] }
 0x24d   : > { %v3402_v18 = vadd.f32 %v3401_v54, %v3289_v50  ;;  %v4048_v4 = vsel %vm3920_vm3, %v3398_v6, %v3984_v25  ;;  %v3985_v20 = vmul.f32 0.01, %v3400_v52  ;;  %vm3921_vm6 = vcmp.gt.f32.partialorder %v3400_v52, 0.0  ;;  %v8627_v50 = vld [vmem:[#allocation15_spill] sm:$0xff] }
 0x24e   : > { %v3403_v51 = vpop.f32.mrf.mxu1  ;;  %v8056_v42 = vpop.f32.mrf.mxu0  ;;  %4570 = vmatprep.mubr.bf16.mxu0 %v4093_v19  ;;  %v3307_v28 = vadd.f32 %v8014_v41, %v8627_v50  ;;  %v3198_v54 = vadd.f32 %v8628_v35, %v3085_v53 }
 0x24f   : > { %vm3924_vm4 = vcmp.gt.f32.partialorder %v3402_v18, 0.0  ;;  %v3988_v11 = vmul.f32 0.01, %v3402_v18  ;;  %v3404_v55 = vadd.f32 %v3403_v51, %v3291_v61  ;;  %4571 = vmatmul.mubr.bf16.gmra.mxu0 %v4092_v10  ;;  %v4049_v23 = vsel %vm3921_vm6, %v3400_v52, %v3985_v20 }
 0x250   : > { %v3407_v31 = vpop.f32.mrf.mxu1  ;;  %v8062_v13 = vpop.f32.mrf.mxu0  ;;  %v3309_v61 = vadd.f32 %v8019_v29, %v8629_v8 }
 0x251   : > { %v4052_v7 = vsel %vm3924_vm4, %v3402_v18, %v3988_v11  ;;  %vm3925_vm5 = vcmp.gt.f32.partialorder %v3404_v55, 0.0  ;;  %v3989_v22 = vmul.f32 0.01, %v3404_v55  ;;  %v3408_v34 = vadd.f32 %v3407_v31, %v3295_v38  ;;  %v8630_v31 = vld [vmem:[#allocation14_spill] sm:$0xff] }
 0x252   : > { %v4096_v30 = vpack.c.bf16 %v4052_v7, %v4048_v4  ;;  %v3409_v48 = vpop.f32.mrf.mxu1  ;;  %v8066_v57 = vpop.f32.mrf.mxu0  ;;  %v3311_v11 = vadd.f32 %v8022_v3, %v3198_v54  ;;  %v3315_v7 = vadd.f32 %v8026_v21, %v8630_v31 }
 0x253   : > { %v3992_v24 = vmul.f32 0.01, %v3408_v34  ;;  %v3410_v2 = vadd.f32 %v3409_v48, %v3297_v16  ;;  %v4053_v27 = vsel %vm3925_vm5, %v3404_v55, %v3989_v22  ;;  %vm3928_vm7 = vcmp.gt.f32.partialorder %v3408_v34, 0.0 }
 0x254   : > { %v3411_v5 = vpop.f32.mrf.mxu1  ;;  %v8071_v63 = vpop.f32.mrf.mxu0  ;;  %v4097_v26 = vpack.c.bf16 %v4053_v27, %v4049_v23 }
 0x255   : > { %v3412_v32 = vadd.f32 %v3411_v5, %v3299_v1  ;;  %v4056_v58 = vsel %vm3928_vm7, %v3408_v34, %v3992_v24  ;;  %v3993_v6 = vmul.f32 0.01, %v3410_v2  ;;  %vm3929_vm10 = vcmp.gt.f32.partialorder %v3410_v2, 0.0  ;;  %v8631_v34 = vld [vmem:[#allocation11_spill] sm:$0xff] }
 0x256   : > { %v3413_v45 = vpop.f32.mrf.mxu1  ;;  %v8074_v37 = vpop.f32.mrf.mxu0  ;;  %4580 = vmatprep.mubr.bf16.mxu0 %v4097_v26  ;;  %v3095_v16 = vadd.f32 %v8631_v34, %v7761_v60  ;;  %v8633_v60 = vld [vmem:[#allocation20_spill] sm:$0xff] }
 0x257   : > { %vm3932_vm8 = vcmp.gt.f32.partialorder %v3412_v32, 0.0  ;;  %v3996_v40 = vmul.f32 0.01, %v3412_v32  ;;  %v3414_v36 = vadd.f32 %v3413_v45, %v3301_v15  ;;  %4581 = vmatmul.mubr.bf16.gmra.mxu0 %v4096_v30  ;;  %v4057_v55 = vsel %vm3929_vm10, %v3410_v2, %v3993_v6  ;;  %v8632_v30 = vld [vmem:[#allocation19_spill] sm:$0xff]  ;;  %v8634_v45 = vld [vmem:[#allocation17_spill] sm:$0xff] }
 0x258   : > { %v3417_v44 = vpop.f32.mrf.mxu1  ;;  %v8080_v47 = vpop.f32.mrf.mxu0  ;;  %v3317_v48 = vadd.f32 %v8030_v14, %v8632_v30  ;;  %v3208_v23 = vadd.f32 %v8633_v60, %v3095_v16  ;;  %v3319_v14 = vadd.f32 %v8034_v43, %v8634_v45 }
 0x259   : > { %v4060_v10 = vsel %vm3932_vm8, %v3412_v32, %v3996_v40  ;;  %vm3933_vm9 = vcmp.gt.f32.partialorder %v3414_v36, 0.0  ;;  %v3997_v0 = vmul.f32 0.01, %v3414_v36  ;;  %v3418_v56 = vadd.f32 %v3417_v44, %v3305_v12  ;;  %v8635_v12 = vld [vmem:[#allocation8_spill] sm:$0xff] }
 0x25a   : > { %v4100_v59 = vpack.c.bf16 %v4060_v10, %v4056_v58  ;;  %v3419_v25 = vpop.f32.mrf.mxu1  ;;  %v8084_v52 = vpop.f32.mrf.mxu0  ;;  %v8636_v40 = vsub.s32 2, %v8635_v12  ;;  %v8638_v58 = vsub.s32 3, %v8635_v12 }
 0x25b   : > { %v4000_v18 = vmul.f32 0.01, %v3418_v56  ;;  %v3420_v9 = vadd.f32 %v3419_v25, %v3307_v28  ;;  %v4061_v38 = vsel %vm3933_vm9, %v3414_v36, %v3997_v0  ;;  %vm3936_vm11 = vcmp.gt.f32.partialorder %v3418_v56, 0.0  ;;  %v8637_v36 = vld [vmem:[#allocation12_spill] sm:$0xff] }
 0x25c   : > { %v3421_v51 = vpop.f32.mrf.mxu1  ;;  %v8089_v19 = vpop.f32.mrf.mxu0  ;;  %v4101_v20 = vpack.c.bf16 %v4061_v38, %v4057_v55  ;;  %v8110_v53 = vrot.slane %v8637_v36, %v8636_v40  ;;  %v8115_v6 = vrot.slane %v8637_v36, %v8638_v58 }
 0x25d   : > { %v3422_v41 = vadd.f32 %v3421_v51, %v3309_v61  ;;  %v4064_v3 = vsel %vm3936_vm11, %v3418_v56, %v4000_v18  ;;  %v4001_v46 = vmul.f32 0.01, %v3420_v9  ;;  %vm3937_vm14 = vcmp.gt.f32.partialorder %v3420_v9, 0.0 }
 0x25e   : > { %v3423_v17 = vpop.f32.mrf.mxu1  ;;  %v8092_v4 = vpop.f32.mrf.mxu0  ;;  %4590 = vmatprep.mubr.bf16.mxu0 %v4101_v20  ;;  %v3321_v56 = vadd.f32 %v8038_v49, %v3208_v23  ;;  %v3471_v18 = vadd.f32 %v8044_v33, %v8110_v53  ;;  %v3473_v51 = vadd.f32 %v8048_v39, %v8115_v6  ;;  %v3475_v33 = vadd.f32 %v8053_v62, %v8110_v53 }
 0x25f   : > { %vm3940_vm12 = vcmp.gt.f32.partialorder %v3422_v41, 0.0  ;;  %v4004_v29 = vmul.f32 0.01, %v3422_v41  ;;  %v3424_v22 = vadd.f32 %v3423_v17, %v3311_v11  ;;  %4591 = vmatmul.mubr.bf16.gmra.mxu0 %v4100_v59  ;;  %v4065_v43 = vsel %vm3937_vm14, %v3420_v9, %v4001_v46 }
 0x260   : > { %v3427_v1 = vpop.f32.mrf.mxu1  ;;  %v8100_v24 = vpop.f32.mrf.mxu0  ;;  %v3481_v46 = vadd.f32 %v8062_v13, %v8110_v53  ;;  %v3483_v62 = vadd.f32 %v8066_v57, %v8115_v6  ;;  %v3491_v57 = vadd.f32 %v8080_v47, %v8110_v53  ;;  %v3493_v36 = vadd.f32 %v8084_v52, %v8115_v6 }
 0x261   : > { %v4068_v2 = vsel %vm3940_vm12, %v3422_v41, %v4004_v29  ;;  %vm3941_vm13 = vcmp.gt.f32.partialorder %v3424_v22, 0.0  ;;  %v4005_v5 = vmul.f32 0.01, %v3424_v22  ;;  %v3428_v21 = vadd.f32 %v3427_v1, %v3315_v7 }
 0x262   : > { %v4104_v27 = vpack.c.bf16 %v4068_v2, %v4064_v3  ;;  %v3429_v15 = vpop.f32.mrf.mxu1  ;;  %v8102_v32 = vpop.f32.mrf.mxu0  ;;  %v3501_v52 = vadd.f32 %v8100_v24, %v8110_v53 }
 0x263   : > { %v3430_v26 = vadd.f32 %v3429_v15, %v3317_v48  ;;  %v4069_v0 = vsel %vm3941_vm13, %v3424_v22, %v4005_v5  ;;  %v4008_v50 = vmul.f32 0.01, %v3428_v21  ;;  %vm3944_vm15 = vcmp.gt.f32.partialorder %v3428_v21, 0.0 }
 0x264   : > { %v3431_v44 = vpop.f32.mrf.mxu1  ;;  %v8117_v10 = vpop.f32.mrf.mxu0  ;;  %v4105_v35 = vpack.c.bf16 %v4069_v0, %v4065_v43  ;;  %v3485_v15 = vadd.f32 %v8071_v63, %v8110_v53  ;;  %v3495_v0 = vadd.f32 %v8089_v19, %v8110_v53 }
 0x265   : > { %v3432_v28 = vadd.f32 %v3431_v44, %v3319_v14  ;;  %v4009_v54 = vmul.f32 0.01, %v3430_v26  ;;  %vm3945_vm1 = vcmp.gt.f32.partialorder %v3430_v26, 0.0  ;;  %v4072_v38 = vsel %vm3944_vm15, %v3428_v21, %v4008_v50 }
 0x266   : > { %v3433_v59 = vpop.f32.mrf.mxu1  ;;  %v8120_v25 = vpop.f32.mrf.mxu0  ;;  %4600 = vmatprep.mubr.bf16.mxu0 %v4105_v35 }
 0x267   : > { %vm3948_vm0 = vcmp.gt.f32.partialorder %v3432_v28, 0.0  ;;  %v4012_v8 = vmul.f32 0.01, %v3432_v28  ;;  %v3434_v61 = vadd.f32 %v3433_v59, %v3321_v56  ;;  %4601 = vmatmul.mubr.bf16.gmra.mxu0 %v4104_v27  ;;  %v4073_v39 = vsel %vm3945_vm1, %v3430_v26, %v4009_v54 }
 0x268   : > { %v8126_v49 = vpop.f32.mrf.mxu0  ;;  %v3583_v9 = vpop.f32.mrf.mxu1 }
 0x269   : > { %v4076_v11 = vsel %vm3948_vm0, %v3432_v28, %v4012_v8  ;;  %vm3949_vm2 = vcmp.gt.f32.partialorder %v3434_v61, 0.0  ;;  %v4013_v41 = vmul.f32 0.01, %v3434_v61  ;;  %v8128_v17 = vadd.f32 %v3583_v9, %v3471_v18 }
 0x26a   : > { %v4108_v55 = vpack.c.bf16 %v4076_v11, %v4072_v38  ;;  %v3512_v20 = vpop.f32.mrf.mxu0  ;;  %v3585_v31 = vpop.f32.mrf.mxu1  ;;  %v3503_v8 = vadd.f32 %v8102_v32, %v8115_v6  ;;  %v3511_v32 = vadd.f32 %v8126_v49, %v8110_v53 }
 0x26b   : > { %v8132_v7 = vadd.f32 %v3585_v31, %v3473_v51  ;;  %v4077_v29 = vsel %vm3949_vm2, %v3434_v61, %v4013_v41  ;;  %v3505_v51 = vadd.f32 %v8117_v10, %v8110_v53 }
 0x26c   : > { %v3514_v22 = vpop.f32.mrf.mxu0  ;;  %v3587_v34 = vpop.f32.mrf.mxu1  ;;  %v4109_v16 = vpack.c.bf16 %v4077_v29, %v4073_v39 }
 0x26d   : > { %v8134_v30 = vadd.f32 %v3587_v34, %v3475_v33  ;;  %v3513_v33 = vadd.f32 %v3512_v20, %v8115_v6  ;;  %v3515_v34 = vadd.f32 %v3514_v22, %v8110_v53 }
 0x26e   : > { %v8136_v48 = vpop.f32.mrf.mxu0  ;;  %v8138_v3 = vpop.f32.mrf.mxu1  ;;  %4610 = vmatprep.mubr.bf16.mxu0 %v4109_v16 }
 0x26f   : > { %4611 = vmatmul.mubr.bf16.gmra.mxu0 %v4108_v55 }
 0x270   : > { %v3520_v1 = vpop.f32.mrf.mxu0  ;;  %v3593_v2 = vpop.f32.mrf.mxu1 }
 0x271   : > { %v8144_v5 = vadd.f32 %v3593_v2, %v3481_v46  ;;  %v3521_v49 = vadd.f32 %v3520_v1, %v8110_v53 }
 0x272   : > { %v3522_v21 = vpop.f32.mrf.mxu0  ;;  %v3595_v27 = vpop.f32.mrf.mxu1 }
 0x273   : > { %v8148_v60 = vadd.f32 %v3595_v27, %v3483_v62  ;;  %v3523_v20 = vadd.f32 %v3522_v21, %v8115_v6 }
 0x274   : > { %v3524_v23 = vpop.f32.mrf.mxu0  ;;  %v3597_v45 = vpop.f32.mrf.mxu1 }
 0x275   : > { %v8150_v14 = vadd.f32 %v3597_v45, %v3485_v15  ;;  %v3525_v22 = vadd.f32 %v3524_v23, %v8110_v53 }
 0x276   : > { %v8152_v13 = vpop.f32.mrf.mxu0  ;;  %v8154_v26 = vpop.f32.mrf.mxu1 }
 0x278   : > { %v3530_v12 = vpop.f32.mrf.mxu0  ;;  %v3603_v40 = vpop.f32.mrf.mxu1 }
 0x279   : > { %v8160_v58 = vadd.f32 %v3603_v40, %v3491_v57 }
 0x27a   : > { %v3532_v63 = vpop.f32.mrf.mxu0  ;;  %v3605_v44 = vpop.f32.mrf.mxu1 }
 0x27b   : > { %v8164_v56 = vadd.f32 %v3605_v44, %v3493_v36 }
 0x27c   : > { %v3534_v50 = vpop.f32.mrf.mxu0  ;;  %v3607_v28 = vpop.f32.mrf.mxu1 }
 0x27d   : > { %v8166_v43 = vadd.f32 %v3607_v28, %v3495_v0 }
 0x27e   : > { %v8168_v59 = vpop.f32.mrf.mxu0  ;;  %v8170_v47 = vpop.f32.mrf.mxu1 }
 0x27f   : > { %8639 = vst [vmem:[#allocation18_spill] sm:$0xff] %v8168_v59 }
 0x280   : > { %v3540_v35 = vpop.f32.mrf.mxu0  ;;  %v3613_v54 = vpop.f32.mrf.mxu1 }
 0x281   : > { %v8176_v61 = vadd.f32 %v3613_v54, %v3501_v52 }
 0x282   : > { %v3542_v19 = vpop.f32.mrf.mxu0  ;;  %v3615_v18 = vpop.f32.mrf.mxu1 }
 0x283   : > { %v8180_v9 = vadd.f32 %v3615_v18, %v3503_v8  ;;  %v3531_v18 = vadd.f32 %v3530_v12, %v8110_v53 }
 0x284   : > { %v3544_v38 = vpop.f32.mrf.mxu0  ;;  %v3617_v11 = vpop.f32.mrf.mxu1 }
 0x285   : > { %v8182_v41 = vadd.f32 %v3617_v11, %v3505_v51  ;;  %v3533_v11 = vadd.f32 %v3532_v63, %v8115_v6  ;;  %v3541_v63 = vadd.f32 %v3540_v35, %v8110_v53 }
 0x286   : > { %v8184_v55 = vpop.f32.mrf.mxu0  ;;  %v8186_v24 = vpop.f32.mrf.mxu1 }
 0x287   : > { %8640 = vst [vmem:[#allocation22_spill] sm:$0xff] %v8184_v55 }
 0x288   : > { %v3623_v31 = vpop.f32.mrf.mxu1 }
 0x289   : > { %v8191_v39 = vadd.f32 %v3623_v31, %v3511_v32  ;;  %v3696_v29 = vpop.f32.mrf.mxu0 }
 0x28a   : > { %v3625_v10 = vpop.f32.mrf.mxu1 }
 0x28b   : > { %v8194_v16 = vadd.f32 %v3625_v10, %v3513_v33  ;;  %v3698_v46 = vpop.f32.mrf.mxu0  ;;  %v3535_v33 = vadd.f32 %v3534_v50, %v8110_v53 }
 0x28c   : > { %v3627_v2 = vpop.f32.mrf.mxu1 }
 0x28d   : > { %v8196_v62 = vadd.f32 %v3627_v2, %v3515_v34  ;;  %v3700_v27 = vpop.f32.mrf.mxu0 }
 0x28e   : > { %v8198_v15 = vpop.f32.mrf.mxu1 }
 0x28f   : > { %v3702_v45 = vpop.f32.mrf.mxu0 }
 0x290   : > { %v3633_v57 = vpop.f32.mrf.mxu1 }
 0x291   : > { %v8202_v40 = vadd.f32 %v3633_v57, %v3521_v49  ;;  %v3706_v36 = vpop.f32.mrf.mxu0 }
 0x292   : > { %v3635_v44 = vpop.f32.mrf.mxu1 }
 0x293   : > { %v8205_v0 = vadd.f32 %v3635_v44, %v3523_v20  ;;  %v8207_v28 = vpop.f32.mrf.mxu0 }
 0x294   : > { %v3637_v52 = vpop.f32.mrf.mxu1 }
 0x295   : > { %v8209_v54 = vadd.f32 %v3637_v52, %v3525_v22  ;;  %v8211_v8 = vpop.f32.mrf.mxu0  ;;  %v3543_v22 = vadd.f32 %v3542_v19, %v8115_v6  ;;  %v3697_v19 = vadd.f32 %v3696_v29, %v8128_v17 }
 0x296   : > { %v8213_v1 = vpop.f32.mrf.mxu1 }
 0x297   : > { %v8216_v21 = vpop.f32.mrf.mxu0 }
 0x298   : > { %v3643_v51 = vpop.f32.mrf.mxu1 }
 0x299   : > { %v8219_v32 = vadd.f32 %v3643_v51, %v3531_v18  ;;  %v8221_v23 = vpop.f32.mrf.mxu0  ;;  %v3545_v51 = vadd.f32 %v3544_v38, %v8110_v53  ;;  %v3477_v53 = vadd.f32 %v8056_v42, %v8115_v6  ;;  %v3699_v38 = vadd.f32 %v3698_v46, %v8132_v7 }
 0x29a   : > { %v3645_v31 = vpop.f32.mrf.mxu1  ;;  %v3707_v42 = vadd.f32 %v3706_v36, %v8144_v5  ;;  %v3487_v46 = vadd.f32 %v8074_v37, %v8115_v6  ;;  %v3711_v37 = vadd.f32 %v8211_v8, %v8150_v14  ;;  %v6241_v14 = vld [vmem:[%s8537_s7 + $0x78] sm:$0xff]   ;;  %v6243_v8 = vld [vmem:[%s8537_s7 + $0x70] sm:$0xff]  }
 0x29b   : > { %v8224_v10 = vadd.f32 %v3645_v31, %v3533_v11  ;;  %v8226_v34 = vpop.f32.mrf.mxu0  ;;  %5660 = vmatprep.subr.bf16.mxu0 %v6241_v14 }
 0x29c   : > { %v3647_v2 = vpop.f32.mrf.mxu1  ;;  %v3600_v36 = vadd.f32 %v8154_v26, %v3487_v46  ;;  %v3719_v46 = vadd.f32 %v8226_v34, %v8164_v56 }
 0x29d   : > { %8641 = vst [vmem:[#allocation21_spill] sm:$0xff] %v8224_v10  ;;  %v8228_v49 = vadd.f32 %v3647_v2, %v3535_v33  ;;  %v8230_v12 = vpop.f32.mrf.mxu0 }
 0x29e   : > { %v8232_v57 = vpop.f32.mrf.mxu1  ;;  %v3721_v56 = vadd.f32 %v8230_v12, %v8166_v43  ;;  %v6246_v43 = vld [vmem:[%s8537_s7 + $0x28] sm:$0xff]  }
 0x29f   : > { %8642 = vst [vmem:[#allocation23_spill] sm:$0xff] %v8228_v49  ;;  %8643 = vst [vmem:[#allocation24_spill] sm:$0xff] %v8232_v57  ;;  %v8235_v20 = vpop.f32.mrf.mxu0 }
 0x2a0   : > { %v3653_v44 = vpop.f32.mrf.mxu1 }
 0x2a1   : > { %v8238_v52 = vadd.f32 %v3653_v44, %v3541_v63  ;;  %v8240_v50 = vpop.f32.mrf.mxu0 }
 0x2a2   : > { %v3655_v18 = vpop.f32.mrf.mxu1 }
 0x2a3   : > { %8644 = vst [vmem:[#allocation26_spill] sm:$0xff] %v8238_v52  ;;  %v8243_v11 = vadd.f32 %v3655_v18, %v3543_v22  ;;  %v8245_v31 = vpop.f32.mrf.mxu0 }
 0x2a4   : > { %v3657_v33 = vpop.f32.mrf.mxu1 }
 0x2a5   : > { %8645 = vst [vmem:[#allocation25_spill] sm:$0xff] %v8243_v11  ;;  %v8247_v2 = vadd.f32 %v3657_v33, %v3545_v51  ;;  %v8249_v35 = vpop.f32.mrf.mxu0  ;;  %v3590_v33 = vadd.f32 %v8138_v3, %v3477_v53 }
 0x2a6   : > { %v8251_v55 = vpop.f32.mrf.mxu1 }
 0x2a7   : > { %8646 = vst [vmem:[#allocation27_spill] sm:$0xff] %v8247_v2  ;;  %8647 = vst [vmem:[#allocation28_spill] sm:$0xff] %v8251_v55  ;;  %v8253_v49 = vpop.f32.mrf.mxu0  ;;  %v3701_v2 = vadd.f32 %v3700_v27, %v8134_v30  ;;  %v3703_v52 = vadd.f32 %v3702_v45, %v3590_v33  ;;  %v3709_v45 = vadd.f32 %v8207_v28, %v8148_v60 }
 0x2a9   : > { %v8256_v63 = vpop.f32.mrf.mxu0  ;;  %v3809_v44 = vpop.f32.mrf.mxu1 }
 0x2aa   : > { %v3810_v22 = vadd.f32 %v3809_v44, %v3697_v19 }
 0x2ab   : > { %v8261_v18 = vpop.f32.mrf.mxu0  ;;  %v3811_v51 = vpop.f32.mrf.mxu1 }
 0x2ac   : > { %v3812_v55 = vadd.f32 %v3811_v51, %v3699_v38  ;;  %v3954_v17 = vmul.f32 0.01, %v3810_v22  ;;  %vm3890_vm3 = vcmp.gt.f32.partialorder %v3810_v22, 0.0 }
 0x2ad   : > { %v3813_v11 = vpop.f32.mrf.mxu1  ;;  %v8265_v29 = vpop.f32.mrf.mxu0 }
 0x2ae   : > { %v3814_v57 = vadd.f32 %v3813_v11, %v3701_v2  ;;  %v3955_v19 = vmul.f32 0.01, %v3812_v55  ;;  %vm3891_vm5 = vcmp.gt.f32.partialorder %v3812_v55, 0.0  ;;  %v4018_v11 = vsel %vm3890_vm3, %v3810_v22, %v3954_v17 }
 0x2af   : > { %v3815_v10 = vpop.f32.mrf.mxu1  ;;  %v8272_v53 = vpop.f32.mrf.mxu0 }
 0x2b0   : > { %v3816_v7 = vadd.f32 %v3815_v10, %v3703_v52  ;;  %vm3894_vm4 = vcmp.gt.f32.partialorder %v3814_v57, 0.0  ;;  %v3958_v3 = vmul.f32 0.01, %v3814_v57  ;;  %v4019_v51 = vsel %vm3891_vm5, %v3812_v55, %v3955_v19  ;;  %v6242_v55 = vld [vmem:[%s8537_s7 + $0x38] sm:$0xff]  }
 0x2b1   : > { %v3819_v44 = vpop.f32.mrf.mxu1  ;;  %v8278_v28 = vpop.f32.mrf.mxu0  ;;  %5661 = vmatpush3.bf16.msra.mxu0 %v6242_v55 }
 0x2b2   : > { %vm3895_vm6 = vcmp.gt.f32.partialorder %v3816_v7, 0.0  ;;  %v3959_v30 = vmul.f32 0.01, %v3816_v7  ;;  %v3820_v27 = vadd.f32 %v3819_v44, %v3707_v42  ;;  %v4022_v2 = vsel %vm3894_vm4, %v3814_v57, %v3958_v3  ;;  %5662 = vmatprep.subr.bf16.mxu0 %v6243_v8 }
 0x2b3   : > { %v3821_v5 = vpop.f32.mrf.mxu1  ;;  %v4082_v10 = vpack.c.bf16 %v4022_v2, %v4018_v11  ;;  %v3713_v42 = vadd.f32 %v8216_v21, %v3600_v36  ;;  %v3497_v21 = vadd.f32 %v8092_v4, %v8115_v6  ;;  %v8297_v2 = vpop.f32.mrf.mxu0 }
 0x2b4   : > { %v3822_v52 = vadd.f32 %v3821_v5, %v3709_v45  ;;  %v4023_v33 = vsel %vm3895_vm6, %v3816_v7, %v3959_v30  ;;  %v3962_v44 = vmul.f32 0.01, %v3820_v27  ;;  %vm3898_vm7 = vcmp.gt.f32.partialorder %v3820_v27, 0.0 }
 0x2b5   : > { %v3823_v38 = vpop.f32.mrf.mxu1  ;;  %v4083_v60 = vpack.c.bf16 %v4023_v33, %v4019_v51  ;;  %v3717_v7 = vadd.f32 %v8221_v23, %v8160_v58  ;;  %v3610_v11 = vadd.f32 %v8170_v47, %v3497_v21  ;;  %v6244_v58 = vld [vmem:[%s8537_s7 + $0x30] sm:$0xff]   ;;  %v6245_v47 = vld [vmem:[%s8537_s7 + $0x68] sm:$0xff]   ;;  %v8309_v33 = vpop.f32.mrf.mxu0 }
 0x2b6   : > { %v3824_v59 = vadd.f32 %v3823_v38, %v3711_v37  ;;  %v3963_v57 = vmul.f32 0.01, %v3822_v52  ;;  %vm3899_vm9 = vcmp.gt.f32.partialorder %v3822_v52, 0.0  ;;  %v4026_v3 = vsel %vm3898_vm7, %v3820_v27, %v3962_v44  ;;  %5663 = vmatpush3.bf16.msra.mxu0 %v6244_v58 }
 0x2b7   : > { %v3825_v22 = vpop.f32.mrf.mxu1  ;;  %4653 = vmatprep.mubr.bf16.mxu1 %v4083_v60  ;;  %5664 = vmatprep.subr.bf16.mxu0 %v6245_v47  ;;  %v3507_v60 = vadd.f32 %v8120_v25, %v8115_v6  ;;  %v8325_v21 = vpop.f32.mrf.mxu0 }
 0x2b8   : > { %vm3902_vm8 = vcmp.gt.f32.partialorder %v3824_v59, 0.0  ;;  %v3966_v26 = vmul.f32 0.01, %v3824_v59  ;;  %v3826_v17 = vadd.f32 %v3825_v22, %v3713_v42  ;;  %4654 = vmatmul.mubr.bf16.vlgmr.msra.gmra.mxu1 %v4082_v10  ;;  %v3723_v10 = vadd.f32 %v8235_v20, %v3610_v11  ;;  %v6247_v20 = vld [vmem:[%s8537_s7 + $0x60] sm:$0xff]  }
 0x2b9   : > { %v3829_v19 = vpop.f32.mrf.mxu1  ;;  %v3729_v22 = vadd.f32 %v8245_v31, %v8180_v9  ;;  %v3620_v8 = vadd.f32 %v8186_v24, %v3507_v60  ;;  %v3731_v9 = vadd.f32 %v8249_v35, %v8182_v41  ;;  %v6249_v24 = vld [vmem:[%s8537_s7 + $0x58] sm:$0xff]   ;;  %v8339_v41 = vpop.f32.mrf.mxu0 }
 0x2ba   : > { %v4030_v30 = vsel %vm3902_vm8, %v3824_v59, %v3966_v26  ;;  %vm3903_vm10 = vcmp.gt.f32.partialorder %v3826_v17, 0.0  ;;  %v3967_v45 = vmul.f32 0.01, %v3826_v17  ;;  %v3830_v5 = vadd.f32 %v3829_v19, %v3717_v7  ;;  %5665 = vmatpush3.bf16.msra.mxu0 %v6246_v43 }
 0x2bb   : > { %v4086_v4 = vpack.c.bf16 %v4030_v30, %v4026_v3  ;;  %v3831_v36 = vpop.f32.mrf.mxu1  ;;  %v4027_v59 = vsel %vm3899_vm9, %v3822_v52, %v3963_v57  ;;  %v3727_v57 = vadd.f32 %v8240_v50, %v8176_v61  ;;  %v6248_v61 = vld [vmem:[%s8537_s7 + $0x20] sm:$0xff]   ;;  %5666 = vmatprep.subr.bf16.mxu0 %v6247_v20  ;;  %v3733_v11 = vadd.f32 %v8253_v49, %v3620_v8  ;;  %v6251_v49 = vld [vmem:[%s8537_s7 + $0x50] sm:$0xff]  }
 0x2bc   : > { %v3832_v23 = vadd.f32 %v3831_v36, %v3719_v46  ;;  %v4031_v34 = vsel %vm3903_vm10, %v3826_v17, %v3967_v45  ;;  %v3970_v38 = vmul.f32 0.01, %v3830_v5  ;;  %vm3906_vm11 = vcmp.gt.f32.partialorder %v3830_v5, 0.0  ;;  %v6250_v36 = vld [vmem:[%s8537_s7 + $0x18] sm:$0xff]  }
 0x2bd   : > { %v3833_v27 = vpop.f32.mrf.mxu1  ;;  %v4087_v37 = vpack.c.bf16 %v4031_v34, %v4027_v59 }
 0x2be   : > { %v3834_v51 = vadd.f32 %v3833_v27, %v3721_v56  ;;  %v3971_v12 = vmul.f32 0.01, %v3832_v23  ;;  %vm3907_vm13 = vcmp.gt.f32.partialorder %v3832_v23, 0.0  ;;  %v4034_v17 = vsel %vm3906_vm11, %v3830_v5, %v3970_v38  ;;  %5667 = vmatpush3.bf16.msra.mxu0 %v6248_v61  ;;  %v3758_v38 = vpop.f32.mrf.mxu0 }
 0x2bf   : > { %v3835_v42 = vpop.f32.mrf.mxu1  ;;  %4663 = vmatprep.mubr.bf16.mxu1 %v4087_v37  ;;  %v3737_v5 = vadd.f32 %v8256_v63, %v8191_v39  ;;  %5668 = vmatprep.subr.bf16.mxu0 %v6249_v24  ;;  %v3517_v39 = vadd.f32 %v8136_v48, %v8115_v6  ;;  %v3739_v63 = vadd.f32 %v8261_v18, %v8194_v16  ;;  %v6252_v48 = vld [vmem:[%s8537_s7 + $0x10] sm:$0xff]  }
 0x2c0   : > { %vm3910_vm12 = vcmp.gt.f32.partialorder %v3834_v51, 0.0  ;;  %v3974_v52 = vmul.f32 0.01, %v3834_v51  ;;  %v3836_v44 = vadd.f32 %v3835_v42, %v3723_v10  ;;  %4664 = vmatmul.mubr.bf16.gmra.mxu1 %v4086_v4  ;;  %v4035_v31 = vsel %vm3907_vm13, %v3832_v23, %v3971_v12 }
 0x2c1   : > { %v3839_v26 = vpop.f32.mrf.mxu1  ;;  %v3630_v10 = vadd.f32 %v8198_v15, %v3517_v39  ;;  %v3741_v16 = vadd.f32 %v8265_v29, %v8196_v62 }
 0x2c2   : > { %v4038_v14 = vsel %vm3910_vm12, %v3834_v51, %v3974_v52  ;;  %vm3911_vm14 = vcmp.gt.f32.partialorder %v3836_v44, 0.0  ;;  %v3975_v55 = vmul.f32 0.01, %v3836_v44  ;;  %v3840_v25 = vadd.f32 %v3839_v26, %v3727_v57  ;;  %5669 = vmatpush3.bf16.msra.mxu0 %v6250_v36  ;;  %v6253_v52 = vld [vmem:[%s8537_s7 + $0x48] sm:$0xff]   ;;  %v3760_v26 = vpop.f32.mrf.mxu0 }
 0x2c3   : > { %v4090_v7 = vpack.c.bf16 %v4038_v14, %v4034_v17  ;;  %v3841_v46 = vpop.f32.mrf.mxu1  ;;  %5670 = vmatprep.subr.bf16.mxu0 %v6251_v49  ;;  %v3743_v60 = vadd.f32 %v8272_v53, %v3630_v10  ;;  %v3749_v53 = vadd.f32 %v8297_v2, %v8205_v0 }
 0x2c4   : > { %v3842_v50 = vadd.f32 %v3841_v46, %v3729_v22  ;;  %v4039_v19 = vsel %vm3911_vm14, %v3836_v44, %v3975_v55  ;;  %v3978_v3 = vmul.f32 0.01, %v3840_v25  ;;  %vm3914_vm15 = vcmp.gt.f32.partialorder %v3840_v25, 0.0  ;;  %v3762_v61 = vpop.f32.mrf.mxu0 }
 0x2c5   : > { %v3843_v30 = vpop.f32.mrf.mxu1  ;;  %v4091_v45 = vpack.c.bf16 %v4039_v19, %v4035_v31  ;;  %v3747_v22 = vadd.f32 %v8278_v28, %v8202_v40  ;;  %v3527_v55 = vadd.f32 %v8152_v13, %v8115_v6  ;;  %v3751_v31 = vadd.f32 %v8309_v33, %v8209_v54  ;;  %v8648_v33 = vld [vmem:[#allocation18_spill] sm:$0xff] }
 0x2c6   : > { %v3844_v4 = vadd.f32 %v3843_v30, %v3731_v9  ;;  %v3979_v58 = vmul.f32 0.01, %v3842_v50  ;;  %v4042_v59 = vsel %vm3914_vm15, %v3840_v25, %v3978_v3  ;;  %vm3915_vm1 = vcmp.gt.f32.partialorder %v3842_v50, 0.0  ;;  %5671 = vmatpush3.bf16.msra.mxu0 %v6252_v48 }
 0x2c7   : > { %v3845_v35 = vpop.f32.mrf.mxu1  ;;  %4673 = vmatprep.mubr.bf16.mxu1 %v4091_v45  ;;  %5672 = vmatprep.subr.bf16.mxu0 %v6253_v52  ;;  %v3640_v46 = vadd.f32 %v8213_v1, %v3527_v55  ;;  %v3766_v1 = vpop.f32.mrf.mxu0  ;;  %v3537_v36 = vadd.f32 %v8648_v33, %v8115_v6 }
 0x2c8   : > { %vm3918_vm0 = vcmp.gt.f32.partialorder %v3844_v4, 0.0  ;;  %v3982_v56 = vmul.f32 0.01, %v3844_v4  ;;  %v3846_v23 = vadd.f32 %v3845_v35, %v3733_v11  ;;  %4674 = vmatmul.mubr.bf16.gmra.mxu1 %v4090_v7  ;;  %v4043_v43 = vsel %vm3915_vm1, %v3842_v50, %v3979_v58  ;;  %v8649_v58 = vld [vmem:[#allocation21_spill] sm:$0xff] }
 0x2c9   : > { %v3849_v34 = vpop.f32.mrf.mxu1  ;;  %v3753_v30 = vadd.f32 %v8325_v21, %v3640_v46  ;;  %v3757_v11 = vadd.f32 %v8339_v41, %v8219_v32  ;;  %v8650_v41 = vld [vmem:[#allocation24_spill] sm:$0xff] }
 0x2ca   : > { %v4046_v47 = vsel %vm3918_vm0, %v3844_v4, %v3982_v56  ;;  %vm3919_vm2 = vcmp.gt.f32.partialorder %v3846_v23, 0.0  ;;  %v3983_v27 = vmul.f32 0.01, %v3846_v23  ;;  %v3850_v37 = vadd.f32 %v3849_v34, %v3737_v5 }
 0x2cb   : > { %v4094_v51 = vpack.c.bf16 %v4046_v47, %v4042_v59  ;;  %v3851_v42 = vpop.f32.mrf.mxu1  ;;  %v3759_v56 = vadd.f32 %v3758_v38, %v8649_v58  ;;  %v3768_v59 = vpop.f32.mrf.mxu0  ;;  %v6254_v58 = vld [vmem:[%s8537_s7 + $0x8] sm:$0xff]  }
 0x2cc   : > { %v3852_v18 = vadd.f32 %v3851_v42, %v3739_v63  ;;  %v4047_v12 = vsel %vm3919_vm2, %v3846_v23, %v3983_v27  ;;  %v3986_v15 = vmul.f32 0.01, %v3850_v37  ;;  %vm3922_vm3 = vcmp.gt.f32.partialorder %v3850_v37, 0.0  ;;  %v8651_v27 = vld [vmem:[#allocation23_spill] sm:$0xff]  ;;  %5673 = vmatpush3.bf16.msra.mxu0 %v6254_v58 }
 0x2cd   : > { %v3853_v44 = vpop.f32.mrf.mxu1  ;;  %v4095_v20 = vpack.c.bf16 %v4047_v12, %v4043_v43  ;;  %v3650_v63 = vadd.f32 %v8650_v41, %v3537_v36  ;;  %v8652_v12 = vld [vmem:[#allocation26_spill] sm:$0xff] }
 0x2ce   : > { %v3854_v57 = vadd.f32 %v3853_v44, %v3741_v16  ;;  %v3987_v29 = vmul.f32 0.01, %v3852_v18  ;;  %v4050_v8 = vsel %vm3922_vm3, %v3850_v37, %v3986_v15  ;;  %vm3923_vm5 = vcmp.gt.f32.partialorder %v3852_v18, 0.0  ;;  %v3770_v15 = vpop.f32.mrf.mxu0 }
 0x2cf   : > { %v3855_v62 = vpop.f32.mrf.mxu1  ;;  %4683 = vmatprep.mubr.bf16.mxu1 %v4095_v20  ;;  %v3761_v37 = vadd.f32 %v3760_v26, %v8651_v27  ;;  %v3767_v52 = vadd.f32 %v3766_v1, %v8652_v12  ;;  %v8658_v12 = vld [vmem:[#allocation9_spill] sm:$0xff] }
 0x2d0   : > { %vm3926_vm4 = vcmp.gt.f32.partialorder %v3854_v57, 0.0  ;;  %v3990_v17 = vmul.f32 0.01, %v3854_v57  ;;  %v3856_v14 = vadd.f32 %v3855_v62, %v3743_v60  ;;  %4684 = vmatmul.mubr.bf16.gmra.mxu1 %v4094_v51  ;;  %v4051_v19 = vsel %vm3923_vm5, %v3852_v18, %v3987_v29  ;;  %v8654_v62 = vld [vmem:[#allocation25_spill] sm:$0xff] }
 0x2d1   : > { %v3859_v7 = vpop.f32.mrf.mxu1  ;;  %v3763_v18 = vadd.f32 %v3762_v61, %v3650_v63  ;;  %v3769_v29 = vadd.f32 %v3768_v59, %v8654_v62  ;;  %v8656_v61 = vld [vmem:[#allocation27_spill] sm:$0xff] }
 0x2d2   : > { %v4054_v40 = vsel %vm3926_vm4, %v3854_v57, %v3990_v17  ;;  %vm3927_vm6 = vcmp.gt.f32.partialorder %v3856_v14, 0.0  ;;  %v3991_v28 = vmul.f32 0.01, %v3856_v14  ;;  %v3860_v25 = vadd.f32 %v3859_v7, %v3747_v22  ;;  %v8653_v22 = vld [vmem:[#allocation22_spill] sm:$0xff]  ;;  %v8655_v7 = vld [vmem:[#allocation28_spill] sm:$0xff] }
 0x2d3   : > { %v4098_v9 = vpack.c.bf16 %v4054_v40, %v4050_v8  ;;  %v3861_v50 = vpop.f32.mrf.mxu1  ;;  %v3547_v26 = vadd.f32 %v8653_v22, %v8115_v6 }
 0x2d4   : > { %v3862_v13 = vadd.f32 %v3861_v50, %v3749_v53  ;;  %v4055_v24 = vsel %vm3927_vm6, %v3856_v14, %v3991_v28  ;;  %v3994_v0 = vmul.f32 0.01, %v3860_v25  ;;  %vm3930_vm7 = vcmp.gt.f32.partialorder %v3860_v25, 0.0  ;;  %v3772_v28 = vpop.f32.mrf.mxu0 }
 0x2d5   : > { %v3863_v2 = vpop.f32.mrf.mxu1  ;;  %v4099_v3 = vpack.c.bf16 %v4055_v24, %v4051_v19  ;;  %v3660_v40 = vadd.f32 %v8655_v7, %v3547_v26 }
 0x2d6   : > { %v3864_v45 = vadd.f32 %v3863_v2, %v3751_v31  ;;  %v3995_v5 = vmul.f32 0.01, %v3862_v13  ;;  %v4058_v23 = vsel %vm3930_vm7, %v3860_v25, %v3994_v0  ;;  %vm3931_vm9 = vcmp.gt.f32.partialorder %v3862_v13, 0.0 }
 0x2d7   : > { %v3865_v4 = vpop.f32.mrf.mxu1  ;;  %4693 = vmatprep.mubr.bf16.mxu1 %v4099_v3  ;;  %v3773_v24 = vadd.f32 %v3772_v28, %v3660_v40 }
 0x2d8   : > { %vm3934_vm8 = vcmp.gt.f32.partialorder %v3864_v45, 0.0  ;;  %v3998_v35 = vmul.f32 0.01, %v3864_v45  ;;  %v3866_v54 = vadd.f32 %v3865_v4, %v3753_v30  ;;  %4694 = vmatmul.mubr.bf16.gmra.mxu1 %v4098_v9  ;;  %v4059_v51 = vsel %vm3931_vm9, %v3862_v13, %v3995_v5 }
 0x2d9   : > { %v3869_v21 = vpop.f32.mrf.mxu1  ;;  %v3771_v9 = vadd.f32 %v3770_v15, %v8656_v61 }
 0x2da   : > { %v4062_v49 = vsel %vm3934_vm8, %v3864_v45, %v3998_v35  ;;  %vm3935_vm10 = vcmp.gt.f32.partialorder %v3866_v54, 0.0  ;;  %v3999_v39 = vmul.f32 0.01, %v3866_v54  ;;  %v3870_v32 = vadd.f32 %v3869_v21, %v3757_v11 }
 0x2db   : > { %v4102_v34 = vpack.c.bf16 %v4062_v49, %v4058_v23  ;;  %v3871_v47 = vpop.f32.mrf.mxu1  ;;  %v6256_v23 = vld [vmem:[%s8537_s7] sm:$0xff]  }
 0x2dc   : > { %v3872_v10 = vadd.f32 %v3871_v47, %v3759_v56  ;;  %v4063_v42 = vsel %vm3935_vm10, %v3866_v54, %v3999_v39  ;;  %v4002_v48 = vmul.f32 0.01, %v3870_v32  ;;  %vm3938_vm11 = vcmp.gt.f32.partialorder %v3870_v32, 0.0  ;;  %v6255_v56 = vld [vmem:[%s8537_s7 + $0x40] sm:$0xff]  }
 0x2dd   : > { %v3873_v38 = vpop.f32.mrf.mxu1  ;;  %v4103_v16 = vpack.c.bf16 %v4063_v42, %v4059_v51  ;;  %5674 = vmatprep.subr.bf16.mxu0 %v6255_v56 }
 0x2de   : > { %v3874_v43 = vadd.f32 %v3873_v38, %v3761_v37  ;;  %v4003_v20 = vmul.f32 0.01, %v3872_v10  ;;  %v4066_v17 = vsel %vm3938_vm11, %v3870_v32, %v4002_v48  ;;  %vm3939_vm13 = vcmp.gt.f32.partialorder %v3872_v10, 0.0  ;;  %5675 = vmatpush3.bf16.msra.mxu0 %v6256_v23 }
 0x2df   : > { %v3875_v44 = vpop.f32.mrf.mxu1  ;;  %4703 = vmatprep.mubr.bf16.mxu1 %v4103_v16  ;;  %v4176_v16 = vld [vmem:[%s8536_s6] sm:$0x3] }
 0x2e0   : > { %vm3942_vm12 = vcmp.gt.f32.partialorder %v3874_v43, 0.0  ;;  %v4006_v60 = vmul.f32 0.01, %v3874_v43  ;;  %v3876_v57 = vadd.f32 %v3875_v44, %v3763_v18  ;;  %4704 = vmatmul.mubr.bf16.gmra.mxu1 %v4102_v34  ;;  %v4067_v31 = vsel %vm3939_vm13, %v3872_v10, %v4003_v20  ;;  %v8657_v18 = vld [vmem:[#allocation10_spill] sm:$0xff] }
 0x2e1   : > { %v3879_v14 = vpop.f32.mrf.mxu1 }
 0x2e2   : > { %v4070_v55 = vsel %vm3942_vm12, %v3874_v43, %v4006_v60  ;;  %vm3943_vm14 = vcmp.gt.f32.partialorder %v3876_v57, 0.0  ;;  %v4007_v53 = vmul.f32 0.01, %v3876_v57  ;;  %v3880_v8 = vadd.f32 %v3879_v14, %v3767_v52 }
 0x2e3   : > { %v4106_v25 = vpack.c.bf16 %v4070_v55, %v4066_v17  ;;  %v3881_v46 = vpop.f32.mrf.mxu1  ;;  %v8412_v43 = vrot.slane %v4176_v16, %v8657_v18  ;;  %v8415_v52 = vrot.slane %v4176_v16, %v8658_v12 }
 0x2e4   : > { %v3882_v50 = vadd.f32 %v3881_v46, %v3769_v29  ;;  %v4071_v6 = vsel %vm3943_vm14, %v3876_v57, %v4007_v53  ;;  %v4010_v0 = vmul.f32 0.01, %v3880_v8  ;;  %vm3946_vm15 = vcmp.gt.f32.partialorder %v3880_v8, 0.0 }
 0x2e5   : > { %v3883_v13 = vpop.f32.mrf.mxu1  ;;  %v4107_v19 = vpack.c.bf16 %v4071_v6, %v4067_v31 }
 0x2e6   : > { %v3884_v2 = vadd.f32 %v3883_v13, %v3771_v9  ;;  %v4011_v30 = vmul.f32 0.01, %v3882_v50  ;;  %vm3947_vm1 = vcmp.gt.f32.partialorder %v3882_v50, 0.0  ;;  %v4074_v1 = vsel %vm3946_vm15, %v3880_v8, %v4010_v0 }
 0x2e7   : > { %v3885_v3 = vpop.f32.mrf.mxu1  ;;  %4713 = vmatprep.mubr.bf16.mxu1 %v4107_v19 }
 0x2e8   : > { %vm3950_vm0 = vcmp.gt.f32.partialorder %v3884_v2, 0.0  ;;  %v4014_v45 = vmul.f32 0.01, %v3884_v2  ;;  %v3886_v11 = vadd.f32 %v3885_v3, %v3773_v24  ;;  %4714 = vmatmul.mubr.bf16.gmra.mxu1 %v4106_v25  ;;  %v4075_v54 = vsel %vm3947_vm1, %v3882_v50, %v4011_v30 }
 0x2ea   : > { %v4078_v4 = vsel %vm3950_vm0, %v3884_v2, %v4014_v45  ;;  %vm3951_vm2 = vcmp.gt.f32.partialorder %v3886_v11, 0.0  ;;  %v4015_v5 = vmul.f32 0.01, %v3886_v11 }
 0x2eb   : > { %v4110_v35 = vpack.c.bf16 %v4078_v4, %v4074_v1 }
 0x2ec   : > { %v4079_v33 = vsel %vm3951_vm2, %v3886_v11, %v4015_v5 }
 0x2ed   : > { %v4111_v36 = vpack.c.bf16 %v4079_v33, %v4075_v54 }
 0x2ef   : > { %4723 = vmatprep.mubr.bf16.mxu1 %v4111_v36 }
 0x2f0   : > { %4724 = vmatmul.mubr.bf16.gmra.mxu1 %v4110_v35 }
 0x2f5   : > { %v4542_v21 = vpop.f32.mrf.mxu0 }
 0x2f6   : > { %v4543_v60 = vadd.f32 %v4542_v21, %v8415_v52 }
 0x2f7   : > { %v4544_v49 = vpop.f32.mrf.mxu0 }
 0x2f8   : > { %v4545_v20 = vadd.f32 %v4544_v49, %v8412_v43 }
 0x2f9   : > { %v4546_v39 = vpop.f32.mrf.mxu0 }
 0x2fa   : > { %v4547_v26 = vadd.f32 %v4546_v39, %v8415_v52 }
 0x2fb   : > { %v4548_v32 = vpop.f32.mrf.mxu0 }
 0x2fc   : > { %v4549_v14 = vadd.f32 %v4548_v32, %v8412_v43 }
 0x2fd   : > { %v4552_v41 = vpop.f32.mrf.mxu0 }
 0x2fe   : > { %v4553_v50 = vadd.f32 %v4552_v41, %v8415_v52 }
 0x2ff   : > { %v4554_v63 = vpop.f32.mrf.mxu0 }
 0x300   : > { %v4555_v61 = vadd.f32 %v4554_v63, %v8412_v43 }
 0x301   : > { %v4556_v59 = vpop.f32.mrf.mxu0 }
 0x302   : > { %v4557_v19 = vadd.f32 %v4556_v59, %v8415_v52 }
 0x303   : > { %v4558_v34 = vpop.f32.mrf.mxu0 }
 0x304   : > { %v4559_v1 = vadd.f32 %v4558_v34, %v8412_v43 }
 0x307   : > { %v8394_v47 = vpop.f32.mrf.mxu0 }
 0x308   : > { %v4563_v39 = vadd.f32 %v8394_v47, %v8415_v52 }
 0x309   : > { %v4564_v27 = vpop.f32.mrf.mxu0 }
 0x30a   : > { %v4565_v21 = vadd.f32 %v4564_v27, %v8412_v43 }
 0x30b   : > { %v8396_v37 = vpop.f32.mrf.mxu0 }
 0x30c   : > { %v4567_v59 = vadd.f32 %v8396_v37, %v8415_v52 }
 0x30d   : > { %v8398_v10 = vpop.f32.mrf.mxu0 }
 0x30f   : > { %v8400_v51 = vpop.f32.mrf.mxu0 }
 0x311   : > { %v8402_v42 = vpop.f32.mrf.mxu0 }
 0x313   : > { %v8404_v48 = vpop.f32.mrf.mxu0 }
 0x315   : > { %v8406_v38 = vpop.f32.mrf.mxu0 }
 0x317   : > { %v8417_v15 = vpop.f32.mrf.mxu0 }
 0x319   : > { %v8421_v57 = vpop.f32.mrf.mxu0 }
 0x31b   : > { %v8425_v53 = vpop.f32.mrf.mxu0 }
 0x31d   : > { %v8429_v31 = vpop.f32.mrf.mxu0 }
 0x31f   : > { %v8433_v35 = vpop.f32.mrf.mxu0 }
 0x321   : > { %v8438_v32 = vpop.f32.mrf.mxu0 }
 0x323   : > { %v8444_v47 = vpop.f32.mrf.mxu0 }
 0x378   : > { %v4655_v44 = vpop.f32.mrf.mxu1 }
 0x379   : > { %v4656_v29 = vadd.f32 %v4655_v44, %v4543_v60  ;;  %v4569_v60 = vadd.f32 %v8398_v10, %v8412_v43 }
 0x37a   : > { %v4657_v22 = vpop.f32.mrf.mxu1 }
 0x37b   : > { %v4658_v62 = vadd.f32 %v4657_v22, %v4545_v20  ;;  %v4766_v25 = vmul.f32 0.01, %v4656_v29  ;;  %vm4734_vm5 = vcmp.gt.f32.partialorder %v4656_v29, 0.0 }
 0x37c   : > { %v4659_v17 = vpop.f32.mrf.mxu1 }
 0x37d   : > { %v4660_v55 = vadd.f32 %v4659_v17, %v4547_v26  ;;  %v4767_v7 = vmul.f32 0.01, %v4658_v62  ;;  %vm4735_vm4 = vcmp.gt.f32.partialorder %v4658_v62, 0.0  ;;  %v4798_v3 = vsel %vm4734_vm5, %v4656_v29, %v4766_v25 }
 0x37e   : > { %v4661_v8 = vpop.f32.mrf.mxu1 }
 0x37f   : > { %vm4736_vm3 = vcmp.gt.f32.partialorder %v4660_v55, 0.0  ;;  %v4768_v40 = vmul.f32 0.01, %v4660_v55  ;;  %v4662_v28 = vadd.f32 %v4661_v8, %v4549_v14  ;;  %v4799_v0 = vsel %vm4735_vm4, %v4658_v62, %v4767_v7 }
 0x380   : > { %v4665_v46 = vpop.f32.mrf.mxu1  ;;  %v4575_v8 = vadd.f32 %v8402_v42, %v8412_v43  ;;  %v4573_v7 = vadd.f32 %v8400_v51, %v8415_v52 }
 0x381   : > { %vm4737_vm6 = vcmp.gt.f32.partialorder %v4662_v28, 0.0  ;;  %v4769_v9 = vmul.f32 0.01, %v4662_v28  ;;  %v4800_v6 = vsel %vm4736_vm3, %v4660_v55, %v4768_v40  ;;  %v4666_v30 = vadd.f32 %v4665_v46, %v4553_v50  ;;  %v8450_v40 = vpop.f32.mrf.mxu0 }
 0x382   : > { %v4667_v13 = vpop.f32.mrf.mxu1  ;;  %v4830_v4 = vpack.c.bf16 %v4800_v6, %v4798_v3  ;;  %v4577_v46 = vadd.f32 %v8404_v48, %v8415_v52 }
 0x383   : > { %v4668_v24 = vadd.f32 %v4667_v13, %v4555_v61  ;;  %v4801_v2 = vsel %vm4737_vm6, %v4662_v28, %v4769_v9  ;;  %v4770_v56 = vmul.f32 0.01, %v4666_v30  ;;  %vm4738_vm9 = vcmp.gt.f32.partialorder %v4666_v30, 0.0  ;;  %v8456_v51 = vpop.f32.mrf.mxu0 }
 0x384   : > { %v4669_v45 = vpop.f32.mrf.mxu1  ;;  %v4831_v11 = vpack.c.bf16 %v4801_v2, %v4799_v0 }
 0x385   : > { %v4670_v5 = vadd.f32 %v4669_v45, %v4557_v19  ;;  %v4771_v33 = vmul.f32 0.01, %v4668_v24  ;;  %vm4739_vm8 = vcmp.gt.f32.partialorder %v4668_v24, 0.0  ;;  %v4802_v12 = vsel %vm4738_vm9, %v4666_v30, %v4770_v56 }
 0x386   : > { %v4671_v54 = vpop.f32.mrf.mxu1  ;;  %5013 = vmatprep.mubr.bf16.mxu0 %v4831_v11 }
 0x387   : > { %vm4740_vm7 = vcmp.gt.f32.partialorder %v4670_v5, 0.0  ;;  %v4772_v36 = vmul.f32 0.01, %v4670_v5  ;;  %v4672_v58 = vadd.f32 %v4671_v54, %v4559_v1  ;;  %5014 = vmatmul.mubr.bf16.vlgmr.msra.gmra.mxu0 %v4830_v4  ;;  %v4803_v16 = vsel %vm4739_vm8, %v4668_v24, %v4771_v33  ;;  %v4604_v54 = vpop.f32.mrf.mxu0 }
 0x388   : > { %v4675_v23 = vpop.f32.mrf.mxu1  ;;  %v4579_v24 = vadd.f32 %v8406_v38, %v8412_v43  ;;  %v4585_v4 = vadd.f32 %v8421_v57, %v8412_v43  ;;  %v4589_v57 = vadd.f32 %v8429_v31, %v8412_v43  ;;  %v4593_v31 = vadd.f32 %v8433_v35, %v8415_v52 }
 0x389   : > { %vm4741_vm10 = vcmp.gt.f32.partialorder %v4672_v58, 0.0  ;;  %v4773_v49 = vmul.f32 0.01, %v4672_v58  ;;  %v4804_v41 = vsel %vm4740_vm7, %v4670_v5, %v4772_v36  ;;  %v4676_v44 = vadd.f32 %v4675_v23, %v4563_v39 }
 0x38a   : > { %v4677_v63 = vpop.f32.mrf.mxu1  ;;  %v4832_v22 = vpack.c.bf16 %v4804_v41, %v4802_v12  ;;  %v4583_v5 = vadd.f32 %v8417_v15, %v8415_v52 }
 0x38b   : > { %v4678_v34 = vadd.f32 %v4677_v63, %v4565_v21  ;;  %v4805_v18 = vsel %vm4741_vm10, %v4672_v58, %v4773_v49  ;;  %v4774_v14 = vmul.f32 0.01, %v4676_v44  ;;  %vm4742_vm13 = vcmp.gt.f32.partialorder %v4676_v44, 0.0 }
 0x38c   : > { %v4679_v20 = vpop.f32.mrf.mxu1  ;;  %v4833_v27 = vpack.c.bf16 %v4805_v18, %v4803_v16  ;;  %v4587_v58 = vadd.f32 %v8425_v53, %v8415_v52  ;;  %v4606_v16 = vpop.f32.mrf.mxu0 }
 0x38d   : > { %v4680_v26 = vadd.f32 %v4679_v20, %v4567_v59  ;;  %v4775_v29 = vmul.f32 0.01, %v4678_v34  ;;  %vm4743_vm12 = vcmp.gt.f32.partialorder %v4678_v34, 0.0  ;;  %v4806_v6 = vsel %vm4742_vm13, %v4676_v44, %v4774_v14 }
 0x38e   : > { %v4681_v62 = vpop.f32.mrf.mxu1  ;;  %5021 = vmatprep.mubr.bf16.mxu0 %v4833_v27  ;;  %v4595_v27 = vadd.f32 %v8438_v32, %v8412_v43  ;;  %v4599_v32 = vadd.f32 %v8450_v40, %v8412_v43  ;;  %v4603_v40 = vadd.f32 %v8456_v51, %v8415_v52 }
 0x38f   : > { %vm4744_vm11 = vcmp.gt.f32.partialorder %v4680_v26, 0.0  ;;  %v4776_v17 = vmul.f32 0.01, %v4680_v26  ;;  %v4682_v37 = vadd.f32 %v4681_v62, %v4569_v60  ;;  %5022 = vmatmul.mubr.bf16.gmra.mxu0 %v4832_v22  ;;  %v4807_v9 = vsel %vm4743_vm12, %v4678_v34, %v4775_v29  ;;  %v4608_v22 = vpop.f32.mrf.mxu0 }
 0x390   : > { %v4685_v55 = vpop.f32.mrf.mxu1  ;;  %v4597_v29 = vadd.f32 %v8444_v47, %v8415_v52 }
 0x391   : > { %vm4745_vm14 = vcmp.gt.f32.partialorder %v4682_v37, 0.0  ;;  %v4777_v10 = vmul.f32 0.01, %v4682_v37  ;;  %v4808_v28 = vsel %vm4744_vm11, %v4680_v26, %v4776_v17  ;;  %v4686_v13 = vadd.f32 %v4685_v55, %v4573_v7 }
 0x392   : > { %v4687_v25 = vpop.f32.mrf.mxu1  ;;  %v4834_v0 = vpack.c.bf16 %v4808_v28, %v4806_v6 }
 0x393   : > { %v4688_v61 = vadd.f32 %v4687_v25, %v4575_v8  ;;  %v4809_v50 = vsel %vm4745_vm14, %v4682_v37, %v4777_v10  ;;  %v4778_v11 = vmul.f32 0.01, %v4686_v13  ;;  %vm4746_vm1 = vcmp.gt.f32.partialorder %v4686_v13, 0.0 }
 0x394   : > { %v4689_v19 = vpop.f32.mrf.mxu1  ;;  %v4835_v42 = vpack.c.bf16 %v4809_v50, %v4807_v9 }
 0x395   : > { %v4690_v2 = vadd.f32 %v4689_v19, %v4577_v46  ;;  %v4779_v30 = vmul.f32 0.01, %v4688_v61  ;;  %vm4747_vm0 = vcmp.gt.f32.partialorder %v4688_v61, 0.0  ;;  %v4810_v49 = vsel %vm4746_vm1, %v4686_v13, %v4778_v11  ;;  %v4612_v46 = vpop.f32.mrf.mxu0 }
 0x396   : > { %v4691_v3 = vpop.f32.mrf.mxu1  ;;  %5029 = vmatprep.mubr.bf16.mxu0 %v4835_v42  ;;  %v4605_v13 = vadd.f32 %v4604_v54, %v8412_v43 }
 0x397   : > { %vm4748_vm15 = vcmp.gt.f32.partialorder %v4690_v2, 0.0  ;;  %v4780_v45 = vmul.f32 0.01, %v4690_v2  ;;  %v4692_v48 = vadd.f32 %v4691_v3, %v4579_v24  ;;  %5030 = vmatmul.mubr.bf16.gmra.mxu0 %v4834_v0  ;;  %v4811_v23 = vsel %vm4747_vm0, %v4688_v61, %v4779_v30  ;;  %v4614_v42 = vpop.f32.mrf.mxu0 }
 0x398   : > { %v4695_v1 = vpop.f32.mrf.mxu1 }
 0x399   : > { %vm4749_vm2 = vcmp.gt.f32.partialorder %v4692_v48, 0.0  ;;  %v4781_v38 = vmul.f32 0.01, %v4692_v48  ;;  %v4812_v33 = vsel %vm4748_vm15, %v4690_v2, %v4780_v45  ;;  %v4696_v39 = vadd.f32 %v4695_v1, %v4583_v5 }
 0x39a   : > { %v4697_v36 = vpop.f32.mrf.mxu1  ;;  %v4836_v59 = vpack.c.bf16 %v4812_v33, %v4810_v49  ;;  %v4607_v2 = vadd.f32 %v4606_v16, %v8415_v52  ;;  %v4616_v33 = vpop.f32.mrf.mxu0  ;;  %v4615_v49 = vadd.f32 %v4614_v42, %v8412_v43 }
 0x39b   : > { %v4698_v56 = vadd.f32 %v4697_v36, %v4585_v4  ;;  %v4813_v21 = vsel %vm4749_vm2, %v4692_v48, %v4781_v38  ;;  %v4782_v53 = vmul.f32 0.01, %v4696_v39  ;;  %vm4750_vm5 = vcmp.gt.f32.partialorder %v4696_v39, 0.0 }
 0x39c   : > { %v4699_v41 = vpop.f32.mrf.mxu1  ;;  %v4837_v63 = vpack.c.bf16 %v4813_v21, %v4811_v23  ;;  %v4609_v38 = vadd.f32 %v4608_v22, %v8412_v43 }
 0x39d   : > { %v4700_v34 = vadd.f32 %v4699_v41, %v4587_v58  ;;  %v4783_v18 = vmul.f32 0.01, %v4698_v56  ;;  %vm4751_vm4 = vcmp.gt.f32.partialorder %v4698_v56, 0.0  ;;  %v4814_v55 = vsel %vm4750_vm5, %v4696_v39, %v4782_v53 }
 0x39e   : > { %v4701_v15 = vpop.f32.mrf.mxu1  ;;  %5037 = vmatprep.mubr.bf16.mxu0 %v4837_v63  ;;  %v4613_v41 = vadd.f32 %v4612_v46, %v8415_v52  ;;  %v4618_v63 = vpop.f32.mrf.mxu0 }
 0x39f   : > { %vm4752_vm3 = vcmp.gt.f32.partialorder %v4700_v34, 0.0  ;;  %v4784_v12 = vmul.f32 0.01, %v4700_v34  ;;  %v4702_v44 = vadd.f32 %v4701_v15, %v4589_v57  ;;  %5038 = vmatmul.mubr.bf16.gmra.mxu0 %v4836_v59  ;;  %v4815_v37 = vsel %vm4751_vm4, %v4698_v56, %v4783_v18 }
 0x3a0   : > { %v4705_v20 = vpop.f32.mrf.mxu1 }
 0x3a1   : > { %vm4753_vm6 = vcmp.gt.f32.partialorder %v4702_v44, 0.0  ;;  %v4785_v60 = vmul.f32 0.01, %v4702_v44  ;;  %v4816_v26 = vsel %vm4752_vm3, %v4700_v34, %v4784_v12  ;;  %v4706_v8 = vadd.f32 %v4705_v20, %v4593_v31 }
 0x3a2   : > { %v4707_v62 = vpop.f32.mrf.mxu1  ;;  %v4838_v28 = vpack.c.bf16 %v4816_v26, %v4814_v55  ;;  %v4617_v34 = vadd.f32 %v4616_v33, %v8415_v52 }
 0x3a3   : > { %v4708_v17 = vadd.f32 %v4707_v62, %v4595_v27  ;;  %v4817_v14 = vsel %vm4753_vm6, %v4702_v44, %v4785_v60  ;;  %v4786_v47 = vmul.f32 0.01, %v4706_v8  ;;  %vm4754_vm9 = vcmp.gt.f32.partialorder %v4706_v8, 0.0 }
 0x3a4   : > { %v4709_v10 = vpop.f32.mrf.mxu1  ;;  %v4839_v7 = vpack.c.bf16 %v4817_v14, %v4815_v37  ;;  %v4619_v27 = vadd.f32 %v4618_v63, %v8412_v43 }
 0x3a5   : > { %v4710_v25 = vadd.f32 %v4709_v10, %v4597_v29  ;;  %v4787_v61 = vmul.f32 0.01, %v4708_v17  ;;  %vm4755_vm8 = vcmp.gt.f32.partialorder %v4708_v17, 0.0  ;;  %v4818_v48 = vsel %vm4754_vm9, %v4706_v8, %v4786_v47 }
 0x3a6   : > { %v4711_v35 = vpop.f32.mrf.mxu1  ;;  %5045 = vmatprep.mubr.bf16.mxu0 %v4839_v7 }
 0x3a7   : > { %vm4756_vm7 = vcmp.gt.f32.partialorder %v4710_v25, 0.0  ;;  %v4788_v9 = vmul.f32 0.01, %v4710_v25  ;;  %v4712_v50 = vadd.f32 %v4711_v35, %v4599_v32  ;;  %5046 = vmatmul.mubr.bf16.gmra.mxu0 %v4838_v28  ;;  %v4819_v30 = vsel %vm4755_vm8, %v4708_v17, %v4787_v61  ;;  %v8486_v32 = vld [vmem:[%s8538_s8] ss:$0 sm:$0xff] }
 0x3a8   : > { %v4715_v6 = vpop.f32.mrf.mxu1 }
 0x3a9   : > { %vm4757_vm10 = vcmp.gt.f32.partialorder %v4712_v50, 0.0  ;;  %v4789_v19 = vmul.f32 0.01, %v4712_v50  ;;  %v4820_v24 = vsel %vm4756_vm7, %v4710_v25, %v4788_v9  ;;  %v4716_v11 = vadd.f32 %v4715_v6, %v4603_v40 }
 0x3aa   : > { %v4717_v0 = vpop.f32.mrf.mxu1  ;;  %v4840_v5 = vpack.c.bf16 %v4820_v24, %v4818_v48 }
 0x3ab   : > { %v4718_v3 = vadd.f32 %v4717_v0, %v4605_v13  ;;  %v4821_v45 = vsel %vm4757_vm10, %v4712_v50, %v4789_v19  ;;  %v4790_v23 = vmul.f32 0.01, %v4716_v11  ;;  %vm4758_vm13 = vcmp.gt.f32.partialorder %v4716_v11, 0.0 }
 0x3ac   : > { %v4719_v1 = vpop.f32.mrf.mxu1  ;;  %v4841_v4 = vpack.c.bf16 %v4821_v45, %v4819_v30 }
 0x3ad   : > { %v4720_v54 = vadd.f32 %v4719_v1, %v4607_v2  ;;  %v4791_v51 = vmul.f32 0.01, %v4718_v3  ;;  %vm4759_vm12 = vcmp.gt.f32.partialorder %v4718_v3, 0.0  ;;  %v4822_v12 = vsel %vm4758_vm13, %v4716_v11, %v4790_v23 }
 0x3ae   : > { %v4721_v36 = vpop.f32.mrf.mxu1  ;;  %5053 = vmatprep.mubr.bf16.mxu0 %v4841_v4 }
 0x3af   : > { %vm4760_vm11 = vcmp.gt.f32.partialorder %v4720_v54, 0.0  ;;  %v4792_v58 = vmul.f32 0.01, %v4720_v54  ;;  %v4722_v56 = vadd.f32 %v4721_v36, %v4609_v38  ;;  %5054 = vmatmul.mubr.bf16.gmra.mxu0 %v4840_v5  ;;  %v4823_v15 = vsel %vm4759_vm12, %v4718_v3, %v4791_v51 }
 0x3b0   : > { %v4725_v21 = vpop.f32.mrf.mxu1 }
 0x3b1   : > { %vm4761_vm14 = vcmp.gt.f32.partialorder %v4722_v56, 0.0  ;;  %v4793_v39 = vmul.f32 0.01, %v4722_v56  ;;  %v4824_v57 = vsel %vm4760_vm11, %v4720_v54, %v4792_v58  ;;  %v4726_v44 = vadd.f32 %v4725_v21, %v4613_v41 }
 0x3b2   : > { %v4727_v59 = vpop.f32.mrf.mxu1  ;;  %v4842_v60 = vpack.c.bf16 %v4824_v57, %v4822_v12 }
 0x3b3   : > { %v4728_v16 = vadd.f32 %v4727_v59, %v4615_v49  ;;  %v4825_v18 = vsel %vm4761_vm14, %v4722_v56, %v4793_v39  ;;  %v4794_v17 = vmul.f32 0.01, %v4726_v44  ;;  %vm4762_vm1 = vcmp.gt.f32.partialorder %v4726_v44, 0.0 }
 0x3b4   : > { %v4729_v53 = vpop.f32.mrf.mxu1  ;;  %v4843_v20 = vpack.c.bf16 %v4825_v18, %v4823_v15 }
 0x3b5   : > { %v4730_v31 = vadd.f32 %v4729_v53, %v4617_v34  ;;  %v4795_v26 = vmul.f32 0.01, %v4728_v16  ;;  %vm4763_vm0 = vcmp.gt.f32.partialorder %v4728_v16, 0.0  ;;  %v4826_v8 = vsel %vm4762_vm1, %v4726_v44, %v4794_v17 }
 0x3b6   : > { %v4731_v22 = vpop.f32.mrf.mxu1  ;;  %5061 = vmatprep.mubr.bf16.mxu0 %v4843_v20 }
 0x3b7   : > { %vm4764_vm15 = vcmp.gt.f32.partialorder %v4730_v31, 0.0  ;;  %v4796_v62 = vmul.f32 0.01, %v4730_v31  ;;  %v4732_v29 = vadd.f32 %v4731_v22, %v4619_v27  ;;  %5062 = vmatmul.mubr.bf16.gmra.mxu0 %v4842_v60  ;;  %v4827_v14 = vsel %vm4763_vm0, %v4728_v16, %v4795_v26 }
 0x3b9   : > { %vm4765_vm2 = vcmp.gt.f32.partialorder %v4732_v29, 0.0  ;;  %v4797_v52 = vmul.f32 0.01, %v4732_v29  ;;  %v4828_v37 = vsel %vm4764_vm15, %v4730_v31, %v4796_v62 }
 0x3ba   : > { %v4844_v43 = vpack.c.bf16 %v4828_v37, %v4826_v8 }
 0x3bb   : > { %v4829_v55 = vsel %vm4765_vm2, %v4732_v29, %v4797_v52 }
 0x3bc   : > { %v4845_v10 = vpack.c.bf16 %v4829_v55, %v4827_v14 }
 0x3be   : > { %5069 = vmatprep.mubr.bf16.mxu0 %v4845_v10 }
 0x3bf   : > { %5070 = vmatmul.mubr.bf16.gmra.mxu0 %v4844_v43 }
 0x447   : > { %v5676_v7 = vpop.f32.mrf.mxu0 }
 0x449   : > { %v5677_v28 = vpop.f32.mrf.mxu0 }
 0x44a   : > { %v5678_v25 = vadd.f32 %v5677_v28, %v5676_v7 }
 0x44b   : > { %v5679_v46 = vpop.f32.mrf.mxu0 }
 0x44c   : > { %v5016_v35 = vadd.f32 %v5678_v25, %v8486_v32 }
 0x44d   : > { %v5680_v61 = vpop.f32.mrf.mxu0 }
 0x44e   : > { %v5078_v9 = vsub.f32 0.0, %v5016_v35  ;;  %v5681_v50 = vadd.f32 %v5680_v61, %v5679_v46 }
 0x44f   : > { %v5682_v47 = vpop.f32.mrf.mxu0 }
 0x450   : > { %v5094_v6 = vmul.f32 1.442695, %v5078_v9  ;;  %v5019_v13 = vadd.f32 %v5681_v50, %v8486_v32 }
 0x451   : > { %v5683_v19 = vpop.f32.mrf.mxu0 }
 0x452   : > { %6257 = vpow2.f32 %v5094_v6  ;;  %v5079_v40 = vsub.f32 0.0, %v5019_v13  ;;  %v5684_v42 = vadd.f32 %v5683_v19, %v5682_v47 }
 0x453   : > { %v5685_v24 = vpop.f32.mrf.mxu0 }
 0x454   : > { %v5096_v0 = vmul.f32 1.442695, %v5079_v40  ;;  %v5024_v2 = vadd.f32 %v5684_v42, %v8486_v32 }
 0x455   : > { %v5686_v3 = vpop.f32.mrf.mxu0 }
 0x456   : > { %6259 = vpow2.f32 %v5096_v0  ;;  %v5080_v30 = vsub.f32 0.0, %v5024_v2  ;;  %v5687_v45 = vadd.f32 %v5686_v3, %v5685_v24 }
 0x457   : > { %v5688_v48 = vpop.f32.mrf.mxu0 }
 0x458   : > { %v5098_v11 = vmul.f32 1.442695, %v5080_v30  ;;  %v5027_v1 = vadd.f32 %v5687_v45, %v8486_v32 }
 0x459   : > { %v5689_v4 = vpop.f32.mrf.mxu0 }
 0x45a   : > { %6261 = vpow2.f32 %v5098_v11  ;;  %v5081_v38 = vsub.f32 0.0, %v5027_v1  ;;  %v5690_v5 = vadd.f32 %v5689_v4, %v5688_v48 }
 0x45b   : > { %v5691_v54 = vpop.f32.mrf.mxu0 }
 0x45c   : > { %v5100_v33 = vmul.f32 1.442695, %v5081_v38  ;;  %v5032_v36 = vadd.f32 %v5690_v5, %v8486_v32 }
 0x45d   : > { %v5692_v51 = vpop.f32.mrf.mxu0 }
 0x45e   : > { %6263 = vpow2.f32 %v5100_v33  ;;  %v5082_v58 = vsub.f32 0.0, %v5032_v36  ;;  %v5693_v56 = vadd.f32 %v5692_v51, %v5691_v54 }
 0x45f   : > { %v6258_v23 = vpop.eup %6257  ;;  %v5694_v21 = vpop.f32.mrf.mxu0 }
 0x460   : > { %v5126_v49 = vadd.f32 1.0, %v6258_v23  ;;  %v5102_v39 = vmul.f32 1.442695, %v5082_v58  ;;  %v5035_v41 = vadd.f32 %v5693_v56, %v8486_v32 }
 0x461   : > { %v5695_v63 = vpop.f32.mrf.mxu0 }
 0x462   : > { %6265 = vrcp.f32 %v5126_v49  ;;  %v5083_v57 = vsub.f32 0.0, %v5035_v41  ;;  %v5696_v59 = vadd.f32 %v5695_v63, %v5694_v21 }
 0x463   : > { %v6260_v34 = vpop.eup %6259  ;;  %6267 = vpow2.f32 %v5102_v39  ;;  %v5697_v16 = vpop.f32.mrf.mxu0 }
 0x464   : > { %v5127_v15 = vadd.f32 1.0, %v6260_v34  ;;  %v5104_v18 = vmul.f32 1.442695, %v5083_v57  ;;  %v5040_v12 = vadd.f32 %v5696_v59, %v8486_v32 }
 0x465   : > { %v5698_v44 = vpop.f32.mrf.mxu0 }
 0x466   : > { %6269 = vrcp.f32 %v5127_v15  ;;  %v5084_v53 = vsub.f32 0.0, %v5040_v12  ;;  %v5699_v20 = vadd.f32 %v5698_v44, %v5697_v16 }
 0x467   : > { %v6262_v27 = vpop.eup %6261  ;;  %6271 = vpow2.f32 %v5104_v18  ;;  %v5700_v60 = vpop.f32.mrf.mxu0 }
 0x468   : > { %v5128_v31 = vadd.f32 1.0, %v6262_v27  ;;  %v5106_v22 = vmul.f32 1.442695, %v5084_v53  ;;  %v5043_v26 = vadd.f32 %v5699_v20, %v8486_v32 }
 0x469   : > { %v5701_v62 = vpop.f32.mrf.mxu0 }
 0x46a   : > { %6273 = vrcp.f32 %v5128_v31  ;;  %v5085_v29 = vsub.f32 0.0, %v5043_v26  ;;  %v5702_v17 = vadd.f32 %v5701_v62, %v5700_v60 }
 0x46b   : > { %v6264_v52 = vpop.eup %6263  ;;  %6275 = vpow2.f32 %v5106_v22  ;;  %v5703_v37 = vpop.f32.mrf.mxu0 }
 0x46c   : > { %v5129_v14 = vadd.f32 1.0, %v6264_v52  ;;  %v5108_v55 = vmul.f32 1.442695, %v5085_v29  ;;  %v5048_v8 = vadd.f32 %v5702_v17, %v8486_v32 }
 0x46d   : > { %v5704_v10 = vpop.f32.mrf.mxu0 }
 0x46e   : > { %6277 = vrcp.f32 %v5129_v14  ;;  %v5086_v43 = vsub.f32 0.0, %v5048_v8  ;;  %v5705_v7 = vadd.f32 %v5704_v10, %v5703_v37 }
 0x46f   : > { %v6266_v28 = vpop.eup %6265  ;;  %6279 = vpow2.f32 %v5108_v55  ;;  %v5706_v25 = vpop.f32.mrf.mxu0 }
 0x470   : > { %v6268_v46 = vpop.eup %6267  ;;  %5174 = vst [vmem:[%s8502_s17] sm:$0xff] %v6266_v28  ;;  %v5110_v35 = vmul.f32 1.442695, %v5086_v43  ;;  %v5051_v61 = vadd.f32 %v5705_v7, %v8486_v32 }
 0x471   : > { %v5130_v9 = vadd.f32 1.0, %v6268_v46  ;;  %v5707_v50 = vpop.f32.mrf.mxu0 }
 0x472   : > { %6281 = vpow2.f32 %v5110_v35  ;;  %v5087_v47 = vsub.f32 0.0, %v5051_v61  ;;  %v5708_v6 = vadd.f32 %v5707_v50, %v5706_v25 }
 0x473   : > { %v6270_v13 = vpop.eup %6269  ;;  %6283 = vrcp.f32 %v5130_v9  ;;  %v5709_v19 = vpop.f32.mrf.mxu0 }
 0x474   : > { %v6272_v40 = vpop.eup %6271  ;;  %5175 = vst [vmem:[%s8502_s17 + $0x8] sm:$0xff] %v6270_v13  ;;  %v5112_v42 = vmul.f32 1.442695, %v5087_v47  ;;  %v5056_v24 = vadd.f32 %v5708_v6, %v8486_v32 }
 0x475   : > { %v5131_v0 = vadd.f32 1.0, %v6272_v40  ;;  %v5710_v2 = vpop.f32.mrf.mxu0 }
 0x476   : > { %6285 = vpow2.f32 %v5112_v42  ;;  %v5088_v3 = vsub.f32 0.0, %v5056_v24  ;;  %v5711_v30 = vadd.f32 %v5710_v2, %v5709_v19 }
 0x477   : > { %v6274_v45 = vpop.eup %6273  ;;  %6287 = vrcp.f32 %v5131_v0  ;;  %v5712_v48 = vpop.f32.mrf.mxu0 }
 0x478   : > { %v6276_v11 = vpop.eup %6275  ;;  %5176 = vst [vmem:[%s8502_s17 + $0x10] sm:$0xff] %v6274_v45  ;;  %v5114_v1 = vmul.f32 1.442695, %v5088_v3  ;;  %v5059_v4 = vadd.f32 %v5711_v30, %v8486_v32 }
 0x479   : > { %v5132_v38 = vadd.f32 1.0, %v6276_v11  ;;  %v5713_v5 = vpop.f32.mrf.mxu0 }
 0x47a   : > { %6289 = vpow2.f32 %v5114_v1  ;;  %v5089_v54 = vsub.f32 0.0, %v5059_v4  ;;  %v5714_v33 = vadd.f32 %v5713_v5, %v5712_v48 }
 0x47b   : > { %v6278_v36 = vpop.eup %6277  ;;  %6291 = vrcp.f32 %v5132_v38  ;;  %v5715_v51 = vpop.f32.mrf.mxu0 }
 0x47c   : > { %v6280_v58 = vpop.eup %6279  ;;  %5177 = vst [vmem:[%s8502_s17 + $0x18] sm:$0xff] %v6278_v36  ;;  %v5116_v56 = vmul.f32 1.442695, %v5089_v54  ;;  %v5064_v23 = vadd.f32 %v5714_v33, %v8486_v32 }
 0x47d   : > { %v5133_v21 = vadd.f32 1.0, %v6280_v58  ;;  %v5716_v49 = vpop.f32.mrf.mxu0 }
 0x47e   : > { %6293 = vpow2.f32 %v5116_v56  ;;  %v5090_v39 = vsub.f32 0.0, %v5064_v23  ;;  %v5717_v41 = vadd.f32 %v5716_v49, %v5715_v51 }
 0x47f   : > { %v6282_v63 = vpop.eup %6281  ;;  %6295 = vrcp.f32 %v5133_v21  ;;  %v5718_v57 = vpop.f32.mrf.mxu0 }
 0x480   : > { %v6284_v59 = vpop.eup %6283  ;;  %v5134_v34 = vadd.f32 1.0, %v6282_v63  ;;  %v5118_v16 = vmul.f32 1.442695, %v5090_v39  ;;  %v5067_v15 = vadd.f32 %v5717_v41, %v8486_v32 }
 0x481   : > { %5178 = vst [vmem:[%s8502_s17 + $0x20] sm:$0xff] %v6284_v59  ;;  %v5719_v18 = vpop.f32.mrf.mxu0 }
 0x482   : > { %6297 = vrcp.f32 %v5134_v34  ;;  %v5091_v12 = vsub.f32 0.0, %v5067_v15  ;;  %v5720_v44 = vadd.f32 %v5719_v18, %v5718_v57 }
 0x483   : > { %v6286_v53 = vpop.eup %6285  ;;  %6299 = vpow2.f32 %v5118_v16  ;;  %v5721_v20 = vpop.f32.mrf.mxu0 }
 0x484   : > { %v6288_v27 = vpop.eup %6287  ;;  %v5135_v60 = vadd.f32 1.0, %v6286_v53  ;;  %v5120_v31 = vmul.f32 1.442695, %v5091_v12  ;;  %v5072_v22 = vadd.f32 %v5720_v44, %v8486_v32 }
 0x485   : > { %5179 = vst [vmem:[%s8502_s17 + $0x28] sm:$0xff] %v6288_v27  ;;  %v5722_v26 = vpop.f32.mrf.mxu0 }
 0x486   : > { %6301 = vrcp.f32 %v5135_v60  ;;  %v5092_v62 = vsub.f32 0.0, %v5072_v22  ;;  %v5723_v29 = vadd.f32 %v5722_v26, %v5721_v20 }
 0x487   : > { %v6290_v17 = vpop.eup %6289  ;;  %6303 = vpow2.f32 %v5120_v31 }
 0x488   : > { %v6292_v52 = vpop.eup %6291  ;;  %v5136_v37 = vadd.f32 1.0, %v6290_v17  ;;  %v5122_v14 = vmul.f32 1.442695, %v5092_v62  ;;  %v5075_v55 = vadd.f32 %v5723_v29, %v8486_v32 }
 0x489   : > { %5180 = vst [vmem:[%s8502_s17 + $0x30] sm:$0xff] %v6292_v52 }
 0x48a   : > { %6305 = vrcp.f32 %v5136_v37  ;;  %v5093_v8 = vsub.f32 0.0, %v5075_v55 }
 0x48b   : > { %v6294_v10 = vpop.eup %6293  ;;  %6307 = vpow2.f32 %v5122_v14 }
 0x48c   : > { %v6296_v43 = vpop.eup %6295  ;;  %v5137_v7 = vadd.f32 1.0, %v6294_v10  ;;  %v5124_v28 = vmul.f32 1.442695, %v5093_v8 }
 0x48d   : > { %5181 = vst [vmem:[%s8502_s17 + $0x38] sm:$0xff] %v6296_v43 }
 0x48e   : > { %6309 = vrcp.f32 %v5137_v7 }
 0x48f   : > { %v6298_v25 = vpop.eup %6297  ;;  %6311 = vpow2.f32 %v5124_v28 }
 0x490   : > { %v6300_v46 = vpop.eup %6299  ;;  %5182 = vst [vmem:[%s8502_s17 + $0x40] sm:$0xff] %v6298_v25 }
 0x491   : > { %v5138_v35 = vadd.f32 1.0, %v6300_v46 }
 0x493   : > { %v6302_v61 = vpop.eup %6301  ;;  %6313 = vrcp.f32 %v5138_v35 }
 0x494   : > { %v6304_v32 = vpop.eup %6303  ;;  %5183 = vst [vmem:[%s8502_s17 + $0x48] sm:$0xff] %v6302_v61 }
 0x495   : > { %v5139_v9 = vadd.f32 1.0, %v6304_v32 }
 0x497   : > { %v6306_v50 = vpop.eup %6305  ;;  %6315 = vrcp.f32 %v5139_v9 }
 0x498   : > { %v6308_v47 = vpop.eup %6307  ;;  %5184 = vst [vmem:[%s8502_s17 + $0x50] sm:$0xff] %v6306_v50 }
 0x499   : > { %v5140_v6 = vadd.f32 1.0, %v6308_v47 }
 0x49b   : > { %v6310_v13 = vpop.eup %6309  ;;  %6317 = vrcp.f32 %v5140_v6 }
 0x49c   : > { %v6312_v19 = vpop.eup %6311  ;;  %5185 = vst [vmem:[%s8502_s17 + $0x58] sm:$0xff] %v6310_v13 }
 0x49d   : > { %v5141_v40 = vadd.f32 1.0, %v6312_v19 }
 0x49f   : > { %6319 = vrcp.f32 %v5141_v40 }
 0x4a0   : > { %v6314_v42 = vpop.eup %6313 }
 0x4a1   : > { %5186 = vst [vmem:[%s8502_s17 + $0x60] sm:$0xff] %v6314_v42 }
 0x4a4   : > { %v6316_v24 = vpop.eup %6315 }
 0x4a5   : > { %5187 = vst [vmem:[%s8502_s17 + $0x68] sm:$0xff] %v6316_v24 }
 0x4a8   : > { %v6318_v0 = vpop.eup %6317 }
 0x4a9   : > { %5188 = vst [vmem:[%s8502_s17 + $0x70] sm:$0xff] %v6318_v0 }
 0x4ac   : > { %v6320_v2 = vpop.eup %6319 }
 0x4ad   : > { %5189 = vst [vmem:[%s8502_s17 + $0x78] sm:$0xff] %v6320_v2 }
 0x4ae PF: > { %s21_s30 = sadd.s32 1, %s6387_s30  }
 0x4af   : > { %p18_p3 = scmp.ge.s32.totalorder %s21_s30, 4  }
 0x4b1   :  { %20 = sbr.rel (!%p18_p3) target bundleno = 2 (0x2), region = 95 }
 0x4b6   :  { %5212 = vsyncpa [#allocation3], 1 }
 0x4b7   :  { %5214 = vsyncpa [#allocation3 + $0x1], 1 }
 0x4b8   :  { %5215 = vsyncpa [#allocation5], 1 }

</bundles_post_ra>
